<compile_context>
chip_gen: v5e
topology: v5e:2x2
jax: 0.10.0
libtpu: 0.0.40
codegen_flags: <defaults>
</compile_context>

<pallas_src>
import jax
import jax.numpy as jnp
from jax.experimental import pallas as pl
from jax.experimental.pallas import tpu as pltpu


# ----------------------------------------------------------------------------
# Kernel 1: per-point MLP (1x1 convs) + running max over the point axis.
# Grid: (B // Bc, n_split, steps_per_split).  Innermost axis is the point-chunk
# reduction (output block resident); the two outer axes are parallel.
# ----------------------------------------------------------------------------
def _point_mlp_kernel(x_ref,
                      w1_ref, b1_ref, w2_ref, b2_ref, w3_ref, b3_ref,
                      w4_ref, b4_ref, w5_ref, b5_ref,
                      g_ref):
    n_step = pl.program_id(2)

    x = x_ref[...]                               # (Bc, n_chunk, C) f32
    bc, nc, c = x.shape
    h = x.reshape(bc * nc, c)                    # pack batch rows into M

    def layer(h, w_ref, b_ref, relu=True):
        # bf16 MXU operands, f32 accumulation; bias add + ReLU stay in f32.
        y = jnp.dot(h.astype(jnp.bfloat16), w_ref[...],
                    preferred_element_type=jnp.float32) + b_ref[...]
        return jnp.maximum(y, 0.0) if relu else y

    h = layer(h, w1_ref, b1_ref)                 # (M, 64)
    h = layer(h, w2_ref, b2_ref)                 # (M, 64)
    h = layer(h, w3_ref, b3_ref)                 # (M, 64)
    h = layer(h, w4_ref, b4_ref)                 # (M, 128)
    h = layer(h, w5_ref, b5_ref, relu=False)     # (M, 1024) f32, no ReLU (matches torch)

    feat = h.shape[-1]
    chunk_max = jnp.max(h.reshape(bc, nc, feat), axis=1)   # (Bc, 1024)

    # Output block is resident across the innermost axis -> accumulate the
    # running max directly into it (no scratch, no finalize copy).
    @pl.when(n_step == 0)
    def _():
        g_ref[0] = chunk_max

    @pl.when(n_step > 0)
    def _():
        g_ref[0] = jnp.maximum(g_ref[0], chunk_max)


# ----------------------------------------------------------------------------
# Kernel 2: combine partial maxes + batched FC head (1024 -> 512 -> z_dim).
# ----------------------------------------------------------------------------
def _fc_head_kernel(g_ref, wf1_ref, bf1_ref, wf2_ref, bf2_ref, out_ref):
    g = jnp.max(g_ref[...], axis=0)              # (bm, 1024) f32 (combine n_split)
    f = jnp.dot(g.astype(jnp.bfloat16), wf1_ref[...],
                preferred_element_type=jnp.float32) + bf1_ref[...]
    f = jnp.maximum(f, 0.0)                      # (bm, 512)
    z = jnp.dot(f.astype(jnp.bfloat16), wf2_ref[...],
                preferred_element_type=jnp.float32) + bf2_ref[...]
    out_ref[...] = z.astype(out_ref.dtype)


# ----------------------------------------------------------------------------
# Tiling policy
# ----------------------------------------------------------------------------
def _divisors_desc(n):
    return [d for d in range(n, 0, -1) if n % d == 0]


def _pick_point_tiles(B, N, target_m=2048):
    """Pick (Bc, n_chunk) so Bc * n_chunk ~ target_m MXU rows (v7x-safe VMEM)."""
    if N <= target_m:
        n_chunk = N
    else:
        n_chunk = N
        for pref in (256, 8):  # prefer full 256-row MXU multiples, then sublane multiples
            cands = [d for d in _divisors_desc(N) if d <= target_m and d % pref == 0]
            if cands:
                n_chunk = cands[0]
                break
    want = max(1, target_m // n_chunk)
    Bc = next((d for d in _divisors_desc(B) if d <= want), 1)
    return Bc, n_chunk


def prepare_params(params):
    """One-time dtype prep: bf16 weights for the MXU, f32 (1, Cout) biases."""
    out = {}
    for k, v in params.items():
        if k.startswith("w"):
            out[k] = jnp.asarray(v, jnp.bfloat16)
        else:
            out[k] = jnp.asarray(v, jnp.float32).reshape(1, -1)
    return out


# ----------------------------------------------------------------------------
# Wrapper
# ----------------------------------------------------------------------------
def encoder_forward(x, params, *, n_chunk=None, batch_chunk=None, n_split=None,
                    target_m=2048):
    """x: (B, N, C) float32.  params: weights (Cin, Cout), biases (Cout,)/(1, Cout)."""
    B, N, C = x.shape
    p = prepare_params(params)   # no-op copies if already prepared

    feat = p["w5"].shape[1]      # 1024
    z_dim = p["wf2"].shape[1]

    bc_auto, nchunk_auto = _pick_point_tiles(B, N, target_m)
    Bc = batch_chunk if batch_chunk is not None else bc_auto
    nchunk = n_chunk if n_chunk is not None else nchunk_auto
    if B % Bc != 0:
        Bc = 1
    if N % nchunk != 0:
        nchunk = N
    n_steps = N // nchunk

    # v7x second-TensorCore helper: if only one parallel batch block exists,
    # split the point axis into 2 independent partial maxes.
    if n_split is None:
        n_split = 2 if (B // Bc) == 1 and n_steps >= 2 and n_steps % 2 == 0 else 1
    if n_steps % n_split != 0:
        n_split = 1
    steps_per_split = n_steps // n_split

    mlp_args = [p["w1"], p["b1"], p["w2"], p["b2"], p["w3"], p["b3"],
                p["w4"], p["b4"], p["w5"], p["b5"]]

    def const_spec(arr):
        nd = arr.ndim
        return pl.BlockSpec(arr.shape, lambda bi, s, n, _nd=nd: (0,) * _nd)

    in_specs = [pl.BlockSpec(
        (Bc, nchunk, C),
        lambda bi, s, n, _sp=steps_per_split: (bi, s * _sp + n, 0))]
    in_specs += [const_spec(a) for a in mlp_args]

    flops = 2 * B * N * (C * 64 + 64 * 64 + 64 * 64 + 64 * 128 + 128 * feat)
    bytes_accessed = int(x.size) * x.dtype.itemsize \
        + sum(int(a.size) * a.dtype.itemsize for a in mlp_args) \
        + int(B * n_split * feat * 4)

    g_partial = pl.pallas_call(
        _point_mlp_kernel,
        out_shape=jax.ShapeDtypeStruct((n_split, B, feat), jnp.float32),
        grid_spec=pltpu.PrefetchScalarGridSpec(
            num_scalar_prefetch=0,
            grid=(B // Bc, n_split, steps_per_split),
            in_specs=in_specs,
            out_specs=pl.BlockSpec((1, Bc, feat), lambda bi, s, n: (s, bi, 0)),
        ),
        compiler_params=pltpu.CompilerParams(
            dimension_semantics=("parallel", "parallel", "arbitrary"),
            vmem_limit_bytes=32 * 1024 * 1024,
        ),
        cost_estimate=pl.CostEstimate(
            flops=flops, transcendentals=0, bytes_accessed=bytes_accessed),
    )(x, *mlp_args)

    # ---- FC head: batched over the pooled slab, batch-tiled for large B ----
    bm = B
    if B > 256:
        bm = next((d for d in _divisors_desc(B) if d <= 256 and d % 8 == 0), B)
    head_args = [p["wf1"], p["bf1"], p["wf2"], p["bf2"]]

    def head_const_spec(arr):
        nd = arr.ndim
        return pl.BlockSpec(arr.shape, lambda i, _nd=nd: (0,) * _nd)

    z = pl.pallas_call(
        _fc_head_kernel,
        out_shape=jax.ShapeDtypeStruct((B, z_dim), jnp.float32),
        grid_spec=pltpu.PrefetchScalarGridSpec(
            num_scalar_prefetch=0,
            grid=(B // bm,),
            in_specs=[pl.BlockSpec((n_split, bm, feat), lambda i: (0, i, 0))]
                     + [head_const_spec(a) for a in head_args],
            out_specs=pl.BlockSpec((bm, z_dim), lambda i: (i, 0)),
        ),
        compiler_params=pltpu.CompilerParams(
            dimension_semantics=("parallel",),
            vmem_limit_bytes=32 * 1024 * 1024,
        ),
    )(g_partial, *head_args)
    return z


# ----------------------------------------------------------------------------
# Parameter init (matches the PyTorch module's parameter shapes)
# ----------------------------------------------------------------------------
def init_params(key, channel=3, z_dim=256):
    """Conv1d(Cin,Cout,1) weight (Cout,Cin,1) stored transposed as (Cin,Cout);
    Linear(in,out) weight (out,in) stored as (in,out).  Biases as (1,Cout)."""
    dims = [
        ("w1", "b1", channel, 64),
        ("w2", "b2", 64, 64),
        ("w3", "b3", 64, 64),
        ("w4", "b4", 64, 128),
        ("w5", "b5", 128, 1024),
        ("wf1", "bf1", 1024, 512),
        ("wf2", "bf2", 512, z_dim),
    ]
    params = {}
    for wname, bname, cin, cout in dims:
        key, kw, kb = jax.random.split(key, 3)
        bound = 1.0 / (cin ** 0.5)  # PyTorch default uniform(-1/sqrt(fan_in), ...)
        params[wname] = jax.random.uniform(kw, (cin, cout), jnp.float32, -bound, bound)
        params[bname] = jax.random.uniform(kb, (1, cout), jnp.float32, -bound, bound)
    return params


# ----------------------------------------------------------------------------
# Pure-JAX references (f32 and bf16-operand-matched) for correctness checking
# ----------------------------------------------------------------------------
def encoder_ref(x, params, *, bf16=False):
    def mm(a, w):
        if bf16:
            a = a.astype(jnp.bfloat16)
            w = w.astype(jnp.bfloat16)
        return jnp.einsum("...i,io->...o", a, w, preferred_element_type=jnp.float32)

    h = x
    for w, b in [("w1", "b1"), ("w2", "b2"), ("w3", "b3"), ("w4", "b4")]:
        h = jnp.maximum(mm(h, params[w]) + params[b], 0.0)
    h = mm(h, params["w5"]) + params["b5"]          # (B, N, 1024), no ReLU
    g = jnp.max(h, axis=1)                          # (B, 1024)   (== max_pool1d)
    f = jnp.maximum(mm(g, params["wf1"]) + params["bf1"], 0.0)
    return mm(f, params["wf2"]) + params["bf2"]


if __name__ == "__main__":
    key = jax.random.PRNGKey(0)
    key, kx = jax.random.split(key)

    B, N, channel, z_dim = 4, 64, 3, 256
    x = jax.random.normal(kx, (B, N, channel), jnp.float32)
    params = init_params(key, channel=channel, z_dim=z_dim)
    pparams = prepare_params(params)   # one-time bf16/f32 cast (hoisted out of forward)

    # 1) Auto tiling: whole point cloud + full batch packed into one grid step.
    out_auto = jax.block_until_ready(encoder_forward(x, pparams))

    # 2) Forced small tiles: exercises the running-max accumulation across point
    #    chunks, batch-block packing, and the 2-way point-axis split.
    out_tiled = jax.block_until_ready(
        encoder_forward(x, pparams, n_chunk=16, batch_chunk=2, n_split=2))

    ref_bf16 = encoder_ref(x, params, bf16=True)    # bf16-operand / f32-acc matched
    ref_f32 = encoder_ref(x, params, bf16=False)    # full-precision sanity check

    for out in (out_auto, out_tiled):
        assert out.shape == (B, z_dim)
        assert jnp.allclose(out, ref_bf16, atol=1e-3, rtol=1e-3), \
            "mismatch vs bf16-matched reference"
        assert jnp.allclose(out, ref_f32, atol=1e-1, rtol=1e-1), \
            "mismatch vs f32 reference"

    print("KERNEL_OK")
</pallas_src>

<mosaic_0001>
module attributes {stable_mosaic.version = 11 : i64} {
  func.func @_point_mlp_kernel(%arg0: i32, %arg1: i32, %arg2: i32, %arg3: memref<4x64x3xf32, #tpu.memory_space<vmem>>, %arg4: memref<3x64xbf16, #tpu.memory_space<vmem>>, %arg5: memref<1x64xf32, #tpu.memory_space<vmem>>, %arg6: memref<64x64xbf16, #tpu.memory_space<vmem>>, %arg7: memref<1x64xf32, #tpu.memory_space<vmem>>, %arg8: memref<64x64xbf16, #tpu.memory_space<vmem>>, %arg9: memref<1x64xf32, #tpu.memory_space<vmem>>, %arg10: memref<64x128xbf16, #tpu.memory_space<vmem>>, %arg11: memref<1x128xf32, #tpu.memory_space<vmem>>, %arg12: memref<128x1024xbf16, #tpu.memory_space<vmem>>, %arg13: memref<1x1024xf32, #tpu.memory_space<vmem>>, %arg14: memref<1x4x1024xf32, #tpu.memory_space<vmem>>) attributes {dimension_semantics = [#tpu.dimension_semantics<parallel>, #tpu.dimension_semantics<parallel>, #tpu.dimension_semantics<arbitrary>], iteration_bounds = array<i64: 1, 1, 1>, scalar_prefetch = 0 : i64, scratch_operands = 0 : i64, tpu.core_type = #tpu.core_type<tc>, window_params = [{transform_indices = @transform_0, window_bounds = array<i64: 4, 64, 3>}, {pipeline_mode = #tpu.pipeline_mode<synchronous>, transform_indices = @transform_1, window_bounds = array<i64: 3, 64>}, {pipeline_mode = #tpu.pipeline_mode<synchronous>, transform_indices = @transform_2, window_bounds = array<i64: 1, 64>}, {pipeline_mode = #tpu.pipeline_mode<synchronous>, transform_indices = @transform_3, window_bounds = array<i64: 64, 64>}, {pipeline_mode = #tpu.pipeline_mode<synchronous>, transform_indices = @transform_4, window_bounds = array<i64: 1, 64>}, {pipeline_mode = #tpu.pipeline_mode<synchronous>, transform_indices = @transform_5, window_bounds = array<i64: 64, 64>}, {pipeline_mode = #tpu.pipeline_mode<synchronous>, transform_indices = @transform_6, window_bounds = array<i64: 1, 64>}, {pipeline_mode = #tpu.pipeline_mode<synchronous>, transform_indices = @transform_7, window_bounds = array<i64: 64, 128>}, {pipeline_mode = #tpu.pipeline_mode<synchronous>, transform_indices = @transform_8, window_bounds = array<i64: 1, 128>}, {pipeline_mode = #tpu.pipeline_mode<synchronous>, transform_indices = @transform_9, window_bounds = array<i64: 128, 1024>}, {pipeline_mode = #tpu.pipeline_mode<synchronous>, transform_indices = @transform_10, window_bounds = array<i64: 1, 1024>}, {transform_indices = @transform_11, window_bounds = array<i64: 1, 4, 1024>}]} {
    %c0 = arith.constant 0 : index
    %c0_0 = arith.constant 0 : index
    %c0_1 = arith.constant 0 : index
    %0 = vector.load %arg3[%c0, %c0_0, %c0_1] : memref<4x64x3xf32, #tpu.memory_space<vmem>>, vector<4x64x3xf32>
    %1 = vector.shape_cast %0 : vector<4x64x3xf32> to vector<256x3xf32>
    %2 = arith.truncf %1 : vector<256x3xf32> to vector<256x3xbf16>
    %c0_2 = arith.constant 0 : index
    %c0_3 = arith.constant 0 : index
    %3 = vector.load %arg4[%c0_2, %c0_3] : memref<3x64xbf16, #tpu.memory_space<vmem>>, vector<3x64xbf16>
    %cst = arith.constant dense<0.000000e+00> : vector<256x64xf32>
    %4 = tpu.matmul %2, %3, %cst {dimension_numbers = #tpu.dot_dimension_numbers<[1], [0], [0], [1], [0, 0, 1, 1], [], []>} : vector<256x3xbf16>, vector<3x64xbf16>, vector<256x64xf32> -> vector<256x64xf32>
    %c0_4 = arith.constant 0 : index
    %c0_5 = arith.constant 0 : index
    %5 = vector.load %arg5[%c0_4, %c0_5] : memref<1x64xf32, #tpu.memory_space<vmem>>, vector<1x64xf32>
    %6 = vector.broadcast %5 : vector<1x64xf32> to vector<256x64xf32>
    %7 = arith.addf %4, %6 : vector<256x64xf32>
    %cst_6 = arith.constant 0.000000e+00 : f32
    %8 = vector.broadcast %cst_6 : f32 to vector<256x64xf32>
    %9 = arith.maximumf %7, %8 : vector<256x64xf32>
    %10 = arith.truncf %9 : vector<256x64xf32> to vector<256x64xbf16>
    %c0_7 = arith.constant 0 : index
    %c0_8 = arith.constant 0 : index
    %11 = vector.load %arg6[%c0_7, %c0_8] : memref<64x64xbf16, #tpu.memory_space<vmem>>, vector<64x64xbf16>
    %cst_9 = arith.constant dense<0.000000e+00> : vector<256x64xf32>
    %12 = tpu.matmul %10, %11, %cst_9 {dimension_numbers = #tpu.dot_dimension_numbers<[1], [0], [0], [1], [0, 0, 1, 1], [], []>} : vector<256x64xbf16>, vector<64x64xbf16>, vector<256x64xf32> -> vector<256x64xf32>
    %c0_10 = arith.constant 0 : index
    %c0_11 = arith.constant 0 : index
    %13 = vector.load %arg7[%c0_10, %c0_11] : memref<1x64xf32, #tpu.memory_space<vmem>>, vector<1x64xf32>
    %14 = vector.broadcast %13 : vector<1x64xf32> to vector<256x64xf32>
    %15 = arith.addf %12, %14 : vector<256x64xf32>
    %cst_12 = arith.constant 0.000000e+00 : f32
    %16 = vector.broadcast %cst_12 : f32 to vector<256x64xf32>
    %17 = arith.maximumf %15, %16 : vector<256x64xf32>
    %18 = arith.truncf %17 : vector<256x64xf32> to vector<256x64xbf16>
    %c0_13 = arith.constant 0 : index
    %c0_14 = arith.constant 0 : index
    %19 = vector.load %arg8[%c0_13, %c0_14] : memref<64x64xbf16, #tpu.memory_space<vmem>>, vector<64x64xbf16>
    %cst_15 = arith.constant dense<0.000000e+00> : vector<256x64xf32>
    %20 = tpu.matmul %18, %19, %cst_15 {dimension_numbers = #tpu.dot_dimension_numbers<[1], [0], [0], [1], [0, 0, 1, 1], [], []>} : vector<256x64xbf16>, vector<64x64xbf16>, vector<256x64xf32> -> vector<256x64xf32>
    %c0_16 = arith.constant 0 : index
    %c0_17 = arith.constant 0 : index
    %21 = vector.load %arg9[%c0_16, %c0_17] : memref<1x64xf32, #tpu.memory_space<vmem>>, vector<1x64xf32>
    %22 = vector.broadcast %21 : vector<1x64xf32> to vector<256x64xf32>
    %23 = arith.addf %20, %22 : vector<256x64xf32>
    %cst_18 = arith.constant 0.000000e+00 : f32
    %24 = vector.broadcast %cst_18 : f32 to vector<256x64xf32>
    %25 = arith.maximumf %23, %24 : vector<256x64xf32>
    %26 = arith.truncf %25 : vector<256x64xf32> to vector<256x64xbf16>
    %c0_19 = arith.constant 0 : index
    %c0_20 = arith.constant 0 : index
    %27 = vector.load %arg10[%c0_19, %c0_20] : memref<64x128xbf16, #tpu.memory_space<vmem>>, vector<64x128xbf16>
    %cst_21 = arith.constant dense<0.000000e+00> : vector<256x128xf32>
    %28 = tpu.matmul %26, %27, %cst_21 {dimension_numbers = #tpu.dot_dimension_numbers<[1], [0], [0], [1], [0, 0, 1, 1], [], []>} : vector<256x64xbf16>, vector<64x128xbf16>, vector<256x128xf32> -> vector<256x128xf32>
    %c0_22 = arith.constant 0 : index
    %c0_23 = arith.constant 0 : index
    %29 = vector.load %arg11[%c0_22, %c0_23] : memref<1x128xf32, #tpu.memory_space<vmem>>, vector<1x128xf32>
    %30 = vector.broadcast %29 : vector<1x128xf32> to vector<256x128xf32>
    %31 = arith.addf %28, %30 : vector<256x128xf32>
    %cst_24 = arith.constant 0.000000e+00 : f32
    %32 = vector.broadcast %cst_24 : f32 to vector<256x128xf32>
    %33 = arith.maximumf %31, %32 : vector<256x128xf32>
    %34 = arith.truncf %33 : vector<256x128xf32> to vector<256x128xbf16>
    %c0_25 = arith.constant 0 : index
    %c0_26 = arith.constant 0 : index
    %35 = vector.load %arg12[%c0_25, %c0_26] : memref<128x1024xbf16, #tpu.memory_space<vmem>>, vector<128x1024xbf16>
    %cst_27 = arith.constant dense<0.000000e+00> : vector<256x1024xf32>
    %36 = tpu.matmul %34, %35, %cst_27 {dimension_numbers = #tpu.dot_dimension_numbers<[1], [0], [0], [1], [0, 0, 1, 1], [], []>} : vector<256x128xbf16>, vector<128x1024xbf16>, vector<256x1024xf32> -> vector<256x1024xf32>
    %c0_28 = arith.constant 0 : index
    %c0_29 = arith.constant 0 : index
    %37 = vector.load %arg13[%c0_28, %c0_29] : memref<1x1024xf32, #tpu.memory_space<vmem>>, vector<1x1024xf32>
    %38 = vector.broadcast %37 : vector<1x1024xf32> to vector<256x1024xf32>
    %39 = arith.addf %36, %38 : vector<256x1024xf32>
    %40 = vector.shape_cast %39 : vector<256x1024xf32> to vector<4x64x1024xf32>
    %cst_30 = arith.constant dense<0xFF800000> : vector<4x1024xf32>
    %41 = vector.multi_reduction <maximumf>, %40, %cst_30 [1] : vector<4x64x1024xf32> to vector<4x1024xf32>
    %c0_i32 = arith.constant 0 : i32
    %42 = arith.cmpi eq, %arg2, %c0_i32 : i32
    %43 = arith.extui %42 : i1 to i32
    %c0_i32_31 = arith.constant 0 : i32
    %44 = arith.cmpi ne, %43, %c0_i32_31 : i32
    scf.if %44 {
      %c0_34 = arith.constant 0 : index
      %c0_35 = arith.constant 0 : index
      %c0_36 = arith.constant 0 : index
      %48 = vector.load %arg14[%c0_34, %c0_35, %c0_36] : memref<1x4x1024xf32, #tpu.memory_space<vmem>>, vector<1x4x1024xf32>
      %49 = vector.shape_cast %48 : vector<1x4x1024xf32> to vector<4x1024xf32>
      %50 = vector.shape_cast %41 : vector<4x1024xf32> to vector<1x4x1024xf32>
      tpu.vector_store %arg14[%c0_34, %c0_35, %c0_36], %50 {strides = array<i32>} : memref<1x4x1024xf32, #tpu.memory_space<vmem>>, vector<1x4x1024xf32>,
    } else {
    }
    %c0_i32_32 = arith.constant 0 : i32
    %45 = arith.cmpi sgt, %arg2, %c0_i32_32 : i32
    %46 = arith.extui %45 : i1 to i32
    %c0_i32_33 = arith.constant 0 : i32
    %47 = arith.cmpi ne, %46, %c0_i32_33 : i32
    scf.if %47 {
      %c0_34 = arith.constant 0 : index
      %c0_35 = arith.constant 0 : index
      %c0_36 = arith.constant 0 : index
      %48 = vector.load %arg14[%c0_34, %c0_35, %c0_36] : memref<1x4x1024xf32, #tpu.memory_space<vmem>>, vector<1x4x1024xf32>
      %49 = vector.shape_cast %48 : vector<1x4x1024xf32> to vector<4x1024xf32>
      %50 = arith.maximumf %49, %41 : vector<4x1024xf32>
      %c0_37 = arith.constant 0 : index
      %c0_38 = arith.constant 0 : index
      %c0_39 = arith.constant 0 : index
      %51 = vector.load %arg14[%c0_37, %c0_38, %c0_39] : memref<1x4x1024xf32, #tpu.memory_space<vmem>>, vector<1x4x1024xf32>
      %52 = vector.shape_cast %51 : vector<1x4x1024xf32> to vector<4x1024xf32>
      %53 = vector.shape_cast %50 : vector<4x1024xf32> to vector<1x4x1024xf32>
      tpu.vector_store %arg14[%c0_37, %c0_38, %c0_39], %53 {strides = array<i32>} : memref<1x4x1024xf32, #tpu.memory_space<vmem>>, vector<1x4x1024xf32>,
    } else {
    }
    return
  }
  func.func @transform_0(%arg0: i32, %arg1: i32, %arg2: i32) -> (i32, i32, i32) {
    %c1_i32 = arith.constant 1 : i32
    %0 = arith.muli %arg1, %c1_i32 : i32
    %1 = arith.addi %0, %arg2 : i32
    %c0_i32 = arith.constant 0 : i32
    %c0_i32_0 = arith.constant 0 : i32
    return %arg0, %1, %c0_i32 : i32, i32, i32
  }
  func.func @transform_1(%arg0: i32, %arg1: i32, %arg2: i32) -> (i32, i32) {
    %c0_i32 = arith.constant 0 : i32
    %c0_i32_0 = arith.constant 0 : i32
    %c0_i32_1 = arith.constant 0 : i32
    return %c0_i32, %c0_i32_0 : i32, i32
  }
  func.func @transform_2(%arg0: i32, %arg1: i32, %arg2: i32) -> (i32, i32) {
    %c0_i32 = arith.constant 0 : i32
    %c0_i32_0 = arith.constant 0 : i32
    %c0_i32_1 = arith.constant 0 : i32
    return %c0_i32, %c0_i32_0 : i32, i32
  }
  func.func @transform_3(%arg0: i32, %arg1: i32, %arg2: i32) -> (i32, i32) {
    %c0_i32 = arith.constant 0 : i32
    %c0_i32_0 = arith.constant 0 : i32
    %c0_i32_1 = arith.constant 0 : i32
    return %c0_i32, %c0_i32_0 : i32, i32
  }
  func.func @transform_4(%arg0: i32, %arg1: i32, %arg2: i32) -> (i32, i32) {
    %c0_i32 = arith.constant 0 : i32
    %c0_i32_0 = arith.constant 0 : i32
    %c0_i32_1 = arith.constant 0 : i32
    return %c0_i32, %c0_i32_0 : i32, i32
  }
  func.func @transform_5(%arg0: i32, %arg1: i32, %arg2: i32) -> (i32, i32) {
    %c0_i32 = arith.constant 0 : i32
    %c0_i32_0 = arith.constant 0 : i32
    %c0_i32_1 = arith.constant 0 : i32
    return %c0_i32, %c0_i32_0 : i32, i32
  }
  func.func @transform_6(%arg0: i32, %arg1: i32, %arg2: i32) -> (i32, i32) {
    %c0_i32 = arith.constant 0 : i32
    %c0_i32_0 = arith.constant 0 : i32
    %c0_i32_1 = arith.constant 0 : i32
    return %c0_i32, %c0_i32_0 : i32, i32
  }
  func.func @transform_7(%arg0: i32, %arg1: i32, %arg2: i32) -> (i32, i32) {
    %c0_i32 = arith.constant 0 : i32
    %c0_i32_0 = arith.constant 0 : i32
    %c0_i32_1 = arith.constant 0 : i32
    return %c0_i32, %c0_i32_0 : i32, i32
  }
  func.func @transform_8(%arg0: i32, %arg1: i32, %arg2: i32) -> (i32, i32) {
    %c0_i32 = arith.constant 0 : i32
    %c0_i32_0 = arith.constant 0 : i32
    %c0_i32_1 = arith.constant 0 : i32
    return %c0_i32, %c0_i32_0 : i32, i32
  }
  func.func @transform_9(%arg0: i32, %arg1: i32, %arg2: i32) -> (i32, i32) {
    %c0_i32 = arith.constant 0 : i32
    %c0_i32_0 = arith.constant 0 : i32
    %c0_i32_1 = arith.constant 0 : i32
    return %c0_i32, %c0_i32_0 : i32, i32
  }
  func.func @transform_10(%arg0: i32, %arg1: i32, %arg2: i32) -> (i32, i32) {
    %c0_i32 = arith.constant 0 : i32
    %c0_i32_0 = arith.constant 0 : i32
    %c0_i32_1 = arith.constant 0 : i32
    return %c0_i32, %c0_i32_0 : i32, i32
  }
  func.func @transform_11(%arg0: i32, %arg1: i32, %arg2: i32) -> (i32, i32, i32) {
    %c0_i32 = arith.constant 0 : i32
    %c0_i32_0 = arith.constant 0 : i32
    return %arg1, %arg0, %c0_i32 : i32, i32, i32
  }
}

</mosaic_0001>

<bundles_post_ra>
// kernel: tpu_custom_call.1
= control target key start
LH: loop header
LB: loop body
LE: loop exit
PB: predicated region body
PF: predicated region fallthrough
CT: control target
= control target key end

     0   :  { %16 = vsyncpa [#allocation3], 0  ;;  %s4278_s0 = inlined_call_operand.vmem [shape: f32[4,64,3], index: 0, kind: input, shape index: {}]   ;;  %s4279_s1 = inlined_call_operand.vmem [shape: bf16[3,64], index: 1, kind: input, shape index: {}]   ;;  %s4280_s2 = inlined_call_operand.vmem [shape: f32[1,64], index: 2, kind: input, shape index: {}]   ;;  %s4281_s3 = inlined_call_operand.vmem [shape: bf16[64,64], index: 3, kind: input, shape index: {}]   ;;  %s4282_s4 = inlined_call_operand.vmem [shape: f32[1,64], index: 4, kind: input, shape index: {}]   ;;  %s4283_s5 = inlined_call_operand.vmem [shape: bf16[64,64], index: 5, kind: input, shape index: {}]   ;;  %s4284_s6 = inlined_call_operand.vmem [shape: f32[1,64], index: 6, kind: input, shape index: {}]   ;;  %s4285_s7 = inlined_call_operand.vmem [shape: bf16[64,128], index: 7, kind: input, shape index: {}]   ;;  %s4286_s8 = inlined_call_operand.vmem [shape: f32[1,128], index: 8, kind: input, shape index: {}]   ;;  %s4287_s9 = inlined_call_operand.hbm [shape: bf16[128,1024], index: 9, kind: input, shape index: {}]   ;;  %s4288_s10 = inlined_call_operand.vmem [shape: f32[1,1024], index: 10, kind: input, shape index: {}]   ;;  %s4289_s11 = inlined_call_operand.hbm [shape: f32[1,4,1024], index: 11, kind: output, shape index: {}]  }
   0x1   :  { %17 = vsyncpa [#allocation4], 0  ;;  %s48_s19 = sshll.u32 %s4287_s9, 4  ;;  %s3293_s20 = smov [#allocation2]   ;;  %s49_s19 = int_to_ptr.hbm [resolvable:$true] %s48_s19 }
   0x2   :  { %s50_s21 = sshll.u32 %s3293_s20, 4  ;;  %s3294_s22 = smov 512   ;;  %s51_s21 = int_to_ptr.vmem [resolvable:$true] %s50_s21 }
   0x3   :  { %s3295_s23 = smov 32  }
   0x4   :  { %56 = dma.hbm_to_vmem [thread:$0]  %s49_s19, 8192, %s51_s21, [#allocation3], %s3294_s22, %s3294_s22, %s3295_s23  }
   0x5   :  { %3289 = dma.done.wait [#allocation3], 8192  }
   0x6   :  { %3290 = vsyncadd [#allocation3], 4294959104  ;;  %vm180_vm0 = vcmask 1040384   ;;  %vm181_vm1 = vcmask 1041408   ;;  %v3296_v0 = vmov 65535   ;;  %v78_v4 = vld [vmem:[%s4278_s0] sm:$0xff] }
   0x7   :  { %v182_v1 = vsel %vm180_vm0, 4294967295, %v3296_v0  ;;  %v126_v3 = vld [vmem:[%s4279_s1] sm:$0x3]  ;;  %v79_v5 = vld [vmem:[%s4278_s0 + $0x8] sm:$0xff]  ;;  %vm131_vm2 = vcmask 23552   ;;  %v80_v8 = vld [vmem:[%s4278_s0 + $0x10] sm:$0xff] }
   0x8   :  { %v183_v2 = vsel %vm181_vm1, %v182_v1, 0  ;;  %v110_v7 = vpack.c.bf16 %v79_v5, %v78_v4  ;;  %v81_v9 = vld [vmem:[%s4278_s0 + $0x18] sm:$0xff]  ;;  %v82_v11 = vld [vmem:[%s4278_s0 + $0x20] sm:$0xff]  ;;  %v83_v12 = vld [vmem:[%s4278_s0 + $0x28] sm:$0xff]  ;;  %vm360_vm3 = vcmask 523264   ;;  %vm2570_vm4 = vcmask 1043456  }
   0x9   :  { %v185_v6 = vand.u32 %v183_v2, %v126_v3  ;;  %v111_v10 = vpack.c.bf16 %v81_v9, %v80_v8  ;;  %v112_v13 = vpack.c.bf16 %v83_v12, %v82_v11  ;;  %v84_v14 = vld [vmem:[%s4278_s0 + $0x30] sm:$0xff]  ;;  %v85_v15 = vld [vmem:[%s4278_s0 + $0x38] sm:$0xff]  ;;  %v86_v17 = vld [vmem:[%s4278_s0 + $0x40] sm:$0xff]  ;;  %vm2588_vm5 = vcmask 1041409   ;;  %s2771_s1 = sshll.u32 %s4289_s11, 4  ;;  %s2772_s1 = int_to_ptr.hbm [resolvable:$true] %s2771_s1 }
   0xa   :  { %v113_v16 = vpack.c.bf16 %v85_v15, %v84_v14  ;;  %v87_v18 = vld [vmem:[%s4278_s0 + $0x48] sm:$0xff]  ;;  %v88_v20 = vld [vmem:[%s4278_s0 + $0x50] sm:$0xff]  ;;  %v89_v21 = vld [vmem:[%s4278_s0 + $0x58] sm:$0xff]  ;;  %vm2590_vm6 = vcmask 1045509   ;;  %vm2593_vm7 = vcmask 1042434   ;;  %vm2595_vm8 = vcmask 1046534  }
   0xb   :  { %194 = vmatpush.bf16.msra.mxu0 %v185_v6  ;;  %v114_v19 = vpack.c.bf16 %v87_v18, %v86_v17  ;;  %v115_v22 = vpack.c.bf16 %v89_v21, %v88_v20  ;;  %v90_v23 = vld [vmem:[%s4278_s0 + $0x60] sm:$0xff]  ;;  %v91_v24 = vld [vmem:[%s4278_s0 + $0x68] sm:$0xff]  ;;  %v3158_v25 = vld [vmem:[%s4281_s3 + $0x18] sm:$0xff]  ;;  %vm2598_vm9 = vcmask 1043459   ;;  %vm2600_vm10 = vcmask 1047559  }
   0xc   :  { %v116_v26 = vpack.c.bf16 %v91_v24, %v90_v23  ;;  %413 = vmatpush.bf16.msra.mxu1 %v3158_v25  ;;  %v3157_v27 = vld [vmem:[%s4281_s3 + $0x10] sm:$0xff]  ;;  %v3156_v28 = vld [vmem:[%s4281_s3 + $0x8] sm:$0xff]  ;;  %v3155_v29 = vld [vmem:[%s4281_s3] sm:$0xff] }
   0xd   :  { %v92_v30 = vld [vmem:[%s4278_s0 + $0x70] sm:$0xff]  ;;  %v93_v31 = vld [vmem:[%s4278_s0 + $0x78] sm:$0xff]  ;;  %v94_v33 = vld [vmem:[%s4278_s0 + $0x80] sm:$0xff] }
   0xe   :  { %2787 = vmatmul.msk.bf16.vlgmr.msra.gmra.mxu0 %vm131_vm2, %v110_v7  ;;  %v117_v32 = vpack.c.bf16 %v93_v31, %v92_v30  ;;  %v95_v34 = vld [vmem:[%s4278_s0 + $0x88] sm:$0xff]  ;;  %v3441_v37 = vld [vmem:[%s4280_s2] ss:$0 sm:$0xff]  ;;  %v96_v43 = vld [vmem:[%s4278_s0 + $0x90] sm:$0xff] }
   0xf   :  { %v118_v35 = vpack.c.bf16 %v95_v34, %v94_v33  ;;  %v97_v44 = vld [vmem:[%s4278_s0 + $0x98] sm:$0xff]  ;;  %v98_v53 = vld [vmem:[%s4278_s0 + $0xa0] sm:$0xff]  ;;  %v99_v54 = vld [vmem:[%s4278_s0 + $0xa8] sm:$0xff] }
  0x10   :  { %414 = vmatpush.bf16.msra.mxu1 %v3157_v27  ;;  %v119_v46 = vpack.c.bf16 %v97_v44, %v96_v43  ;;  %v120_v56 = vpack.c.bf16 %v99_v54, %v98_v53  ;;  %v100_v63 = vld [vmem:[%s4278_s0 + $0xb0] sm:$0xff]  ;;  %v101_v0 = vld [vmem:[%s4278_s0 + $0xb8] sm:$0xff]  ;;  %v102_v9 = vld [vmem:[%s4278_s0 + $0xc0] sm:$0xff] }
  0x11   :  { %v121_v2 = vpack.c.bf16 %v101_v0, %v100_v63  ;;  %v105_v20 = vld [vmem:[%s4278_s0 + $0xd8] sm:$0xff]  ;;  %v107_v30 = vld [vmem:[%s4278_s0 + $0xe8] sm:$0xff]  ;;  %v3161_v44 = vld [vmem:[%s4283_s5 + $0x10] sm:$0xff] }
  0x12   :  { %v3534_v63 = vld [vmem:[%s4282_s4] ss:$0 sm:$0xff] }
  0x14   :  { %415 = vmatpush.bf16.msra.mxu1 %v3156_v28 }
  0x18   :  { %416 = vmatpush.bf16.msra.mxu1 %v3155_v29  ;;  %v106_v29 = vld [vmem:[%s4278_s0 + $0xe0] sm:$0xff] }
  0x1e   :  { %2788 = vmatmul.msk.bf16.gmra.mxu0 %vm131_vm2, %v111_v10  ;;  %v103_v10 = vld [vmem:[%s4278_s0 + $0xc8] sm:$0xff] }
  0x1f   :  { %v122_v12 = vpack.c.bf16 %v103_v10, %v102_v9 }
  0x2e   :  { %2789 = vmatmul.msk.bf16.gmra.mxu0 %vm131_vm2, %v112_v13 }
  0x3e   :  { %2790 = vmatmul.msk.bf16.gmra.mxu0 %vm131_vm2, %v113_v16 }
  0x4e   :  { %2791 = vmatmul.msk.bf16.gmra.mxu0 %vm131_vm2, %v114_v19  ;;  %v104_v19 = vld [vmem:[%s4278_s0 + $0xd0] sm:$0xff] }
  0x5e   :  { %2792 = vmatmul.msk.bf16.gmra.mxu0 %vm131_vm2, %v115_v22  ;;  %v123_v22 = vpack.c.bf16 %v105_v20, %v104_v19 }
  0x6e   :  { %2793 = vmatmul.msk.bf16.gmra.mxu0 %vm131_vm2, %v116_v26 }
  0x7e   :  { %2794 = vmatmul.msk.bf16.gmra.mxu0 %vm131_vm2, %v117_v32  ;;  %v124_v32 = vpack.c.bf16 %v107_v30, %v106_v29 }
  0x8b   :  { %v196_v36 = vpop.f32.mrf.mxu0 }
  0x8c   :  { %v197_v38 = vadd.f32 %v3441_v37, %v196_v36 }
  0x8e   :  { %2795 = vmatmul.msk.bf16.gmra.mxu0 %vm131_vm2, %v118_v35  ;;  %v276_v41 = vmax.f32 %v197_v38, 0.0  ;;  %v3162_v38 = vld [vmem:[%s4283_s5 + $0x18] sm:$0xff] }
  0x8f   :  { %634 = vmatpush.bf16.msra.mxu2 %v3162_v38 }
  0x93   :  { %v198_v39 = vpop.f32.mrf.mxu0  ;;  %635 = vmatpush.bf16.msra.mxu2 %v3161_v44 }
  0x94   :  { %v199_v40 = vadd.f32 %v3441_v37, %v198_v39 }
  0x96   :  { %v277_v42 = vmax.f32 %v199_v40, 0.0 }
  0x98   :  { %v308_v45 = vpack.c.bf16 %v277_v42, %v276_v41  ;;  %v108_v41 = vld [vmem:[%s4278_s0 + $0xf0] sm:$0xff]  ;;  %v109_v42 = vld [vmem:[%s4278_s0 + $0xf8] sm:$0xff] }
  0x9a   :  { %2819 = vmatmul.msk.bf16.vlgmr.msra.gmra.mxu1 %vm360_vm3, %v308_v45  ;;  %v125_v45 = vpack.c.bf16 %v109_v42, %v108_v41 }
  0x9b   :  { %v201_v47 = vpop.f32.mrf.mxu0 }
  0x9c   :  { %v202_v48 = vadd.f32 %v3441_v37, %v201_v47  ;;  %v3160_v47 = vld [vmem:[%s4283_s5 + $0x8] sm:$0xff] }
  0x9d   :  { %636 = vmatpush.bf16.msra.mxu2 %v3160_v47 }
  0x9e   :  { %2796 = vmatmul.msk.bf16.gmra.mxu0 %vm131_vm2, %v119_v46  ;;  %v278_v51 = vmax.f32 %v202_v48, 0.0  ;;  %v3159_v48 = vld [vmem:[%s4283_s5] sm:$0xff] }
  0xa1   :  { %637 = vmatpush.bf16.msra.mxu2 %v3159_v48 }
  0xa3   :  { %v203_v49 = vpop.f32.mrf.mxu0 }
  0xa4   :  { %v204_v50 = vadd.f32 %v3441_v37, %v203_v49 }
  0xa6   :  { %v279_v52 = vmax.f32 %v204_v50, 0.0 }
  0xa8   :  { %v309_v55 = vpack.c.bf16 %v279_v52, %v278_v51 }
  0xaa   :  { %2820 = vmatmul.msk.bf16.gmra.mxu1 %vm360_vm3, %v309_v55 }
  0xab   :  { %v206_v57 = vpop.f32.mrf.mxu0 }
  0xac   :  { %v207_v58 = vadd.f32 %v3441_v37, %v206_v57 }
  0xae   :  { %2797 = vmatmul.msk.bf16.gmra.mxu0 %vm131_vm2, %v120_v56  ;;  %v280_v61 = vmax.f32 %v207_v58, 0.0 }
  0xb3   :  { %v208_v59 = vpop.f32.mrf.mxu0 }
  0xb4   :  { %v209_v60 = vadd.f32 %v3441_v37, %v208_v59 }
  0xb6   :  { %v281_v62 = vmax.f32 %v209_v60, 0.0 }
  0xb8   :  { %v310_v1 = vpack.c.bf16 %v281_v62, %v280_v61 }
  0xba   :  { %2821 = vmatmul.msk.bf16.gmra.mxu1 %vm360_vm3, %v310_v1 }
  0xbb   :  { %v211_v3 = vpop.f32.mrf.mxu0 }
  0xbc   :  { %v212_v4 = vadd.f32 %v3441_v37, %v211_v3 }
  0xbe   :  { %2798 = vmatmul.msk.bf16.gmra.mxu0 %vm131_vm2, %v121_v2  ;;  %v282_v7 = vmax.f32 %v212_v4, 0.0 }
  0xc3   :  { %v213_v5 = vpop.f32.mrf.mxu0 }
  0xc4   :  { %v214_v6 = vadd.f32 %v3441_v37, %v213_v5 }
  0xc6   :  { %v283_v8 = vmax.f32 %v214_v6, 0.0 }
  0xc8   :  { %v311_v11 = vpack.c.bf16 %v283_v8, %v282_v7 }
  0xca   :  { %2822 = vmatmul.msk.bf16.gmra.mxu1 %vm360_vm3, %v311_v11 }
  0xcb   :  { %v216_v13 = vpop.f32.mrf.mxu0 }
  0xcc   :  { %v217_v14 = vadd.f32 %v3441_v37, %v216_v13 }
  0xce   :  { %2799 = vmatmul.msk.bf16.gmra.mxu0 %vm131_vm2, %v122_v12  ;;  %v284_v17 = vmax.f32 %v217_v14, 0.0 }
  0xd3   :  { %v218_v15 = vpop.f32.mrf.mxu0 }
  0xd4   :  { %v219_v16 = vadd.f32 %v3441_v37, %v218_v15 }
  0xd6   :  { %v285_v18 = vmax.f32 %v219_v16, 0.0 }
  0xd8   :  { %v312_v21 = vpack.c.bf16 %v285_v18, %v284_v17 }
  0xda   :  { %2823 = vmatmul.msk.bf16.gmra.mxu1 %vm360_vm3, %v312_v21 }
  0xdb   :  { %v221_v23 = vpop.f32.mrf.mxu0 }
  0xdc   :  { %v222_v24 = vadd.f32 %v3441_v37, %v221_v23 }
  0xde   :  { %2800 = vmatmul.msk.bf16.gmra.mxu0 %vm131_vm2, %v123_v22  ;;  %v286_v27 = vmax.f32 %v222_v24, 0.0 }
  0xe3   :  { %v223_v25 = vpop.f32.mrf.mxu0 }
  0xe4   :  { %v224_v26 = vadd.f32 %v3441_v37, %v223_v25 }
  0xe6   :  { %v287_v28 = vmax.f32 %v224_v26, 0.0 }
  0xe8   :  { %v313_v31 = vpack.c.bf16 %v287_v28, %v286_v27 }
  0xea   :  { %2824 = vmatmul.msk.bf16.gmra.mxu1 %vm360_vm3, %v313_v31 }
  0xeb   :  { %v226_v33 = vpop.f32.mrf.mxu0 }
  0xec   :  { %v227_v34 = vadd.f32 %v3441_v37, %v226_v33 }
  0xee   :  { %2801 = vmatmul.msk.bf16.gmra.mxu0 %vm131_vm2, %v124_v32  ;;  %v288_v39 = vmax.f32 %v227_v34, 0.0 }
  0xf3   :  { %v228_v35 = vpop.f32.mrf.mxu0 }
  0xf4   :  { %v229_v36 = vadd.f32 %v3441_v37, %v228_v35 }
  0xf6   :  { %v289_v40 = vmax.f32 %v229_v36, 0.0 }
  0xf8   :  { %v314_v43 = vpack.c.bf16 %v289_v40, %v288_v39 }
  0xfa   :  { %2825 = vmatmul.msk.bf16.gmra.mxu1 %vm360_vm3, %v314_v43 }
  0xfb   :  { %v231_v46 = vpop.f32.mrf.mxu0 }
  0xfc   :  { %v232_v49 = vadd.f32 %v3441_v37, %v231_v46 }
  0xfe   :  { %2802 = vmatmul.msk.bf16.gmra.mxu0 %vm131_vm2, %v125_v45  ;;  %v290_v52 = vmax.f32 %v232_v49, 0.0 }
 0x103   :  { %v233_v50 = vpop.f32.mrf.mxu0 }
 0x104   :  { %v234_v51 = vadd.f32 %v3441_v37, %v233_v50 }
 0x106   :  { %v291_v53 = vmax.f32 %v234_v51, 0.0 }
 0x108   :  { %v315_v54 = vpack.c.bf16 %v291_v53, %v290_v52 }
 0x10a   :  { %2826 = vmatmul.msk.bf16.gmra.mxu1 %vm360_vm3, %v315_v54 }
 0x10b   :  { %v236_v55 = vpop.f32.mrf.mxu0 }
 0x10c   :  { %v237_v56 = vadd.f32 %v3441_v37, %v236_v55 }
 0x10e   :  { %v292_v59 = vmax.f32 %v237_v56, 0.0 }
 0x113   :  { %v238_v57 = vpop.f32.mrf.mxu0 }
 0x114   :  { %v239_v58 = vadd.f32 %v3441_v37, %v238_v57 }
 0x116   :  { %v293_v60 = vmax.f32 %v239_v58, 0.0 }
 0x117   :  { %v418_v61 = vpop.f32.mrf.mxu1 }
 0x118   :  { %v316_v62 = vpack.c.bf16 %v293_v60, %v292_v59  ;;  %v419_v1 = vadd.f32 %v3534_v63, %v418_v61 }
 0x11a   :  { %2827 = vmatmul.msk.bf16.gmra.mxu1 %vm360_vm3, %v316_v62  ;;  %v498_v4 = vmax.f32 %v419_v1, 0.0 }
 0x11b   :  { %v241_v0 = vpop.f32.mrf.mxu0 }
 0x11c   :  { %v242_v5 = vadd.f32 %v3441_v37, %v241_v0 }
 0x11e   :  { %v294_v10 = vmax.f32 %v242_v5, 0.0 }
 0x11f   :  { %v420_v2 = vpop.f32.mrf.mxu1 }
 0x120   :  { %v421_v3 = vadd.f32 %v3534_v63, %v420_v2 }
 0x122   :  { %v499_v6 = vmax.f32 %v421_v3, 0.0 }
 0x123   :  { %v243_v7 = vpop.f32.mrf.mxu0 }
 0x124   :  { %v244_v8 = vadd.f32 %v3441_v37, %v243_v7  ;;  %v530_v9 = vpack.c.bf16 %v499_v6, %v498_v4 }
 0x126   :  { %v295_v11 = vmax.f32 %v244_v8, 0.0  ;;  %2851 = vmatmul.msk.bf16.vlgmr.msra.gmra.mxu2 %vm360_vm3, %v530_v9 }
 0x127   :  { %v423_v12 = vpop.f32.mrf.mxu1 }
 0x128   :  { %v317_v13 = vpack.c.bf16 %v295_v11, %v294_v10  ;;  %v424_v15 = vadd.f32 %v3534_v63, %v423_v12 }
 0x12a   :  { %2828 = vmatmul.msk.bf16.gmra.mxu1 %vm360_vm3, %v317_v13  ;;  %v500_v18 = vmax.f32 %v424_v15, 0.0 }
 0x12b   :  { %v246_v14 = vpop.f32.mrf.mxu0 }
 0x12c   :  { %v247_v19 = vadd.f32 %v3441_v37, %v246_v14 }
 0x12e   :  { %v296_v24 = vmax.f32 %v247_v19, 0.0 }
 0x12f   :  { %v425_v16 = vpop.f32.mrf.mxu1 }
 0x130   :  { %v426_v17 = vadd.f32 %v3534_v63, %v425_v16 }
 0x132   :  { %v501_v20 = vmax.f32 %v426_v17, 0.0 }
 0x133   :  { %v248_v21 = vpop.f32.mrf.mxu0 }
 0x134   :  { %v249_v22 = vadd.f32 %v3441_v37, %v248_v21  ;;  %v531_v23 = vpack.c.bf16 %v501_v20, %v500_v18 }
 0x136   :  { %v297_v25 = vmax.f32 %v249_v22, 0.0  ;;  %2852 = vmatmul.msk.bf16.gmra.mxu2 %vm360_vm3, %v531_v23 }
 0x137   :  { %v428_v26 = vpop.f32.mrf.mxu1 }
 0x138   :  { %v318_v27 = vpack.c.bf16 %v297_v25, %v296_v24  ;;  %v429_v29 = vadd.f32 %v3534_v63, %v428_v26 }
 0x13a   :  { %2829 = vmatmul.msk.bf16.gmra.mxu1 %vm360_vm3, %v318_v27  ;;  %v502_v32 = vmax.f32 %v429_v29, 0.0 }
 0x13b   :  { %v251_v28 = vpop.f32.mrf.mxu0 }
 0x13c   :  { %v252_v33 = vadd.f32 %v3441_v37, %v251_v28 }
 0x13e   :  { %v298_v39 = vmax.f32 %v252_v33, 0.0 }
 0x13f   :  { %v430_v30 = vpop.f32.mrf.mxu1 }
 0x140   :  { %v431_v31 = vadd.f32 %v3534_v63, %v430_v30 }
 0x142   :  { %v503_v34 = vmax.f32 %v431_v31, 0.0 }
 0x143   :  { %v253_v35 = vpop.f32.mrf.mxu0 }
 0x144   :  { %v254_v36 = vadd.f32 %v3441_v37, %v253_v35  ;;  %v532_v38 = vpack.c.bf16 %v503_v34, %v502_v32  ;;  %v3166_v35 = vld [vmem:[%s4285_s7 + $0x18] sm:$0xff] }
 0x145   :  { %855 = vmatpush.bf16.msra.mxu3 %v3166_v35 }
 0x146   :  { %v299_v40 = vmax.f32 %v254_v36, 0.0  ;;  %2853 = vmatmul.msk.bf16.gmra.mxu2 %vm360_vm3, %v532_v38  ;;  %v3165_v38 = vld [vmem:[%s4285_s7 + $0x10] sm:$0xff] }
 0x147   :  { %v433_v41 = vpop.f32.mrf.mxu1 }
 0x148   :  { %v319_v42 = vpack.c.bf16 %v299_v40, %v298_v39  ;;  %v434_v44 = vadd.f32 %v3534_v63, %v433_v41  ;;  %v3164_v40 = vld [vmem:[%s4285_s7 + $0x8] sm:$0xff] }
 0x149   :  { %856 = vmatpush.bf16.msra.mxu3 %v3165_v38 }
 0x14a   :  { %2830 = vmatmul.msk.bf16.gmra.mxu1 %vm360_vm3, %v319_v42  ;;  %v504_v47 = vmax.f32 %v434_v44, 0.0  ;;  %v3163_v44 = vld [vmem:[%s4285_s7] sm:$0xff] }
 0x14b   :  { %v256_v43 = vpop.f32.mrf.mxu0 }
 0x14c   :  { %v257_v48 = vadd.f32 %v3441_v37, %v256_v43 }
 0x14d   :  { %857 = vmatpush.bf16.msra.mxu3 %v3164_v40  ;;  %v3219_v40 = vld [vmem:[#allocation2 + $0x19c] sm:$0xf0] }
 0x14e   :  { %v300_v53 = vmax.f32 %v257_v48, 0.0  ;;  %v3135_v48 = vld [vmem:[#allocation2 + $0x1e8] sm:$0xf0] }
 0x14f   :  { %v435_v45 = vpop.f32.mrf.mxu1 }
 0x150   :  { %v436_v46 = vadd.f32 %v3534_v63, %v435_v45 }
 0x151   :  { %858 = vmatpush.bf16.msra.mxu3 %v3163_v44 }
 0x152   :  { %v505_v49 = vmax.f32 %v436_v46, 0.0 }
 0x153   :  { %v258_v50 = vpop.f32.mrf.mxu0 }
 0x154   :  { %v259_v51 = vadd.f32 %v3441_v37, %v258_v50  ;;  %v533_v52 = vpack.c.bf16 %v505_v49, %v504_v47  ;;  %v3224_v47 = vld [vmem:[#allocation2 + $0x1cc] sm:$0xf]  ;;  %v3133_v50 = vld [vmem:[#allocation2 + $0x1c8] sm:$0xf] }
 0x155   :  { %v3138_v49 = vor.u32 %v3224_v47, %v3135_v48 }
 0x156   :  { %v301_v54 = vmax.f32 %v259_v51, 0.0  ;;  %2854 = vmatmul.msk.bf16.gmra.mxu2 %vm360_vm3, %v533_v52  ;;  %v3228_v51 = vld [vmem:[#allocation2 + $0x1e4] sm:$0xf0]  ;;  %v3223_v52 = vld [vmem:[#allocation2 + $0x1c4] sm:$0xf] }
 0x157   :  { %v438_v55 = vpop.f32.mrf.mxu1  ;;  %1657 = vmatpush.bf16.msrb.mxu3 %v3138_v49 }
 0x158   :  { %v320_v56 = vpack.c.bf16 %v301_v54, %v300_v53  ;;  %v439_v58 = vadd.f32 %v3534_v63, %v438_v55  ;;  %v3134_v53 = vor.u32 %v3228_v51, %v3133_v50  ;;  %v3127_v54 = vld [vmem:[#allocation2 + $0x1e0] sm:$0xf0] }
 0x15a   :  { %2831 = vmatmul.msk.bf16.gmra.mxu1 %vm360_vm3, %v320_v56  ;;  %v506_v61 = vmax.f32 %v439_v58, 0.0  ;;  %v3130_v56 = vor.u32 %v3223_v52, %v3127_v54  ;;  %1568 = vmatpush.bf16.msrb.mxu2 %v3134_v53 }
 0x15b   :  { %v261_v57 = vpop.f32.mrf.mxu0 }
 0x15c   :  { %v262_v62 = vadd.f32 %v3441_v37, %v261_v57  ;;  %1479 = vmatpush.bf16.msrb.mxu1 %v3130_v56 }
 0x15e   :  { %v302_v4 = vmax.f32 %v262_v62, 0.0  ;;  %v3227_v62 = vld [vmem:[#allocation2 + $0x1dc] sm:$0xf0] }
 0x15f   :  { %v440_v59 = vpop.f32.mrf.mxu1 }
 0x160   :  { %v441_v60 = vadd.f32 %v3534_v63, %v440_v59 }
 0x162   :  { %v507_v0 = vmax.f32 %v441_v60, 0.0 }
 0x163   :  { %v263_v1 = vpop.f32.mrf.mxu0 }
 0x164   :  { %v264_v2 = vadd.f32 %v3441_v37, %v263_v1  ;;  %v534_v3 = vpack.c.bf16 %v507_v0, %v506_v61  ;;  %v3125_v61 = vld [vmem:[#allocation2 + $0x1c0] sm:$0xf] }
 0x165   :  { %v3126_v0 = vor.u32 %v3227_v62, %v3125_v61  ;;  %v3069_v62 = vld [vmem:[#allocation2 + $0x148] sm:$0xf] }
 0x166   :  { %v303_v5 = vmax.f32 %v264_v2, 0.0  ;;  %2855 = vmatmul.msk.bf16.gmra.mxu2 %vm360_vm3, %v534_v3 }
 0x167   :  { %v443_v6 = vpop.f32.mrf.mxu1  ;;  %1390 = vmatpush.bf16.msrb.mxu0 %v3126_v0  ;;  %v3212_v0 = vld [vmem:[#allocation2 + $0x164] sm:$0xf0] }
 0x168   :  { %v321_v7 = vpack.c.bf16 %v303_v5, %v302_v4  ;;  %v444_v9 = vadd.f32 %v3534_v63, %v443_v6  ;;  %v3600_v4 = vld [vmem:[%s4284_s6] ss:$0 sm:$0xff] }
 0x16a   :  { %2832 = vmatmul.msk.bf16.gmra.mxu1 %vm360_vm3, %v321_v7  ;;  %v508_v12 = vmax.f32 %v444_v9, 0.0 }
 0x16b   :  { %v266_v8 = vpop.f32.mrf.mxu0 }
 0x16c   :  { %v267_v13 = vadd.f32 %v3441_v37, %v266_v8 }
 0x16e   :  { %v304_v18 = vmax.f32 %v267_v13, 0.0 }
 0x16f   :  { %v445_v10 = vpop.f32.mrf.mxu1 }
 0x170   :  { %v446_v11 = vadd.f32 %v3534_v63, %v445_v10 }
 0x172   :  { %v509_v14 = vmax.f32 %v446_v11, 0.0 }
 0x173   :  { %v268_v15 = vpop.f32.mrf.mxu0 }
 0x174   :  { %v269_v16 = vadd.f32 %v3441_v37, %v268_v15  ;;  %v535_v17 = vpack.c.bf16 %v509_v14, %v508_v12 }
 0x176   :  { %v305_v19 = vmax.f32 %v269_v16, 0.0  ;;  %2856 = vmatmul.msk.bf16.gmra.mxu2 %vm360_vm3, %v535_v17 }
 0x177   :  { %v448_v20 = vpop.f32.mrf.mxu1 }
 0x178   :  { %v322_v21 = vpack.c.bf16 %v305_v19, %v304_v18  ;;  %v449_v23 = vadd.f32 %v3534_v63, %v448_v20  ;;  %v3216_v19 = vld [vmem:[#allocation2 + $0x18c] sm:$0xf] }
 0x179   :  { %v3103_v20 = vld [vmem:[#allocation2 + $0x1a8] sm:$0xf0] }
 0x17a   :  { %2833 = vmatmul.msk.bf16.gmra.mxu1 %vm360_vm3, %v322_v21  ;;  %v510_v26 = vmax.f32 %v449_v23, 0.0  ;;  %v3106_v21 = vor.u32 %v3216_v19, %v3103_v20  ;;  %v3220_v23 = vld [vmem:[#allocation2 + $0x1a4] sm:$0xf0] }
 0x17b   :  { %v271_v22 = vpop.f32.mrf.mxu0 }
 0x17c   :  { %v272_v27 = vadd.f32 %v3441_v37, %v271_v22  ;;  %v3101_v22 = vld [vmem:[#allocation2 + $0x188] sm:$0xf]  ;;  %1658 = vmatpush.bf16.msrb.mxu3 %v3106_v21 }
 0x17e   :  { %v306_v32 = vmax.f32 %v272_v27, 0.0 }
 0x17f   :  { %v450_v24 = vpop.f32.mrf.mxu1 }
 0x180   :  { %v451_v25 = vadd.f32 %v3534_v63, %v450_v24  ;;  %v3102_v24 = vor.u32 %v3220_v23, %v3101_v22 }
 0x182   :  { %v511_v28 = vmax.f32 %v451_v25, 0.0  ;;  %v3215_v25 = vld [vmem:[#allocation2 + $0x184] sm:$0xf]  ;;  %1569 = vmatpush.bf16.msrb.mxu2 %v3102_v24 }
 0x183   :  { %v273_v29 = vpop.f32.mrf.mxu0 }
 0x184   :  { %v274_v30 = vadd.f32 %v3441_v37, %v273_v29  ;;  %v536_v31 = vpack.c.bf16 %v511_v28, %v510_v26  ;;  %v3095_v26 = vld [vmem:[#allocation2 + $0x1a0] sm:$0xf0] }
 0x185   :  { %v3098_v28 = vor.u32 %v3215_v25, %v3095_v26 }
 0x186   :  { %v307_v33 = vmax.f32 %v274_v30, 0.0  ;;  %2857 = vmatmul.msk.bf16.gmra.mxu2 %vm360_vm3, %v536_v31 }
 0x187   :  { %v453_v34 = vpop.f32.mrf.mxu1  ;;  %1480 = vmatpush.bf16.msrb.mxu1 %v3098_v28 }
 0x188   :  { %v323_v36 = vpack.c.bf16 %v307_v33, %v306_v32  ;;  %v454_v37 = vadd.f32 %v3534_v63, %v453_v34 }
 0x18a   :  { %2834 = vmatmul.msk.bf16.gmra.mxu1 %vm360_vm3, %v323_v36  ;;  %v512_v42 = vmax.f32 %v454_v37, 0.0 }
 0x18f   :  { %v455_v39 = vpop.f32.mrf.mxu1 }
 0x190   :  { %v456_v41 = vadd.f32 %v3534_v63, %v455_v39  ;;  %v3093_v39 = vld [vmem:[#allocation2 + $0x180] sm:$0xf] }
 0x192   :  { %v513_v43 = vmax.f32 %v456_v41, 0.0  ;;  %v3094_v41 = vor.u32 %v3219_v40, %v3093_v39  ;;  %v3037_v40 = vld [vmem:[#allocation2 + $0x108] sm:$0xf] }
 0x194   :  { %v537_v45 = vpack.c.bf16 %v513_v43, %v512_v42  ;;  %1391 = vmatpush.bf16.msrb.mxu0 %v3094_v41  ;;  %v3204_v41 = vld [vmem:[#allocation2 + $0x124] sm:$0xf0] }
 0x196   :  { %2858 = vmatmul.msk.bf16.gmra.mxu2 %vm360_vm3, %v537_v45 }
 0x197   :  { %v458_v46 = vpop.f32.mrf.mxu1 }
 0x198   :  { %v459_v55 = vadd.f32 %v3534_v63, %v458_v46 }
 0x19a   :  { %v514_v59 = vmax.f32 %v459_v55, 0.0 }
 0x19f   :  { %v460_v57 = vpop.f32.mrf.mxu1 }
 0x1a0   :  { %v461_v58 = vadd.f32 %v3534_v63, %v460_v57 }
 0x1a2   :  { %v515_v60 = vmax.f32 %v461_v58, 0.0 }
 0x1a4   :  { %v538_v1 = vpack.c.bf16 %v515_v60, %v514_v59  ;;  %v3208_v59 = vld [vmem:[#allocation2 + $0x14c] sm:$0xf] }
 0x1a5   :  { %v3071_v60 = vld [vmem:[#allocation2 + $0x168] sm:$0xf0] }
 0x1a6   :  { %2859 = vmatmul.msk.bf16.gmra.mxu2 %vm360_vm3, %v538_v1  ;;  %v3074_v61 = vor.u32 %v3208_v59, %v3071_v60  ;;  %v3070_v1 = vor.u32 %v3212_v0, %v3069_v62 }
 0x1a7   :  { %v463_v2 = vpop.f32.mrf.mxu1 }
 0x1a8   :  { %v464_v5 = vadd.f32 %v3534_v63, %v463_v2  ;;  %1659 = vmatpush.bf16.msrb.mxu3 %v3074_v61  ;;  %v3207_v2 = vld [vmem:[#allocation2 + $0x144] sm:$0xf]  ;;  %1570 = vmatpush.bf16.msrb.mxu2 %v3070_v1 }
 0x1a9   :  { %v639_v3 = vpop.f32.mrf.mxu2 }
 0x1aa   :  { %v640_v7 = vadd.f32 %v3600_v4, %v639_v3  ;;  %v516_v10 = vmax.f32 %v464_v5, 0.0  ;;  %v3063_v3 = vld [vmem:[#allocation2 + $0x160] sm:$0xf0] }
 0x1ac   :  { %v719_v13 = vmax.f32 %v640_v7, 0.0 }
 0x1af   :  { %v465_v6 = vpop.f32.mrf.mxu1 }
 0x1b0   :  { %v466_v8 = vadd.f32 %v3534_v63, %v465_v6  ;;  %v3066_v6 = vor.u32 %v3207_v2, %v3063_v3 }
 0x1b1   :  { %v641_v9 = vpop.f32.mrf.mxu2 }
 0x1b2   :  { %v517_v11 = vmax.f32 %v466_v8, 0.0  ;;  %v642_v12 = vadd.f32 %v3600_v4, %v641_v9  ;;  %1481 = vmatpush.bf16.msrb.mxu1 %v3066_v6 }
 0x1b4   :  { %v720_v14 = vmax.f32 %v642_v12, 0.0  ;;  %v539_v15 = vpack.c.bf16 %v517_v11, %v516_v10 }
 0x1b6   :  { %2860 = vmatmul.msk.bf16.gmra.mxu2 %vm360_vm3, %v539_v15  ;;  %v751_v16 = vpack.c.bf16 %v720_v14, %v719_v13 }
 0x1b7   :  { %v468_v17 = vpop.f32.mrf.mxu1 }
 0x1b8   :  { %2883 = vmatmul.msk.bf16.vlgmr.msra.gmra.mxu3 %vm360_vm3, %v751_v16  ;;  %v469_v27 = vadd.f32 %v3534_v63, %v468_v17  ;;  %v3061_v17 = vld [vmem:[#allocation2 + $0x140] sm:$0xf] }
 0x1b9   :  { %v644_v18 = vpop.f32.mrf.mxu2 }
 0x1ba   :  { %v645_v30 = vadd.f32 %v3600_v4, %v644_v18  ;;  %v518_v33 = vmax.f32 %v469_v27, 0.0  ;;  %v3211_v18 = vld [vmem:[#allocation2 + $0x15c] sm:$0xf0] }
 0x1bb   :  { %v3062_v19 = vor.u32 %v3211_v18, %v3061_v17  ;;  %v3196_v18 = vld [vmem:[#allocation2 + $0xe4] sm:$0xf0] }
 0x1bc   :  { %v721_v36 = vmax.f32 %v645_v30, 0.0 }
 0x1bd   :  { %1392 = vmatpush.bf16.msrb.mxu0 %v3062_v19  ;;  %v3195_v19 = vld [vmem:[#allocation2 + $0xdc] sm:$0xf0] }
 0x1bf   :  { %v470_v29 = vpop.f32.mrf.mxu1 }
 0x1c0   :  { %v471_v31 = vadd.f32 %v3534_v63, %v470_v29 }
 0x1c1   :  { %v646_v32 = vpop.f32.mrf.mxu2 }
 0x1c2   :  { %v519_v34 = vmax.f32 %v471_v31, 0.0  ;;  %v647_v35 = vadd.f32 %v3600_v4, %v646_v32 }
 0x1c4   :  { %v722_v38 = vmax.f32 %v647_v35, 0.0  ;;  %v540_v37 = vpack.c.bf16 %v519_v34, %v518_v33 }
 0x1c6   :  { %2861 = vmatmul.msk.bf16.gmra.mxu2 %vm360_vm3, %v540_v37  ;;  %v752_v42 = vpack.c.bf16 %v722_v38, %v721_v36  ;;  %v3200_v36 = vld [vmem:[#allocation2 + $0x10c] sm:$0xf] }
 0x1c7   :  { %v473_v43 = vpop.f32.mrf.mxu1  ;;  %v3039_v38 = vld [vmem:[#allocation2 + $0x128] sm:$0xf0] }
 0x1c8   :  { %2884 = vmatmul.msk.bf16.gmra.mxu3 %vm360_vm3, %v752_v42  ;;  %v474_v45 = vadd.f32 %v3534_v63, %v473_v43  ;;  %v3042_v39 = vor.u32 %v3200_v36, %v3039_v38  ;;  %v3038_v42 = vor.u32 %v3204_v41, %v3037_v40  ;;  %v3199_v43 = vld [vmem:[#allocation2 + $0x104] sm:$0xf]  ;;  %v3179_v36 = vld [vmem:[#allocation2 + $0x5c] sm:$0xf0]  ;;  %v2941_v41 = vld [vmem:[#allocation2 + $0x48] sm:$0xf] }
 0x1c9   :  { %v649_v44 = vpop.f32.mrf.mxu2  ;;  %v3175_v38 = vld [vmem:[#allocation2 + $0x44] sm:$0xf] }
 0x1ca   :  { %v650_v47 = vadd.f32 %v3600_v4, %v649_v44  ;;  %v520_v50 = vmax.f32 %v474_v45, 0.0  ;;  %1660 = vmatpush.bf16.msrb.mxu3 %v3042_v39  ;;  %v3031_v44 = vld [vmem:[#allocation2 + $0x120] sm:$0xf0]  ;;  %v3029_v45 = vld [vmem:[#allocation2 + $0x100] sm:$0xf]  ;;  %1571 = vmatpush.bf16.msrb.mxu2 %v3038_v42 }
 0x1cb   :  { %v2935_v40 = vld [vmem:[#allocation2 + $0x60] sm:$0xf0]  ;;  %v3180_v42 = vld [vmem:[#allocation2 + $0x64] sm:$0xf0] }
 0x1cc   :  { %v723_v53 = vmax.f32 %v650_v47, 0.0  ;;  %v3034_v47 = vor.u32 %v3199_v43, %v3031_v44  ;;  %v2938_v44 = vor.u32 %v3175_v38, %v2935_v40 }
 0x1ce   :  { %1482 = vmatpush.bf16.msrb.mxu1 %v3034_v47 }
 0x1cf   :  { %v475_v46 = vpop.f32.mrf.mxu1 }
 0x1d0   :  { %v476_v48 = vadd.f32 %v3534_v63, %v475_v46 }
 0x1d1   :  { %v651_v49 = vpop.f32.mrf.mxu2 }
 0x1d2   :  { %v521_v51 = vmax.f32 %v476_v48, 0.0  ;;  %v652_v52 = vadd.f32 %v3600_v4, %v651_v49  ;;  %v3203_v48 = vld [vmem:[#allocation2 + $0x11c] sm:$0xf0] }
 0x1d4   :  { %v724_v54 = vmax.f32 %v652_v52, 0.0  ;;  %v541_v55 = vpack.c.bf16 %v521_v51, %v520_v50  ;;  %v3030_v50 = vor.u32 %v3203_v48, %v3029_v45  ;;  %v2942_v45 = vor.u32 %v3180_v42, %v2941_v41  ;;  %v2901_v48 = vld [vmem:[#allocation2] sm:$0xf] }
 0x1d6   :  { %2862 = vmatmul.msk.bf16.gmra.mxu2 %vm360_vm3, %v541_v55  ;;  %v753_v56 = vpack.c.bf16 %v724_v54, %v723_v53  ;;  %1393 = vmatpush.bf16.msrb.mxu0 %v3030_v50 }
 0x1d7   :  { %v478_v57 = vpop.f32.mrf.mxu1 }
 0x1d8   :  { %2885 = vmatmul.msk.bf16.gmra.mxu3 %vm360_vm3, %v753_v56  ;;  %v479_v5 = vadd.f32 %v3534_v63, %v478_v57 }
 0x1d9   :  { %v654_v58 = vpop.f32.mrf.mxu2 }
 0x1da   :  { %v655_v8 = vadd.f32 %v3600_v4, %v654_v58  ;;  %v522_v11 = vmax.f32 %v479_v5, 0.0 }
 0x1dc   :  { %v725_v14 = vmax.f32 %v655_v8, 0.0 }
 0x1df   :  { %v480_v7 = vpop.f32.mrf.mxu1 }
 0x1e0   :  { %v481_v9 = vadd.f32 %v3534_v63, %v480_v7 }
 0x1e1   :  { %v656_v10 = vpop.f32.mrf.mxu2 }
 0x1e2   :  { %v523_v12 = vmax.f32 %v481_v9, 0.0  ;;  %v657_v13 = vadd.f32 %v3600_v4, %v656_v10 }
 0x1e4   :  { %v542_v15 = vpack.c.bf16 %v523_v12, %v522_v11  ;;  %v726_v16 = vmax.f32 %v657_v13, 0.0  ;;  %v3192_v13 = vld [vmem:[#allocation2 + $0xcc] sm:$0xf] }
 0x1e6   :  { %2863 = vmatmul.msk.bf16.gmra.mxu2 %vm360_vm3, %v542_v15  ;;  %v754_v20 = vpack.c.bf16 %v726_v16, %v725_v14  ;;  %v3007_v14 = vld [vmem:[#allocation2 + $0xe8] sm:$0xf0]  ;;  %v3005_v15 = vld [vmem:[#allocation2 + $0xc8] sm:$0xf] }
 0x1e7   :  { %v483_v21 = vpop.f32.mrf.mxu1  ;;  %v3010_v17 = vor.u32 %v3192_v13, %v3007_v14 }
 0x1e8   :  { %2886 = vmatmul.msk.bf16.gmra.mxu3 %vm360_vm3, %v754_v20  ;;  %v484_v23 = vadd.f32 %v3534_v63, %v483_v21  ;;  %v3006_v20 = vor.u32 %v3196_v18, %v3005_v15 }
 0x1e9   :  { %v659_v22 = vpop.f32.mrf.mxu2  ;;  %1661 = vmatpush.bf16.msrb.mxu3 %v3010_v17 }
 0x1ea   :  { %v660_v25 = vadd.f32 %v3600_v4, %v659_v22  ;;  %v524_v28 = vmax.f32 %v484_v23, 0.0  ;;  %v3191_v22 = vld [vmem:[#allocation2 + $0xc4] sm:$0xf]  ;;  %1572 = vmatpush.bf16.msrb.mxu2 %v3006_v20 }
 0x1eb   :  { %v2999_v23 = vld [vmem:[#allocation2 + $0xe0] sm:$0xf0] }
 0x1ec   :  { %v727_v31 = vmax.f32 %v660_v25, 0.0  ;;  %v2965_v25 = vld [vmem:[#allocation2 + $0x80] sm:$0xf] }
 0x1ef   :  { %v485_v24 = vpop.f32.mrf.mxu1 }
 0x1f0   :  { %v486_v26 = vadd.f32 %v3534_v63, %v485_v24  ;;  %v3002_v24 = vor.u32 %v3191_v22, %v2999_v23 }
 0x1f1   :  { %v661_v27 = vpop.f32.mrf.mxu2 }
 0x1f2   :  { %v525_v29 = vmax.f32 %v486_v26, 0.0  ;;  %v662_v30 = vadd.f32 %v3600_v4, %v661_v27  ;;  %v3187_v26 = vld [vmem:[#allocation2 + $0x9c] sm:$0xf0]  ;;  %1483 = vmatpush.bf16.msrb.mxu1 %v3002_v24 }
 0x1f3   :  { %v2966_v27 = vor.u32 %v3187_v26, %v2965_v25 }
 0x1f4   :  { %v543_v32 = vpack.c.bf16 %v525_v29, %v524_v28  ;;  %v728_v33 = vmax.f32 %v662_v30, 0.0  ;;  %v3183_v28 = vld [vmem:[#allocation2 + $0x84] sm:$0xf]  ;;  %v2973_v30 = vld [vmem:[#allocation2 + $0x88] sm:$0xf] }
 0x1f5   :  { %v2967_v29 = vld [vmem:[#allocation2 + $0xa0] sm:$0xf0] }
 0x1f6   :  { %2864 = vmatmul.msk.bf16.gmra.mxu2 %vm360_vm3, %v543_v32  ;;  %v755_v34 = vpack.c.bf16 %v728_v33, %v727_v31  ;;  %v2970_v31 = vor.u32 %v3183_v28, %v2967_v29  ;;  %v3188_v32 = vld [vmem:[#allocation2 + $0xa4] sm:$0xf0] }
 0x1f7   :  { %v488_v35 = vpop.f32.mrf.mxu1  ;;  %v2974_v33 = vor.u32 %v3188_v32, %v2973_v30 }
 0x1f8   :  { %2887 = vmatmul.msk.bf16.gmra.mxu3 %vm360_vm3, %v755_v34  ;;  %v489_v46 = vadd.f32 %v3534_v63, %v488_v35  ;;  %v2933_v35 = vld [vmem:[#allocation2 + $0x40] sm:$0xf]  ;;  %1484 = vmatpush.bf16.msrb.mxu1 %v2970_v31 }
 0x1f9   :  { %v664_v37 = vpop.f32.mrf.mxu2  ;;  %1573 = vmatpush.bf16.msrb.mxu2 %v2974_v33  ;;  %v2934_v39 = vor.u32 %v3179_v36, %v2933_v35  ;;  %v2943_v35 = vld [vmem:[#allocation2 + $0x68] sm:$0xf0] }
 0x1fa   :  { %v665_v51 = vadd.f32 %v3600_v4, %v664_v37  ;;  %v526_v54 = vmax.f32 %v489_v46, 0.0 }
 0x1fc   :  { %v729_v57 = vmax.f32 %v665_v51, 0.0  ;;  %1485 = vmatpush.bf16.msrb.mxu1 %v2938_v44  ;;  %v3167_v51 = vld [vmem:[#allocation2 + $0x4] sm:$0xf] }
 0x1fd   :  { %1574 = vmatpush.bf16.msrb.mxu2 %v2942_v45 }
 0x1ff   :  { %v490_v49 = vpop.f32.mrf.mxu1 }
 0x200   :  { %v491_v52 = vadd.f32 %v3534_v63, %v490_v49  ;;  %v3171_v49 = vld [vmem:[#allocation2 + $0x1c] sm:$0xf0] }
 0x201   :  { %v666_v53 = vpop.f32.mrf.mxu2  ;;  %v2902_v50 = vor.u32 %v3171_v49, %v2901_v48 }
 0x202   :  { %v527_v55 = vmax.f32 %v491_v52, 0.0  ;;  %v667_v56 = vadd.f32 %v3600_v4, %v666_v53  ;;  %v2903_v52 = vld [vmem:[#allocation2 + $0x20] sm:$0xf0]  ;;  %v2909_v53 = vld [vmem:[#allocation2 + $0x8] sm:$0xf] }
 0x204   :  { %v544_v58 = vpack.c.bf16 %v527_v55, %v526_v54  ;;  %v730_v59 = vmax.f32 %v667_v56, 0.0  ;;  %v2906_v55 = vor.u32 %v3167_v51, %v2903_v52  ;;  %v3172_v56 = vld [vmem:[#allocation2 + $0x24] sm:$0xf0] }
 0x206   :  { %2865 = vmatmul.msk.bf16.gmra.mxu2 %vm360_vm3, %v544_v58  ;;  %v756_v60 = vpack.c.bf16 %v730_v59, %v729_v57  ;;  %v2910_v57 = vor.u32 %v3172_v56, %v2909_v53  ;;  %1486 = vmatpush.bf16.msrb.mxu1 %v2906_v55 }
 0x207   :  { %v493_v61 = vpop.f32.mrf.mxu1 }
 0x208   :  { %2888 = vmatmul.msk.bf16.gmra.mxu3 %vm360_vm3, %v756_v60  ;;  %v494_v0 = vadd.f32 %v3534_v63, %v493_v61  ;;  %1575 = vmatpush.bf16.msrb.mxu2 %v2910_v57 }
 0x209   :  { %v669_v62 = vpop.f32.mrf.mxu2 }
 0x20a   :  { %v670_v2 = vadd.f32 %v3600_v4, %v669_v62  ;;  %v528_v6 = vmax.f32 %v494_v0, 0.0 }
 0x20c   :  { %v731_v9 = vmax.f32 %v670_v2, 0.0  ;;  %v3184_v2 = vld [vmem:[#allocation2 + $0x8c] sm:$0xf] }
 0x20f   :  { %v495_v1 = vpop.f32.mrf.mxu1 }
 0x210   :  { %v496_v3 = vadd.f32 %v3534_v63, %v495_v1  ;;  %v2997_v63 = vld [vmem:[#allocation2 + $0xc0] sm:$0xf] }
 0x211   :  { %v671_v5 = vpop.f32.mrf.mxu2  ;;  %v2998_v21 = vor.u32 %v3195_v19, %v2997_v63 }
 0x212   :  { %v529_v7 = vmax.f32 %v496_v3, 0.0  ;;  %v672_v8 = vadd.f32 %v3600_v4, %v671_v5  ;;  %v2975_v3 = vld [vmem:[#allocation2 + $0xa8] sm:$0xf0] }
 0x213   :  { %1394 = vmatpush.bf16.msrb.mxu0 %v2998_v21 }
 0x214   :  { %v545_v10 = vpack.c.bf16 %v529_v7, %v528_v6  ;;  %v732_v11 = vmax.f32 %v672_v8, 0.0  ;;  %v2978_v6 = vor.u32 %v3184_v2, %v2975_v3  ;;  %v3653_v8 = vld [vmem:[%s4286_s8] ss:$0 sm:$0xff]  ;;  %v3168_v2 = vld [vmem:[#allocation2 + $0xc] sm:$0xf] }
 0x215   :  { %v2911_v3 = vld [vmem:[#allocation2 + $0x28] sm:$0xf0] }
 0x216   :  { %2866 = vmatmul.msk.bf16.gmra.mxu2 %vm360_vm3, %v545_v10  ;;  %v757_v12 = vpack.c.bf16 %v732_v11, %v731_v9  ;;  %1662 = vmatpush.bf16.msrb.mxu3 %v2978_v6  ;;  %v2914_v6 = vor.u32 %v3168_v2, %v2911_v3 }
 0x217   :  { %1395 = vmatpush.bf16.msrb.mxu0 %v2966_v27 }
 0x218   :  { %2889 = vmatmul.msk.bf16.gmra.mxu3 %vm360_vm3, %v757_v12 }
 0x219   :  { %v674_v16 = vpop.f32.mrf.mxu2 }
 0x21a   :  { %v675_v34 = vadd.f32 %v3600_v4, %v674_v16 }
 0x21b   :  { %1396 = vmatpush.bf16.msrb.mxu0 %v2934_v39 }
 0x21c   :  { %v733_v46 = vmax.f32 %v675_v34, 0.0  ;;  %v3176_v34 = vld [vmem:[#allocation2 + $0x4c] sm:$0xf] }
 0x21d   :  { %v2946_v38 = vor.u32 %v3176_v34, %v2943_v35 }
 0x21f   :  { %1397 = vmatpush.bf16.msrb.mxu0 %v2902_v50  ;;  %1663 = vmatpush.bf16.msrb.mxu3 %v2946_v38  ;;  %v3151_v38 = vld [vmem:[#allocation2 + $0x1f8] sm:$0xf0] }
 0x221   :  { %v676_v37 = vpop.f32.mrf.mxu2 }
 0x222   :  { %v677_v43 = vadd.f32 %v3600_v4, %v676_v37 }
 0x223   :  { %1664 = vmatpush.bf16.msrb.mxu3 %v2914_v6 }
 0x224   :  { %v734_v47 = vmax.f32 %v677_v43, 0.0 }
 0x226   :  { %v758_v54 = vpack.c.bf16 %v734_v47, %v733_v46 }
 0x228   :  { %2890 = vmatmul.msk.bf16.gmra.mxu3 %vm360_vm3, %v758_v54 }
 0x229   :  { %v679_v58 = vpop.f32.mrf.mxu2 }
 0x22a   :  { %v680_v59 = vadd.f32 %v3600_v4, %v679_v58 }
 0x22c   :  { %v735_v62 = vmax.f32 %v680_v59, 0.0 }
 0x231   :  { %v681_v60 = vpop.f32.mrf.mxu2 }
 0x232   :  { %v682_v61 = vadd.f32 %v3600_v4, %v681_v60 }
 0x234   :  { %v736_v0 = vmax.f32 %v682_v61, 0.0 }
 0x236   :  { %v759_v1 = vpack.c.bf16 %v736_v0, %v735_v62 }
 0x238   :  { %2891 = vmatmul.msk.bf16.gmra.mxu3 %vm360_vm3, %v759_v1 }
 0x239   :  { %v684_v5 = vpop.f32.mrf.mxu2 }
 0x23a   :  { %v685_v9 = vadd.f32 %v3600_v4, %v684_v5 }
 0x23b   :  { %v860_v7 = vpop.f32.mrf.mxu3 }
 0x23c   :  { %v861_v11 = vadd.f32 %v3653_v8, %v860_v7  ;;  %v737_v14 = vmax.f32 %v685_v9, 0.0 }
 0x23e   :  { %v940_v17 = vmax.f32 %v861_v11, 0.0 }
 0x241   :  { %v686_v10 = vpop.f32.mrf.mxu2 }
 0x242   :  { %v687_v12 = vadd.f32 %v3600_v4, %v686_v10 }
 0x243   :  { %v862_v13 = vpop.f32.mrf.mxu3 }
 0x244   :  { %v738_v15 = vmax.f32 %v687_v12, 0.0  ;;  %v863_v16 = vadd.f32 %v3653_v8, %v862_v13 }
 0x246   :  { %v941_v18 = vmax.f32 %v863_v16, 0.0  ;;  %v760_v63 = vpack.c.bf16 %v738_v15, %v737_v14 }
 0x248   :  { %v3659_v19 = vpack.c.bf16 %v941_v18, %v940_v17  ;;  %2892 = vmatmul.msk.bf16.gmra.mxu3 %vm360_vm3, %v760_v63 }
 0x249   :  { %v689_v20 = vpop.f32.mrf.mxu2 }
 0x24a   :  { %1398 = vmatmul.bf16.vlgmr.msrb.gmra.mxu0 %v3659_v19  ;;  %1487 = vmatmul.bf16.vlgmr.msrb.gmra.mxu1 %v3659_v19  ;;  %v690_v22 = vadd.f32 %v3600_v4, %v689_v20 }
 0x24b   :  { %1576 = vmatmul.bf16.vlgmr.msrb.gmra.mxu2 %v3659_v19  ;;  %v865_v21 = vpop.f32.mrf.mxu3 }
 0x24c   :  { %v866_v24 = vadd.f32 %v3653_v8, %v865_v21  ;;  %v739_v27 = vmax.f32 %v690_v22, 0.0 }
 0x24e   :  { %v942_v30 = vmax.f32 %v866_v24, 0.0 }
 0x251   :  { %v691_v23 = vpop.f32.mrf.mxu2 }
 0x252   :  { %v692_v25 = vadd.f32 %v3600_v4, %v691_v23 }
 0x253   :  { %v867_v26 = vpop.f32.mrf.mxu3 }
 0x254   :  { %v740_v28 = vmax.f32 %v692_v25, 0.0  ;;  %v868_v29 = vadd.f32 %v3653_v8, %v867_v26 }
 0x256   :  { %v943_v31 = vmax.f32 %v868_v29, 0.0  ;;  %v761_v32 = vpack.c.bf16 %v740_v28, %v739_v27 }
 0x258   :  { %v3669_v33 = vpack.c.bf16 %v943_v31, %v942_v30  ;;  %2893 = vmatmul.msk.bf16.gmra.mxu3 %vm360_vm3, %v761_v32 }
 0x259   :  { %v694_v36 = vpop.f32.mrf.mxu2 }
 0x25a   :  { %1403 = vmatmul.bf16.gmra.mxu0 %v3669_v33  ;;  %1492 = vmatmul.bf16.gmra.mxu1 %v3669_v33  ;;  %v695_v39 = vadd.f32 %v3600_v4, %v694_v36  ;;  %v3226_v36 = vld [vmem:[#allocation2 + $0x1dc] sm:$0xf] }
 0x25b   :  { %1581 = vmatmul.bf16.gmra.mxu2 %v3669_v33  ;;  %v870_v37 = vpop.f32.mrf.mxu3 }
 0x25c   :  { %v871_v41 = vadd.f32 %v3653_v8, %v870_v37  ;;  %v741_v44 = vmax.f32 %v695_v39, 0.0  ;;  %v3154_v39 = vor.u32 %v3226_v36, %v3151_v38 }
 0x25e   :  { %v944_v47 = vmax.f32 %v871_v41, 0.0  ;;  %2013 = vmatpush.bf16.msra.mxu3 %v3154_v39  ;;  %v3149_v41 = vld [vmem:[#allocation2 + $0x1d8] sm:$0xf] }
 0x261   :  { %v696_v40 = vpop.f32.mrf.mxu2 }
 0x262   :  { %v697_v42 = vadd.f32 %v3600_v4, %v696_v40 }
 0x263   :  { %v872_v43 = vpop.f32.mrf.mxu3 }
 0x264   :  { %v742_v45 = vmax.f32 %v697_v42, 0.0  ;;  %v873_v46 = vadd.f32 %v3653_v8, %v872_v43  ;;  %v3230_v42 = vld [vmem:[#allocation2 + $0x1f4] sm:$0xf0] }
 0x265   :  { %v3150_v43 = vor.u32 %v3230_v42, %v3149_v41 }
 0x266   :  { %v945_v48 = vmax.f32 %v873_v46, 0.0  ;;  %v762_v49 = vpack.c.bf16 %v742_v45, %v741_v44  ;;  %v3225_v44 = vld [vmem:[#allocation2 + $0x1d4] sm:$0xf] }
 0x267   :  { %1924 = vmatpush.bf16.msra.mxu2 %v3150_v43  ;;  %v3143_v45 = vld [vmem:[#allocation2 + $0x1f0] sm:$0xf0] }
 0x268   :  { %v3679_v50 = vpack.c.bf16 %v945_v48, %v944_v47  ;;  %2894 = vmatmul.msk.bf16.gmra.mxu3 %vm360_vm3, %v762_v49  ;;  %v3146_v46 = vor.u32 %v3225_v44, %v3143_v45  ;;  %v3141_v47 = vld [vmem:[#allocation2 + $0x1d0] sm:$0xf] }
 0x269   :  { %v699_v51 = vpop.f32.mrf.mxu2  ;;  %v3229_v48 = vld [vmem:[#allocation2 + $0x1ec] sm:$0xf0] }
 0x26a   :  { %1408 = vmatmul.bf16.gmra.mxu0 %v3679_v50  ;;  %1497 = vmatmul.bf16.gmra.mxu1 %v3679_v50  ;;  %v700_v53 = vadd.f32 %v3600_v4, %v699_v51  ;;  %v3142_v51 = vor.u32 %v3229_v48, %v3141_v47 }
 0x26b   :  { %1586 = vmatmul.bf16.gmra.mxu2 %v3679_v50  ;;  %v875_v52 = vpop.f32.mrf.mxu3  ;;  %1835 = vmatpush.bf16.msra.mxu1 %v3146_v46 }
 0x26c   :  { %v876_v55 = vadd.f32 %v3653_v8, %v875_v52  ;;  %v743_v58 = vmax.f32 %v700_v53, 0.0  ;;  %1746 = vmatpush.bf16.msra.mxu0 %v3142_v51 }
 0x26e   :  { %v946_v61 = vmax.f32 %v876_v55, 0.0 }
 0x271   :  { %v701_v54 = vpop.f32.mrf.mxu2 }
 0x272   :  { %v702_v56 = vadd.f32 %v3600_v4, %v701_v54 }
 0x273   :  { %v877_v57 = vpop.f32.mrf.mxu3 }
 0x274   :  { %v744_v59 = vmax.f32 %v702_v56, 0.0  ;;  %v878_v60 = vadd.f32 %v3653_v8, %v877_v57 }
 0x276   :  { %v763_v62 = vpack.c.bf16 %v744_v59, %v743_v58  ;;  %v947_v0 = vmax.f32 %v878_v60, 0.0 }
 0x278   :  { %v3689_v1 = vpack.c.bf16 %v947_v0, %v946_v61  ;;  %2895 = vmatmul.msk.bf16.gmra.mxu3 %vm360_vm3, %v763_v62 }
 0x279   :  { %v704_v5 = vpop.f32.mrf.mxu2 }
 0x27a   :  { %1413 = vmatmul.bf16.gmra.mxu0 %v3689_v1  ;;  %1502 = vmatmul.bf16.gmra.mxu1 %v3689_v1  ;;  %v705_v9 = vadd.f32 %v3600_v4, %v704_v5 }
 0x27b   :  { %1591 = vmatmul.bf16.gmra.mxu2 %v3689_v1  ;;  %v880_v7 = vpop.f32.mrf.mxu3 }
 0x27c   :  { %v881_v11 = vadd.f32 %v3653_v8, %v880_v7  ;;  %v745_v14 = vmax.f32 %v705_v9, 0.0  ;;  %v3218_v9 = vld [vmem:[#allocation2 + $0x19c] sm:$0xf] }
 0x27e   :  { %v948_v17 = vmax.f32 %v881_v11, 0.0 }
 0x281   :  { %v706_v10 = vpop.f32.mrf.mxu2 }
 0x282   :  { %v707_v12 = vadd.f32 %v3600_v4, %v706_v10  ;;  %v3119_v10 = vld [vmem:[#allocation2 + $0x1b8] sm:$0xf0] }
 0x283   :  { %v882_v13 = vpop.f32.mrf.mxu3 }
 0x284   :  { %v746_v15 = vmax.f32 %v707_v12, 0.0  ;;  %v883_v16 = vadd.f32 %v3653_v8, %v882_v13  ;;  %v3122_v12 = vor.u32 %v3218_v9, %v3119_v10  ;;  %v3117_v13 = vld [vmem:[#allocation2 + $0x198] sm:$0xf] }
 0x285   :  { %v3085_v9 = vld [vmem:[#allocation2 + $0x158] sm:$0xf] }
 0x286   :  { %v764_v18 = vpack.c.bf16 %v746_v15, %v745_v14  ;;  %v949_v63 = vmax.f32 %v883_v16, 0.0  ;;  %v3222_v14 = vld [vmem:[#allocation2 + $0x1b4] sm:$0xf0]  ;;  %2014 = vmatpush.bf16.msra.mxu3 %v3122_v12  ;;  %v3217_v16 = vld [vmem:[#allocation2 + $0x194] sm:$0xf] }
 0x287   :  { %v3118_v15 = vor.u32 %v3222_v14, %v3117_v13  ;;  %v3214_v10 = vld [vmem:[#allocation2 + $0x174] sm:$0xf0] }
 0x288   :  { %v3699_v20 = vpack.c.bf16 %v949_v63, %v948_v17  ;;  %2896 = vmatmul.msk.bf16.gmra.mxu3 %vm360_vm3, %v764_v18  ;;  %v3111_v17 = vld [vmem:[#allocation2 + $0x1b0] sm:$0xf0] }
 0x289   :  { %v709_v21 = vpop.f32.mrf.mxu2  ;;  %1925 = vmatpush.bf16.msra.mxu2 %v3118_v15  ;;  %v3114_v63 = vor.u32 %v3217_v16, %v3111_v17 }
 0x28a   :  { %1418 = vmatmul.bf16.gmra.mxu0 %v3699_v20  ;;  %1507 = vmatmul.bf16.gmra.mxu1 %v3699_v20  ;;  %v710_v23 = vadd.f32 %v3600_v4, %v709_v21  ;;  %v3109_v21 = vld [vmem:[#allocation2 + $0x190] sm:$0xf] }
 0x28b   :  { %1596 = vmatmul.bf16.gmra.mxu2 %v3699_v20  ;;  %v885_v22 = vpop.f32.mrf.mxu3  ;;  %1836 = vmatpush.bf16.msra.mxu1 %v3114_v63  ;;  %v3209_v63 = vld [vmem:[#allocation2 + $0x154] sm:$0xf] }
 0x28c   :  { %v886_v25 = vadd.f32 %v3653_v8, %v885_v22  ;;  %v747_v28 = vmax.f32 %v710_v23, 0.0  ;;  %v3221_v22 = vld [vmem:[#allocation2 + $0x1ac] sm:$0xf0] }
 0x28e   :  { %v950_v31 = vmax.f32 %v886_v25, 0.0 }
 0x291   :  { %v711_v24 = vpop.f32.mrf.mxu2 }
 0x292   :  { %v712_v26 = vadd.f32 %v3600_v4, %v711_v24  ;;  %v3110_v24 = vor.u32 %v3221_v22, %v3109_v21  ;;  %v3079_v21 = vld [vmem:[#allocation2 + $0x170] sm:$0xf0] }
 0x293   :  { %v887_v27 = vpop.f32.mrf.mxu3 }
 0x294   :  { %v748_v29 = vmax.f32 %v712_v26, 0.0  ;;  %v888_v30 = vadd.f32 %v3653_v8, %v887_v27  ;;  %1747 = vmatpush.bf16.msra.mxu0 %v3110_v24 }
 0x296   :  { %v765_v32 = vpack.c.bf16 %v748_v29, %v747_v28  ;;  %v951_v34 = vmax.f32 %v888_v30, 0.0 }
 0x298   :  { %v3709_v35 = vpack.c.bf16 %v951_v34, %v950_v31  ;;  %2897 = vmatmul.msk.bf16.gmra.mxu3 %vm360_vm3, %v765_v32  ;;  %v3741_v31 = vld [vmem:[%s4288_s10] sm:$0xff] }
 0x299   :  { %v714_v37 = vpop.f32.mrf.mxu2  ;;  %v3747_v34 = vperm.slane %v3741_v31, 0  ;;  %v3750_v36 = vperm.slane %v3741_v31, 1  ;;  %v3758_v47 = vperm.slane %v3741_v31, 2 }
 0x29a   :  { %1423 = vmatmul.bf16.gmra.mxu0 %v3709_v35  ;;  %1512 = vmatmul.bf16.gmra.mxu1 %v3709_v35  ;;  %v715_v49 = vadd.f32 %v3600_v4, %v714_v37 }
 0x29b   :  { %1601 = vmatmul.bf16.gmra.mxu2 %v3709_v35  ;;  %v890_v40 = vpop.f32.mrf.mxu3 }
 0x29c   :  { %v891_v53 = vadd.f32 %v3653_v8, %v890_v40  ;;  %v749_v56 = vmax.f32 %v715_v49, 0.0 }
 0x29e   :  { %v952_v59 = vmax.f32 %v891_v53, 0.0 }
 0x2a1   :  { %v716_v52 = vpop.f32.mrf.mxu2 }
 0x2a2   :  { %v717_v54 = vadd.f32 %v3600_v4, %v716_v52 }
 0x2a3   :  { %v892_v55 = vpop.f32.mrf.mxu3 }
 0x2a4   :  { %v750_v57 = vmax.f32 %v717_v54, 0.0  ;;  %v893_v58 = vadd.f32 %v3653_v8, %v892_v55 }
 0x2a6   :  { %v766_v60 = vpack.c.bf16 %v750_v57, %v749_v56  ;;  %v953_v61 = vmax.f32 %v893_v58, 0.0 }
 0x2a8   :  { %v3719_v62 = vpack.c.bf16 %v953_v61, %v952_v59  ;;  %2898 = vmatmul.msk.bf16.gmra.mxu3 %vm360_vm3, %v766_v60 }
 0x2aa   :  { %1428 = vmatmul.bf16.gmra.mxu0 %v3719_v62  ;;  %1517 = vmatmul.bf16.gmra.mxu1 %v3719_v62 }
 0x2ab   :  { %1606 = vmatmul.bf16.gmra.mxu2 %v3719_v62  ;;  %v895_v4 = vpop.f32.mrf.mxu3 }
 0x2ac   :  { %v896_v0 = vadd.f32 %v3653_v8, %v895_v4 }
 0x2ae   :  { %v954_v5 = vmax.f32 %v896_v0, 0.0 }
 0x2b3   :  { %v897_v2 = vpop.f32.mrf.mxu3 }
 0x2b4   :  { %v898_v3 = vadd.f32 %v3653_v8, %v897_v2  ;;  %v3210_v2 = vld [vmem:[#allocation2 + $0x15c] sm:$0xf] }
 0x2b6   :  { %v955_v6 = vmax.f32 %v898_v3, 0.0  ;;  %v3087_v3 = vld [vmem:[#allocation2 + $0x178] sm:$0xf0] }
 0x2b8   :  { %v3727_v7 = vpack.c.bf16 %v955_v6, %v954_v5  ;;  %1665 = vmatmul.bf16.vlgmr.msrb.gmra.mxu3 %v3659_v19  ;;  %v3090_v6 = vor.u32 %v3210_v2, %v3087_v3 }
 0x2ba   :  { %1433 = vmatmul.bf16.gmra.mxu0 %v3727_v7  ;;  %1522 = vmatmul.bf16.gmra.mxu1 %v3727_v7 }
 0x2bb   :  { %1611 = vmatmul.bf16.gmra.mxu2 %v3727_v7  ;;  %v900_v11 = vpop.f32.mrf.mxu3  ;;  %2015 = vmatpush.bf16.msra.mxu3 %v3090_v6 }
 0x2bc   :  { %v901_v18 = vadd.f32 %v3653_v8, %v900_v11  ;;  %v3086_v11 = vor.u32 %v3214_v10, %v3085_v9 }
 0x2be   :  { %v956_v26 = vmax.f32 %v901_v18, 0.0  ;;  %1926 = vmatpush.bf16.msra.mxu2 %v3086_v11 }
 0x2c3   :  { %v902_v23 = vpop.f32.mrf.mxu3 }
 0x2c4   :  { %v903_v25 = vadd.f32 %v3653_v8, %v902_v23 }
 0x2c6   :  { %v957_v27 = vmax.f32 %v903_v25, 0.0  ;;  %v3082_v25 = vor.u32 %v3209_v63, %v3079_v21  ;;  %v3055_v63 = vld [vmem:[#allocation2 + $0x138] sm:$0xf0] }
 0x2c7   :  { %v1399_v28 = vpop.f32.mrf.mxu0  ;;  %v1488_v29 = vpop.f32.mrf.mxu1 }
 0x2c8   :  { %v3735_v30 = vpack.c.bf16 %v957_v27, %v956_v26  ;;  %1670 = vmatmul.bf16.gmra.mxu3 %v3669_v33  ;;  %v1400_v40 = vadd.f32 %v1399_v28, %v3747_v34  ;;  %v1489_v41 = vadd.f32 %v1488_v29, %v3750_v36  ;;  %1837 = vmatpush.bf16.msra.mxu1 %v3082_v25 }
 0x2ca   :  { %1438 = vmatmul.bf16.gmra.mxu0 %v3735_v30  ;;  %1527 = vmatmul.bf16.gmra.mxu1 %v3735_v30 }
 0x2cb   :  { %1616 = vmatmul.bf16.gmra.mxu2 %v3735_v30  ;;  %v905_v32 = vpop.f32.mrf.mxu3 }
 0x2cc   :  { %v906_v44 = vadd.f32 %v3653_v8, %v905_v32 }
 0x2ce   :  { %v1577_v38 = vpop.f32.mrf.mxu2  ;;  %v958_v51 = vmax.f32 %v906_v44, 0.0 }
 0x2cf   :  { %v1401_v37 = vpop.f32.mrf.mxu0  ;;  %v1490_v39 = vpop.f32.mrf.mxu1  ;;  %v1578_v54 = vadd.f32 %v1577_v38, %v3758_v47 }
 0x2d0   :  { %v1402_v42 = vadd.f32 %v1401_v37, %v3747_v34  ;;  %v1491_v43 = vadd.f32 %v1490_v39, %v3750_v36 }
 0x2d2   :  { %v2102_v45 = vmax.f32 %v1400_v40, %v1402_v42  ;;  %v2115_v46 = vmax.f32 %v1489_v41, %v1491_v43 }
 0x2d3   :  { %v907_v48 = vpop.f32.mrf.mxu3 }
 0x2d4   :  { %v908_v49 = vadd.f32 %v3653_v8, %v907_v48 }
 0x2d6   :  { %v959_v52 = vmax.f32 %v908_v49, 0.0  ;;  %v1579_v53 = vpop.f32.mrf.mxu2 }
 0x2d7   :  { %v1580_v55 = vadd.f32 %v1579_v53, %v3758_v47  ;;  %v1404_v56 = vpop.f32.mrf.mxu0  ;;  %v1493_v57 = vpop.f32.mrf.mxu1 }
 0x2d8   :  { %v3763_v58 = vpack.c.bf16 %v959_v52, %v958_v51  ;;  %v1405_v59 = vadd.f32 %v1404_v56, %v3747_v34  ;;  %v1494_v60 = vadd.f32 %v1493_v57, %v3750_v36  ;;  %1675 = vmatmul.bf16.gmra.mxu3 %v3679_v50 }
 0x2d9   :  { %v2128_v61 = vmax.f32 %v1578_v54, %v1580_v55 }
 0x2da   :  { %v2103_v4 = vmax.f32 %v2102_v45, %v1405_v59  ;;  %v2116_v0 = vmax.f32 %v2115_v46, %v1494_v60  ;;  %1443 = vmatmul.bf16.gmra.mxu0 %v3763_v58  ;;  %1532 = vmatmul.bf16.gmra.mxu1 %v3763_v58  ;;  %v3077_v60 = vld [vmem:[#allocation2 + $0x150] sm:$0xf] }
 0x2db   :  { %1621 = vmatmul.bf16.gmra.mxu2 %v3763_v58  ;;  %v910_v5 = vpop.f32.mrf.mxu3 }
 0x2dc   :  { %v911_v22 = vadd.f32 %v3653_v8, %v910_v5 }
 0x2de   :  { %v1582_v12 = vpop.f32.mrf.mxu2  ;;  %v960_v28 = vmax.f32 %v911_v22, 0.0 }
 0x2df   :  { %v1583_v13 = vadd.f32 %v1582_v12, %v3758_v47  ;;  %v1406_v14 = vpop.f32.mrf.mxu0  ;;  %v1495_v15 = vpop.f32.mrf.mxu1 }
 0x2e0   :  { %v1407_v16 = vadd.f32 %v1406_v14, %v3747_v34  ;;  %v1496_v17 = vadd.f32 %v1495_v15, %v3750_v36 }
 0x2e1   :  { %v2129_v18 = vmax.f32 %v2128_v61, %v1583_v13  ;;  %v3213_v61 = vld [vmem:[#allocation2 + $0x16c] sm:$0xf0] }
 0x2e2   :  { %v2104_v23 = vmax.f32 %v2103_v4, %v1407_v16  ;;  %v2117_v24 = vmax.f32 %v2116_v0, %v1496_v17  ;;  %v3078_v0 = vor.u32 %v3213_v61, %v3077_v60 }
 0x2e3   :  { %v912_v26 = vpop.f32.mrf.mxu3 }
 0x2e4   :  { %v913_v27 = vadd.f32 %v3653_v8, %v912_v26  ;;  %1748 = vmatpush.bf16.msra.mxu0 %v3078_v0 }
 0x2e6   :  { %v961_v29 = vmax.f32 %v913_v27, 0.0  ;;  %v1584_v32 = vpop.f32.mrf.mxu2 }
 0x2e7   :  { %v1585_v38 = vadd.f32 %v1584_v32, %v3758_v47  ;;  %v1409_v37 = vpop.f32.mrf.mxu0  ;;  %v1498_v39 = vpop.f32.mrf.mxu1 }
 0x2e8   :  { %v3777_v40 = vpack.c.bf16 %v961_v29, %v960_v28  ;;  %v1410_v41 = vadd.f32 %v1409_v37, %v3747_v34  ;;  %v1499_v42 = vadd.f32 %v1498_v39, %v3750_v36  ;;  %1680 = vmatmul.bf16.gmra.mxu3 %v3689_v1  ;;  %v3201_v39 = vld [vmem:[#allocation2 + $0x114] sm:$0xf] }
 0x2e9   :  { %v2130_v43 = vmax.f32 %v2129_v18, %v1585_v38  ;;  %v3202_v18 = vld [vmem:[#allocation2 + $0x11c] sm:$0xf] }
 0x2ea   :  { %v2105_v44 = vmax.f32 %v2104_v23, %v1410_v41  ;;  %v2118_v45 = vmax.f32 %v2117_v24, %v1499_v42  ;;  %1448 = vmatmul.bf16.gmra.mxu0 %v3777_v40  ;;  %1537 = vmatmul.bf16.gmra.mxu1 %v3777_v40  ;;  %v3058_v22 = vor.u32 %v3202_v18, %v3055_v63  ;;  %v3053_v23 = vld [vmem:[#allocation2 + $0x118] sm:$0xf]  ;;  %v3047_v41 = vld [vmem:[#allocation2 + $0x130] sm:$0xf0] }
 0x2eb   :  { %1626 = vmatmul.bf16.gmra.mxu2 %v3777_v40  ;;  %v915_v46 = vpop.f32.mrf.mxu3  ;;  %v3206_v24 = vld [vmem:[#allocation2 + $0x134] sm:$0xf0] }
 0x2ec   :  { %v916_v56 = vadd.f32 %v3653_v8, %v915_v46  ;;  %v3054_v25 = vor.u32 %v3206_v24, %v3053_v23  ;;  %2016 = vmatpush.bf16.msra.mxu3 %v3058_v22  ;;  %v3045_v46 = vld [vmem:[#allocation2 + $0x110] sm:$0xf] }
 0x2ee   :  { %v1587_v48 = vpop.f32.mrf.mxu2  ;;  %v962_v3 = vmax.f32 %v916_v56, 0.0  ;;  %1927 = vmatpush.bf16.msra.mxu2 %v3054_v25 }
 0x2ef   :  { %v1588_v49 = vadd.f32 %v1587_v48, %v3758_v47  ;;  %v1411_v51 = vpop.f32.mrf.mxu0  ;;  %v1500_v52 = vpop.f32.mrf.mxu1  ;;  %v3205_v48 = vld [vmem:[#allocation2 + $0x12c] sm:$0xf0] }
 0x2f0   :  { %v1412_v53 = vadd.f32 %v1411_v51, %v3747_v34  ;;  %v1501_v54 = vadd.f32 %v1500_v52, %v3750_v36  ;;  %v3046_v51 = vor.u32 %v3205_v48, %v3045_v46 }
 0x2f1   :  { %v2131_v55 = vmax.f32 %v2130_v43, %v1588_v49 }
 0x2f2   :  { %v2106_v57 = vmax.f32 %v2105_v44, %v1412_v53  ;;  %v2119_v59 = vmax.f32 %v2118_v45, %v1501_v54  ;;  %v3050_v45 = vor.u32 %v3201_v39, %v3047_v41  ;;  %1749 = vmatpush.bf16.msra.mxu0 %v3046_v51 }
 0x2f3   :  { %v917_v4 = vpop.f32.mrf.mxu3 }
 0x2f4   :  { %v918_v2 = vadd.f32 %v3653_v8, %v917_v4  ;;  %1838 = vmatpush.bf16.msra.mxu1 %v3050_v45 }
 0x2f6   :  { %v963_v5 = vmax.f32 %v918_v2, 0.0  ;;  %v1589_v6 = vpop.f32.mrf.mxu2 }
 0x2f7   :  { %v1590_v9 = vadd.f32 %v1589_v6, %v3758_v47  ;;  %v1414_v10 = vpop.f32.mrf.mxu0  ;;  %v1503_v11 = vpop.f32.mrf.mxu1 }
 0x2f8   :  { %v3791_v12 = vpack.c.bf16 %v963_v5, %v962_v3  ;;  %v1415_v13 = vadd.f32 %v1414_v10, %v3747_v34  ;;  %v1504_v14 = vadd.f32 %v1503_v11, %v3750_v36  ;;  %1685 = vmatmul.bf16.gmra.mxu3 %v3699_v20 }
 0x2f9   :  { %v2132_v15 = vmax.f32 %v2131_v55, %v1590_v9 }
 0x2fa   :  { %v2107_v16 = vmax.f32 %v2106_v57, %v1415_v13  ;;  %v2120_v17 = vmax.f32 %v2119_v59, %v1504_v14  ;;  %1453 = vmatmul.bf16.gmra.mxu0 %v3791_v12  ;;  %1542 = vmatmul.bf16.gmra.mxu1 %v3791_v12 }
 0x2fb   :  { %1631 = vmatmul.bf16.gmra.mxu2 %v3791_v12  ;;  %v920_v21 = vpop.f32.mrf.mxu3 }
 0x2fc   :  { %v921_v42 = vadd.f32 %v3653_v8, %v920_v21 }
 0x2fe   :  { %v1592_v26 = vpop.f32.mrf.mxu2  ;;  %v964_v55 = vmax.f32 %v921_v42, 0.0 }
 0x2ff   :  { %v1593_v27 = vadd.f32 %v1592_v26, %v3758_v47  ;;  %v1416_v28 = vpop.f32.mrf.mxu0  ;;  %v1505_v29 = vpop.f32.mrf.mxu1 }
 0x300   :  { %v1417_v32 = vadd.f32 %v1416_v28, %v3747_v34  ;;  %v1506_v38 = vadd.f32 %v1505_v29, %v3750_v36 }
 0x301   :  { %v2133_v37 = vmax.f32 %v2132_v15, %v1593_v27 }
 0x302   :  { %v2108_v43 = vmax.f32 %v2107_v16, %v1417_v32  ;;  %v2121_v44 = vmax.f32 %v2120_v17, %v1506_v38 }
 0x303   :  { %v922_v49 = vpop.f32.mrf.mxu3 }
 0x304   :  { %v2109_v52 = vrot.slane %v2108_v43, 4  ;;  %v2122_v53 = vrot.slane %v2121_v44, 4  ;;  %v923_v54 = vadd.f32 %v3653_v8, %v922_v49 }
 0x306   :  { %v2110_v56 = vmax.f32 %v2108_v43, %v2109_v52  ;;  %v2123_v57 = vmax.f32 %v2121_v44, %v2122_v53  ;;  %v965_v59 = vmax.f32 %v923_v54, 0.0  ;;  %v1594_v60 = vpop.f32.mrf.mxu2  ;;  %v3021_v52 = vld [vmem:[#allocation2 + $0xd8] sm:$0xf]  ;;  %v3013_v54 = vld [vmem:[#allocation2 + $0xd0] sm:$0xf] }
 0x307   :  { %v1595_v61 = vadd.f32 %v1594_v60, %v3758_v47  ;;  %v1419_v4 = vpop.f32.mrf.mxu0  ;;  %v1508_v0 = vpop.f32.mrf.mxu1  ;;  %v3198_v53 = vld [vmem:[#allocation2 + $0xf4] sm:$0xf0] }
 0x308   :  { %v2111_v2 = vrot.slane %v2110_v56, 2  ;;  %v2124_v3 = vrot.slane %v2123_v57, 2  ;;  %v3805_v5 = vpack.c.bf16 %v965_v59, %v964_v55  ;;  %1690 = vmatmul.bf16.gmra.mxu3 %v3709_v35  ;;  %v1420_v17 = vadd.f32 %v1419_v4, %v3747_v34  ;;  %v3023_v59 = vld [vmem:[#allocation2 + $0xf8] sm:$0xf0] }
 0x309   :  { %v3808_v6 = vmax.f32 %v2133_v37, %v1595_v61  ;;  %v1509_v18 = vadd.f32 %v1508_v0, %v3750_v36  ;;  %v3022_v60 = vor.u32 %v3198_v53, %v3021_v52  ;;  %v3197_v61 = vld [vmem:[#allocation2 + $0xec] sm:$0xf0] }
 0x30a   :  { %v2112_v9 = vmax.f32 %v2110_v56, %v2111_v2  ;;  %v2125_v10 = vmax.f32 %v2123_v57, %v2124_v3  ;;  %1458 = vmatmul.bf16.gmra.mxu0 %v3805_v5  ;;  %1547 = vmatmul.bf16.gmra.mxu1 %v3805_v5  ;;  %v3194_v57 = vld [vmem:[#allocation2 + $0xdc] sm:$0xf]  ;;  %v3014_v2 = vor.u32 %v3197_v61, %v3013_v54  ;;  %v3193_v3 = vld [vmem:[#allocation2 + $0xd4] sm:$0xf] }
 0x30b   :  { %1636 = vmatmul.bf16.gmra.mxu2 %v3805_v5  ;;  %v925_v11 = vpop.f32.mrf.mxu3  ;;  %v3026_v0 = vor.u32 %v3194_v57, %v3023_v59  ;;  %v3173_v57 = vld [vmem:[#allocation2 + $0x2c] sm:$0xf0]  ;;  %v3169_v59 = vld [vmem:[#allocation2 + $0x14] sm:$0xf] }
 0x30c   :  { %v2113_v13 = vrot.slane %v2112_v9, 1  ;;  %v2126_v14 = vrot.slane %v2125_v10, 1  ;;  %v926_v27 = vadd.f32 %v3653_v8, %v925_v11  ;;  %1928 = vmatpush.bf16.msra.mxu2 %v3022_v60  ;;  %1750 = vmatpush.bf16.msra.mxu0 %v3014_v2  ;;  %v2981_v11 = vld [vmem:[#allocation2 + $0x90] sm:$0xf] }
 0x30d   :  { %2017 = vmatpush.bf16.msra.mxu3 %v3026_v0  ;;  %v2925_v0 = vld [vmem:[#allocation2 + $0x18] sm:$0xf] }
 0x30e   :  { %v2127_v15 = vmax.f32 %v2125_v10, %v2126_v14  ;;  %v1597_v16 = vpop.f32.mrf.mxu2  ;;  %v2114_v22 = vmax.f32 %v2112_v9, %v2113_v13  ;;  %v966_v37 = vmax.f32 %v926_v27, 0.0  ;;  %v3015_v9 = vld [vmem:[#allocation2 + $0xf0] sm:$0xf0]  ;;  %v3189_v13 = vld [vmem:[#allocation2 + $0xac] sm:$0xf0] }
 0x30f   :  { %v1421_v63 = vpop.f32.mrf.mxu0  ;;  %v1510_v21 = vpop.f32.mrf.mxu1  ;;  %v1598_v42 = vadd.f32 %v1597_v16, %v3758_v47  ;;  %v3018_v10 = vor.u32 %v3193_v3, %v3015_v9  ;;  %v3185_v14 = vld [vmem:[#allocation2 + $0x94] sm:$0xf]  ;;  %v2982_v16 = vor.u32 %v3189_v13, %v2981_v11  ;;  %v3174_v11 = vld [vmem:[#allocation2 + $0x34] sm:$0xf0] }
 0x310   :  { %v2554_v23 = vrot.slane %v2127_v15, 4  ;;  %v1422_v24 = vadd.f32 %v1421_v63, %v3747_v34  ;;  %v1511_v25 = vadd.f32 %v1510_v21, %v3750_v36 }
 0x311   :  { %1839 = vmatpush.bf16.msra.mxu1 %v3018_v10  ;;  %1751 = vmatpush.bf16.msra.mxu0 %v2982_v16  ;;  %v2926_v16 = vor.u32 %v3174_v11, %v2925_v0 }
 0x312   :  { %v3818_v26 = vsel %vm2570_vm4, %v2114_v22, %v2554_v23  ;;  %v2206_v28 = vmax.f32 %v1420_v17, %v1422_v24  ;;  %v2219_v29 = vmax.f32 %v1509_v18, %v1511_v25  ;;  %v2983_v17 = vld [vmem:[#allocation2 + $0xb0] sm:$0xf0]  ;;  %v2989_v18 = vld [vmem:[#allocation2 + $0x98] sm:$0xf] }
 0x313   :  { %v927_v32 = vpop.f32.mrf.mxu3  ;;  %v2986_v23 = vor.u32 %v3185_v14, %v2983_v17  ;;  %v3190_v24 = vld [vmem:[#allocation2 + $0xb4] sm:$0xf0] }
 0x314   :  { %v928_v38 = vadd.f32 %v3653_v8, %v927_v32 }
 0x315   :  { %1840 = vmatpush.bf16.msra.mxu1 %v2986_v23 }
 0x316   :  { %v967_v39 = vmax.f32 %v928_v38, 0.0  ;;  %v1599_v41 = vpop.f32.mrf.mxu2  ;;  %v2949_v38 = vld [vmem:[#allocation2 + $0x50] sm:$0xf] }
 0x317   :  { %v1600_v43 = vadd.f32 %v1599_v41, %v3758_v47  ;;  %v1424_v44 = vpop.f32.mrf.mxu0  ;;  %v1513_v45 = vpop.f32.mrf.mxu1 }
 0x318   :  { %v3824_v46 = vpack.c.bf16 %v967_v39, %v966_v37  ;;  %v1425_v48 = vadd.f32 %v1424_v44, %v3747_v34  ;;  %v1514_v49 = vadd.f32 %v1513_v45, %v3750_v36  ;;  %1695 = vmatmul.bf16.gmra.mxu3 %v3719_v62  ;;  %v3181_v37 = vld [vmem:[#allocation2 + $0x6c] sm:$0xf0]  ;;  %v3177_v39 = vld [vmem:[#allocation2 + $0x54] sm:$0xf]  ;;  %v2957_v45 = vld [vmem:[#allocation2 + $0x58] sm:$0xf] }
 0x319   :  { %v2232_v51 = vmax.f32 %v1598_v42, %v1600_v43  ;;  %v2950_v43 = vor.u32 %v3181_v37, %v2949_v38  ;;  %v2951_v44 = vld [vmem:[#allocation2 + $0x70] sm:$0xf0] }
 0x31a   :  { %v3829_v55 = vmax.f32 %v2206_v28, %v1425_v48  ;;  %v3831_v56 = vmax.f32 %v2219_v29, %v1514_v49  ;;  %1463 = vmatmul.bf16.gmra.mxu0 %v3824_v46  ;;  %1552 = vmatmul.bf16.gmra.mxu1 %v3824_v46  ;;  %v2990_v28 = vor.u32 %v3190_v24, %v2989_v18  ;;  %v3182_v48 = vld [vmem:[#allocation2 + $0x74] sm:$0xf0] }
 0x31b   :  { %1641 = vmatmul.bf16.gmra.mxu2 %v3824_v46  ;;  %v930_v4 = vpop.f32.mrf.mxu3  ;;  %v2954_v52 = vor.u32 %v3177_v39, %v2951_v44  ;;  %v2958_v53 = vor.u32 %v3182_v48, %v2957_v45  ;;  %1752 = vmatpush.bf16.msra.mxu0 %v2950_v43 }
 0x31c   :  { %v931_v29 = vadd.f32 %v3653_v8, %v930_v4  ;;  %1929 = vmatpush.bf16.msra.mxu2 %v2990_v28  ;;  %v2919_v4 = vld [vmem:[#allocation2 + $0x30] sm:$0xf0] }
 0x31d   :  { %1841 = vmatpush.bf16.msra.mxu1 %v2954_v52  ;;  %v2922_v10 = vor.u32 %v3169_v59, %v2919_v4 }
 0x31e   :  { %v1602_v15 = vpop.f32.mrf.mxu2  ;;  %v968_v60 = vmax.f32 %v931_v29, 0.0 }
 0x31f   :  { %v1603_v63 = vadd.f32 %v1602_v15, %v3758_v47  ;;  %v1426_v21 = vpop.f32.mrf.mxu0  ;;  %v1515_v22 = vpop.f32.mrf.mxu1 }
 0x320   :  { %v1427_v25 = vadd.f32 %v1426_v21, %v3747_v34  ;;  %v1516_v27 = vadd.f32 %v1515_v22, %v3750_v36  ;;  %1930 = vmatpush.bf16.msra.mxu2 %v2958_v53 }
 0x321   :  { %v2233_v32 = vmax.f32 %v2232_v51, %v1603_v63  ;;  %v2917_v51 = vld [vmem:[#allocation2 + $0x10] sm:$0xf]  ;;  %1842 = vmatpush.bf16.msra.mxu1 %v2922_v10 }
 0x322   :  { %v2208_v41 = vmax.f32 %v3829_v55, %v1427_v25  ;;  %v2221_v42 = vmax.f32 %v3831_v56, %v1516_v27  ;;  %v2918_v56 = vor.u32 %v3173_v57, %v2917_v51 }
 0x323   :  { %v932_v49 = vpop.f32.mrf.mxu3 }
 0x324   :  { %v933_v54 = vadd.f32 %v3653_v8, %v932_v49  ;;  %1753 = vmatpush.bf16.msra.mxu0 %v2918_v56  ;;  %1931 = vmatpush.bf16.msra.mxu2 %v2926_v16 }
 0x326   :  { %v969_v61 = vmax.f32 %v933_v54, 0.0  ;;  %v1604_v55 = vpop.f32.mrf.mxu2 }
 0x327   :  { %v1605_v2 = vadd.f32 %v1604_v55, %v3758_v47  ;;  %v1429_v3 = vpop.f32.mrf.mxu0  ;;  %v1518_v9 = vpop.f32.mrf.mxu1 }
 0x328   :  { %v3844_v13 = vpack.c.bf16 %v969_v61, %v968_v60  ;;  %v1430_v14 = vadd.f32 %v1429_v3, %v3747_v34  ;;  %v1519_v15 = vadd.f32 %v1518_v9, %v3750_v36  ;;  %1700 = vmatmul.bf16.gmra.mxu3 %v3727_v7  ;;  %v2991_v60 = vld [vmem:[#allocation2 + $0xb8] sm:$0xf0]  ;;  %v3868_v3 = vperm.slane %v3741_v31, 3 }
 0x329   :  { %v2234_v17 = vmax.f32 %v2233_v32, %v1605_v2 }
 0x32a   :  { %v2209_v18 = vmax.f32 %v2208_v41, %v1430_v14  ;;  %v2222_v63 = vmax.f32 %v2221_v42, %v1519_v15  ;;  %1468 = vmatmul.bf16.gmra.mxu0 %v3844_v13  ;;  %1557 = vmatmul.bf16.gmra.mxu1 %v3844_v13 }
 0x32b   :  { %1646 = vmatmul.bf16.gmra.mxu2 %v3844_v13  ;;  %v935_v21 = vpop.f32.mrf.mxu3 }
 0x32c   :  { %v936_v32 = vadd.f32 %v3653_v8, %v935_v21 }
 0x32e   :  { %v1607_v22 = vpop.f32.mrf.mxu2  ;;  %v970_v42 = vmax.f32 %v936_v32, 0.0 }
 0x32f   :  { %v1608_v23 = vadd.f32 %v1607_v22, %v3758_v47  ;;  %v1431_v24 = vpop.f32.mrf.mxu0  ;;  %v1520_v25 = vpop.f32.mrf.mxu1 }
 0x330   :  { %v1432_v27 = vadd.f32 %v1431_v24, %v3747_v34  ;;  %v1521_v28 = vadd.f32 %v1520_v25, %v3750_v36 }
 0x331   :  { %v2235_v29 = vmax.f32 %v2234_v17, %v1608_v23 }
 0x332   :  { %v2210_v38 = vmax.f32 %v2209_v18, %v1432_v27  ;;  %v2223_v37 = vmax.f32 %v2222_v63, %v1521_v28 }
 0x333   :  { %v937_v39 = vpop.f32.mrf.mxu3 }
 0x334   :  { %v938_v41 = vadd.f32 %v3653_v8, %v937_v39  ;;  %v3186_v8 = vld [vmem:[#allocation2 + $0x9c] sm:$0xf] }
 0x335   :  { %v2994_v55 = vor.u32 %v3186_v8, %v2991_v60 }
 0x336   :  { %v971_v43 = vmax.f32 %v938_v41, 0.0  ;;  %v1609_v44 = vpop.f32.mrf.mxu2 }
 0x337   :  { %v1610_v45 = vadd.f32 %v1609_v44, %v3758_v47  ;;  %v1434_v48 = vpop.f32.mrf.mxu0  ;;  %v1523_v49 = vpop.f32.mrf.mxu1  ;;  %2018 = vmatpush.bf16.msra.mxu3 %v2994_v55 }
 0x338   :  { %v3858_v52 = vpack.c.bf16 %v971_v43, %v970_v42  ;;  %v1435_v53 = vadd.f32 %v1434_v48, %v3747_v34  ;;  %v1524_v54 = vadd.f32 %v1523_v49, %v3750_v36  ;;  %1705 = vmatmul.bf16.gmra.mxu3 %v3735_v30 }
 0x339   :  { %v2236_v51 = vmax.f32 %v2235_v29, %v1610_v45 }
 0x33a   :  { %v2211_v57 = vmax.f32 %v2210_v38, %v1435_v53  ;;  %v2224_v59 = vmax.f32 %v2223_v37, %v1524_v54  ;;  %1473 = vmatmul.bf16.gmra.mxu0 %v3858_v52  ;;  %1562 = vmatmul.bf16.gmra.mxu1 %v3858_v52 }
 0x33b   :  { %1651 = vmatmul.bf16.gmra.mxu2 %v3858_v52  ;;  %v1666_v61 = vpop.f32.mrf.mxu3 }
 0x33c   :  { %v1667_v17 = vadd.f32 %v1666_v61, %v3868_v3 }
 0x33e   :  { %v1612_v56 = vpop.f32.mrf.mxu2 }
 0x33f   :  { %v1613_v4 = vadd.f32 %v1612_v56, %v3758_v47  ;;  %v1436_v0 = vpop.f32.mrf.mxu0  ;;  %v1525_v2 = vpop.f32.mrf.mxu1 }
 0x340   :  { %v1437_v9 = vadd.f32 %v1436_v0, %v3747_v34  ;;  %v1526_v10 = vadd.f32 %v1525_v2, %v3750_v36 }
 0x341   :  { %v2237_v11 = vmax.f32 %v2236_v51, %v1613_v4 }
 0x342   :  { %v2212_v14 = vmax.f32 %v2211_v57, %v1437_v9  ;;  %v2225_v15 = vmax.f32 %v2224_v59, %v1526_v10 }
 0x343   :  { %v1668_v16 = vpop.f32.mrf.mxu3 }
 0x344   :  { %v2213_v18 = vrot.slane %v2212_v14, 4  ;;  %v2226_v63 = vrot.slane %v2225_v15, 4  ;;  %v1669_v21 = vadd.f32 %v1668_v16, %v3868_v3 }
 0x346   :  { %v2214_v22 = vmax.f32 %v2212_v14, %v2213_v18  ;;  %v2227_v23 = vmax.f32 %v2225_v15, %v2226_v63  ;;  %v2141_v24 = vmax.f32 %v1667_v17, %v1669_v21  ;;  %v1614_v25 = vpop.f32.mrf.mxu2 }
 0x347   :  { %v1615_v31 = vadd.f32 %v1614_v25, %v3758_v47  ;;  %v1439_v27 = vpop.f32.mrf.mxu0  ;;  %v1528_v28 = vpop.f32.mrf.mxu1 }
 0x348   :  { %v2215_v29 = vrot.slane %v2214_v22, 2  ;;  %v2228_v32 = vrot.slane %v2227_v23, 2  ;;  %1710 = vmatmul.bf16.gmra.mxu3 %v3763_v58  ;;  %v1440_v53 = vadd.f32 %v1439_v27, %v3747_v34  ;;  %v1529_v54 = vadd.f32 %v1528_v28, %v3750_v36 }
 0x349   :  { %v3876_v38 = vmax.f32 %v2237_v11, %v1615_v31 }
 0x34a   :  { %v2216_v37 = vmax.f32 %v2214_v22, %v2215_v29  ;;  %v2229_v39 = vmax.f32 %v2227_v23, %v2228_v32  ;;  %1754 = vmatmul.bf16.vlgmr.msra.gmra.mxu0 %v3659_v19  ;;  %1843 = vmatmul.bf16.vlgmr.msra.gmra.mxu1 %v3659_v19 }
 0x34b   :  { %1932 = vmatmul.bf16.vlgmr.msra.gmra.mxu2 %v3659_v19  ;;  %v1671_v41 = vpop.f32.mrf.mxu3 }
 0x34c   :  { %v2217_v42 = vrot.slane %v2216_v37, 1  ;;  %v2230_v43 = vrot.slane %v2229_v39, 1  ;;  %v1672_v44 = vadd.f32 %v1671_v41, %v3868_v3 }
 0x34e   :  { %v2231_v45 = vmax.f32 %v2229_v39, %v2230_v43  ;;  %v2142_v48 = vmax.f32 %v2141_v24, %v1672_v44  ;;  %v1617_v49 = vpop.f32.mrf.mxu2  ;;  %v2218_v59 = vmax.f32 %v2216_v37, %v2217_v42 }
 0x34f   :  { %v1441_v51 = vpop.f32.mrf.mxu0  ;;  %v1530_v57 = vpop.f32.mrf.mxu1  ;;  %v1618_v16 = vadd.f32 %v1617_v49, %v3758_v47 }
 0x350   :  { %v2558_v8 = vrot.slane %v2231_v45, 4  ;;  %v1442_v60 = vadd.f32 %v1441_v51, %v3747_v34  ;;  %v1531_v61 = vadd.f32 %v1530_v57, %v3750_v36  ;;  %v2959_v51 = vld [vmem:[#allocation2 + $0x78] sm:$0xf0] }
 0x352   :  { %v2575_v55 = vsel %vm2570_vm4, %v2218_v59, %v2558_v8  ;;  %v2310_v56 = vmax.f32 %v1440_v53, %v1442_v60  ;;  %v2323_v4 = vmax.f32 %v1529_v54, %v1531_v61  ;;  %v3178_v54 = vld [vmem:[#allocation2 + $0x5c] sm:$0xf] }
 0x353   :  { %v2587_v0 = vrot.slane %v2575_v55, 7  ;;  %v1673_v2 = vpop.f32.mrf.mxu3  ;;  %v2962_v60 = vor.u32 %v3178_v54, %v2959_v51 }
 0x354   :  { %v1674_v9 = vadd.f32 %v1673_v2, %v3868_v3 }
 0x355   :  { %v2589_v10 = vsel %vm2588_vm5, %v2587_v0, %v3818_v26  ;;  %2019 = vmatpush.bf16.msra.mxu3 %v2962_v60 }
 0x356   :  { %v3891_v11 = vsel %vm2590_vm6, %v2587_v0, %v2589_v10  ;;  %v2143_v14 = vmax.f32 %v2142_v48, %v1674_v9  ;;  %v1619_v15 = vpop.f32.mrf.mxu2 }
 0x357   :  { %v1620_v17 = vadd.f32 %v1619_v15, %v3758_v47  ;;  %v1444_v18 = vpop.f32.mrf.mxu0  ;;  %v1533_v63 = vpop.f32.mrf.mxu1  ;;  %v2135_v15 = vrot.slane %v3808_v6, 4 }
 0x358   :  { %v1445_v21 = vadd.f32 %v1444_v18, %v3747_v34  ;;  %v1534_v22 = vadd.f32 %v1533_v63, %v3750_v36  ;;  %1715 = vmatmul.bf16.gmra.mxu3 %v3777_v40 }
 0x359   :  { %v2336_v23 = vmax.f32 %v1618_v16, %v1620_v17 }
 0x35a   :  { %v2311_v24 = vmax.f32 %v2310_v56, %v1445_v21  ;;  %v2324_v26 = vmax.f32 %v2323_v4, %v1534_v22  ;;  %1759 = vmatmul.bf16.gmra.mxu0 %v3669_v33  ;;  %1848 = vmatmul.bf16.gmra.mxu1 %v3669_v33 }
 0x35b   :  { %1937 = vmatmul.bf16.gmra.mxu2 %v3669_v33  ;;  %v1676_v25 = vpop.f32.mrf.mxu3 }
 0x35c   :  { %v1677_v31 = vadd.f32 %v1676_v25, %v3868_v3 }
 0x35e   :  { %v2144_v27 = vmax.f32 %v2143_v14, %v1677_v31  ;;  %v1622_v28 = vpop.f32.mrf.mxu2 }
 0x35f   :  { %v1623_v29 = vadd.f32 %v1622_v28, %v3758_v47  ;;  %v1446_v32 = vpop.f32.mrf.mxu0  ;;  %v1535_v37 = vpop.f32.mrf.mxu1 }
 0x360   :  { %v1447_v39 = vadd.f32 %v1446_v32, %v3747_v34  ;;  %v1536_v41 = vadd.f32 %v1535_v37, %v3750_v36 }
 0x361   :  { %v2337_v42 = vmax.f32 %v2336_v23, %v1623_v29 }
 0x362   :  { %v2312_v43 = vmax.f32 %v2311_v24, %v1447_v39  ;;  %v2325_v44 = vmax.f32 %v2324_v26, %v1536_v41  ;;  %v2136_v26 = vmax.f32 %v3808_v6, %v2135_v15 }
 0x363   :  { %v1678_v45 = vpop.f32.mrf.mxu3 }
 0x364   :  { %v1679_v48 = vadd.f32 %v1678_v45, %v3868_v3  ;;  %v2137_v29 = vrot.slane %v2136_v26, 2 }
 0x366   :  { %v2145_v49 = vmax.f32 %v2144_v27, %v1679_v48  ;;  %v1624_v53 = vpop.f32.mrf.mxu2  ;;  %v2138_v54 = vmax.f32 %v2136_v26, %v2137_v29 }
 0x367   :  { %v1625_v57 = vadd.f32 %v1624_v53, %v3758_v47  ;;  %v1449_v59 = vpop.f32.mrf.mxu0  ;;  %v1538_v8 = vpop.f32.mrf.mxu1  ;;  %v2927_v53 = vld [vmem:[#allocation2 + $0x38] sm:$0xf0] }
 0x368   :  { %v1450_v61 = vadd.f32 %v1449_v59, %v3747_v34  ;;  %v1539_v55 = vadd.f32 %v1538_v8, %v3750_v36  ;;  %1720 = vmatmul.bf16.gmra.mxu3 %v3791_v12 }
 0x369   :  { %v2338_v56 = vmax.f32 %v2337_v42, %v1625_v57 }
 0x36a   :  { %v2313_v4 = vmax.f32 %v2312_v43, %v1450_v61  ;;  %v2326_v0 = vmax.f32 %v2325_v44, %v1539_v55  ;;  %1764 = vmatmul.bf16.gmra.mxu0 %v3679_v50  ;;  %1853 = vmatmul.bf16.gmra.mxu1 %v3679_v50  ;;  %v2139_v61 = vrot.slane %v2138_v54, 1 }
 0x36b   :  { %1942 = vmatmul.bf16.gmra.mxu2 %v3679_v50  ;;  %v1681_v2 = vpop.f32.mrf.mxu3 }
 0x36c   :  { %v1682_v9 = vadd.f32 %v1681_v2, %v3868_v3 }
 0x36e   :  { %v2146_v10 = vmax.f32 %v2145_v49, %v1682_v9  ;;  %v1627_v14 = vpop.f32.mrf.mxu2  ;;  %v3170_v49 = vld [vmem:[#allocation2 + $0x1c] sm:$0xf] }
 0x36f   :  { %v1628_v16 = vadd.f32 %v1627_v14, %v3758_v47  ;;  %v1451_v17 = vpop.f32.mrf.mxu0  ;;  %v1540_v18 = vpop.f32.mrf.mxu1  ;;  %v2930_v57 = vor.u32 %v3170_v49, %v2927_v53 }
 0x370   :  { %v1452_v63 = vadd.f32 %v1451_v17, %v3747_v34  ;;  %v1541_v21 = vadd.f32 %v1540_v18, %v3750_v36  ;;  %v2140_v17 = vmax.f32 %v2138_v54, %v2139_v61 }
 0x371   :  { %v2339_v22 = vmax.f32 %v2338_v56, %v1628_v16  ;;  %2020 = vmatpush.bf16.msra.mxu3 %v2930_v57 }
 0x372   :  { %v2314_v23 = vmax.f32 %v2313_v4, %v1452_v63  ;;  %v2327_v24 = vmax.f32 %v2326_v0, %v1541_v21 }
 0x373   :  { %v1683_v25 = vpop.f32.mrf.mxu3 }
 0x374   :  { %v1684_v31 = vadd.f32 %v1683_v25, %v3868_v3 }
 0x376   :  { %v2147_v27 = vmax.f32 %v2146_v10, %v1684_v31  ;;  %v1629_v28 = vpop.f32.mrf.mxu2 }
 0x377   :  { %v1630_v32 = vadd.f32 %v1629_v28, %v3758_v47  ;;  %v1454_v37 = vpop.f32.mrf.mxu0  ;;  %v1543_v39 = vpop.f32.mrf.mxu1 }
 0x378   :  { %v2148_v41 = vrot.slane %v2147_v27, 4  ;;  %v1455_v42 = vadd.f32 %v1454_v37, %v3747_v34  ;;  %v1544_v43 = vadd.f32 %v1543_v39, %v3750_v36  ;;  %1725 = vmatmul.bf16.gmra.mxu3 %v3805_v5 }
 0x379   :  { %v2340_v44 = vmax.f32 %v2339_v22, %v1630_v32 }
 0x37a   :  { %v2149_v45 = vmax.f32 %v2147_v27, %v2148_v41  ;;  %v2315_v6 = vmax.f32 %v2314_v23, %v1455_v42  ;;  %v2328_v48 = vmax.f32 %v2327_v24, %v1544_v43  ;;  %1769 = vmatmul.bf16.gmra.mxu0 %v3689_v1  ;;  %1858 = vmatmul.bf16.gmra.mxu1 %v3689_v1 }
 0x37b   :  { %1947 = vmatmul.bf16.gmra.mxu2 %v3689_v1  ;;  %v1686_v51 = vpop.f32.mrf.mxu3 }
 0x37c   :  { %v2150_v59 = vrot.slane %v2149_v45, 2  ;;  %v1687_v18 = vadd.f32 %v1686_v51, %v3868_v3 }
 0x37e   :  { %v2151_v8 = vmax.f32 %v2149_v45, %v2150_v59  ;;  %v1632_v60 = vpop.f32.mrf.mxu2 }
 0x37f   :  { %v1633_v55 = vadd.f32 %v1632_v60, %v3758_v47  ;;  %v1456_v56 = vpop.f32.mrf.mxu0  ;;  %v1545_v4 = vpop.f32.mrf.mxu1 }
 0x380   :  { %v2152_v0 = vrot.slane %v2151_v8, 1  ;;  %v1457_v2 = vadd.f32 %v1456_v56, %v3747_v34  ;;  %v1546_v9 = vadd.f32 %v1545_v4, %v3750_v36 }
 0x381   :  { %v2341_v10 = vmax.f32 %v2340_v44, %v1633_v55 }
 0x382   :  { %v2153_v14 = vmax.f32 %v2151_v8, %v2152_v0  ;;  %v2316_v15 = vmax.f32 %v2315_v6, %v1457_v2  ;;  %v2329_v16 = vmax.f32 %v2328_v48, %v1546_v9 }
 0x383   :  { %v1688_v63 = vpop.f32.mrf.mxu3 }
 0x384   :  { %v2555_v21 = vrot.slane %v2153_v14, 4  ;;  %v2317_v22 = vrot.slane %v2316_v15, 4  ;;  %v2330_v23 = vrot.slane %v2329_v16, 4  ;;  %v1689_v24 = vadd.f32 %v1688_v63, %v3868_v3 }
 0x386   :  { %v3933_v26 = vsel %vm2570_vm4, %v2140_v17, %v2555_v21  ;;  %v2318_v25 = vmax.f32 %v2316_v15, %v2317_v22  ;;  %v2331_v31 = vmax.f32 %v2329_v16, %v2330_v23  ;;  %v2245_v27 = vmax.f32 %v1687_v18, %v1689_v24  ;;  %v1634_v28 = vpop.f32.mrf.mxu2 }
 0x387   :  { %v1635_v29 = vadd.f32 %v1634_v28, %v3758_v47  ;;  %v3936_v32 = vpop.f32.mrf.mxu0  ;;  %v3938_v37 = vpop.f32.mrf.mxu1 }
 0x388   :  { %v2319_v39 = vrot.slane %v2318_v25, 2  ;;  %v2332_v41 = vrot.slane %v2331_v31, 2  ;;  %1730 = vmatmul.bf16.gmra.mxu3 %v3824_v46 }
 0x389   :  { %v3941_v42 = vmax.f32 %v2341_v10, %v1635_v29 }
 0x38a   :  { %v2320_v43 = vmax.f32 %v2318_v25, %v2319_v39  ;;  %v2333_v44 = vmax.f32 %v2331_v31, %v2332_v41  ;;  %1774 = vmatmul.bf16.gmra.mxu0 %v3699_v20  ;;  %1863 = vmatmul.bf16.gmra.mxu1 %v3699_v20 }
 0x38b   :  { %1952 = vmatmul.bf16.gmra.mxu2 %v3699_v20  ;;  %v1691_v45 = vpop.f32.mrf.mxu3 }
 0x38c   :  { %v2321_v6 = vrot.slane %v2320_v43, 1  ;;  %v2334_v48 = vrot.slane %v2333_v44, 1  ;;  %v1692_v49 = vadd.f32 %v1691_v45, %v3868_v3 }
 0x38e   :  { %v2335_v53 = vmax.f32 %v2333_v44, %v2334_v48  ;;  %v2246_v54 = vmax.f32 %v2245_v27, %v1692_v49  ;;  %v1637_v51 = vpop.f32.mrf.mxu2  ;;  %v2322_v8 = vmax.f32 %v2320_v43, %v2321_v6 }
 0x38f   :  { %v1461_v57 = vpop.f32.mrf.mxu0  ;;  %v1550_v59 = vpop.f32.mrf.mxu1  ;;  %v1638_v14 = vadd.f32 %v1637_v51, %v3758_v47 }
 0x390   :  { %v2562_v60 = vrot.slane %v2335_v53, 4 }
 0x392   :  { %v2579_v61 = vsel %vm2570_vm4, %v2322_v8, %v2562_v60 }
 0x393   :  { %v2592_v55 = vrot.slane %v2579_v61, 6  ;;  %v1693_v56 = vpop.f32.mrf.mxu3  ;;  %v1462_v61 = vadd.f32 %v1461_v57, %v3747_v34 }
 0x394   :  { %v1694_v4 = vadd.f32 %v1693_v56, %v3868_v3  ;;  %v1551_v56 = vadd.f32 %v1550_v59, %v3750_v36 }
 0x395   :  { %v2594_v0 = vsel %vm2593_vm7, %v2592_v55, %v3891_v11 }
 0x396   :  { %v2247_v2 = vmax.f32 %v2246_v54, %v1694_v4  ;;  %v1639_v9 = vpop.f32.mrf.mxu2  ;;  %v3952_v10 = vsel %vm2595_vm8, %v2592_v55, %v2594_v0  ;;  %v2239_v54 = vrot.slane %v3876_v38, 4  ;;  %v1460_v0 = vadd.f32 %v3936_v32, %v3747_v34 }
 0x397   :  { %v1640_v15 = vadd.f32 %v1639_v9, %v3758_v47  ;;  %v1464_v16 = vpop.f32.mrf.mxu0  ;;  %v1553_v17 = vpop.f32.mrf.mxu1 }
 0x398   :  { %1735 = vmatmul.bf16.gmra.mxu3 %v3844_v13  ;;  %v2240_v4 = vmax.f32 %v3876_v38, %v2239_v54 }
 0x399   :  { %v2440_v18 = vmax.f32 %v1638_v14, %v1640_v15  ;;  %v1549_v14 = vadd.f32 %v3938_v37, %v3750_v36  ;;  %v1554_v15 = vadd.f32 %v1553_v17, %v3750_v36 }
 0x39a   :  { %1779 = vmatmul.bf16.gmra.mxu0 %v3709_v35  ;;  %1868 = vmatmul.bf16.gmra.mxu1 %v3709_v35 }
 0x39b   :  { %1957 = vmatmul.bf16.gmra.mxu2 %v3709_v35  ;;  %v1696_v11 = vpop.f32.mrf.mxu3 }
 0x39c   :  { %v1697_v63 = vadd.f32 %v1696_v11, %v3868_v3  ;;  %v2414_v11 = vmax.f32 %v1460_v0, %v1462_v61 }
 0x39e   :  { %v2248_v21 = vmax.f32 %v2247_v2, %v1697_v63  ;;  %v1642_v22 = vpop.f32.mrf.mxu2  ;;  %v1465_v2 = vadd.f32 %v1464_v16, %v3747_v34  ;;  %v2427_v63 = vmax.f32 %v1549_v14, %v1551_v56 }
 0x39f   :  { %v1643_v23 = vadd.f32 %v1642_v22, %v3758_v47  ;;  %v1466_v24 = vpop.f32.mrf.mxu0  ;;  %v1555_v25 = vpop.f32.mrf.mxu1  ;;  %v2241_v22 = vrot.slane %v2240_v4, 2 }
 0x3a0   :  { %v1467_v57 = vadd.f32 %v1466_v24, %v3747_v34  ;;  %v1556_v59 = vadd.f32 %v1555_v25, %v3750_v36  ;;  %v2415_v32 = vmax.f32 %v2414_v11, %v1465_v2 }
 0x3a1   :  { %v2441_v31 = vmax.f32 %v2440_v18, %v1643_v23 }
 0x3a2   :  { %v2416_v24 = vmax.f32 %v2415_v32, %v1467_v57 }
 0x3a3   :  { %v1698_v27 = vpop.f32.mrf.mxu3 }
 0x3a4   :  { %v1699_v28 = vadd.f32 %v1698_v27, %v3868_v3  ;;  %v2428_v27 = vmax.f32 %v2427_v63, %v1554_v15 }
 0x3a6   :  { %v2249_v29 = vmax.f32 %v2248_v21, %v1699_v28  ;;  %v1644_v39 = vpop.f32.mrf.mxu2 }
 0x3a7   :  { %v1645_v41 = vadd.f32 %v1644_v39, %v3758_v47  ;;  %v1469_v43 = vpop.f32.mrf.mxu0  ;;  %v1558_v44 = vpop.f32.mrf.mxu1  ;;  %v2429_v39 = vmax.f32 %v2428_v27, %v1556_v59 }
 0x3a8   :  { %1740 = vmatmul.bf16.gmra.mxu3 %v3858_v52  ;;  %v1470_v16 = vadd.f32 %v1469_v43, %v3747_v34  ;;  %v1559_v17 = vadd.f32 %v1558_v44, %v3750_v36  ;;  %v2242_v43 = vmax.f32 %v2240_v4, %v2241_v22 }
 0x3a9   :  { %v2442_v45 = vmax.f32 %v2441_v31, %v1645_v41 }
 0x3aa   :  { %1784 = vmatmul.bf16.gmra.mxu0 %v3719_v62  ;;  %1873 = vmatmul.bf16.gmra.mxu1 %v3719_v62  ;;  %v2243_v61 = vrot.slane %v2242_v43, 1 }
 0x3ab   :  { %1962 = vmatmul.bf16.gmra.mxu2 %v3719_v62  ;;  %v1701_v6 = vpop.f32.mrf.mxu3 }
 0x3ac   :  { %v1702_v48 = vadd.f32 %v1701_v6, %v3868_v3  ;;  %v2417_v6 = vmax.f32 %v2416_v24, %v1470_v16  ;;  %v2244_v59 = vmax.f32 %v2242_v43, %v2243_v61 }
 0x3ae   :  { %v2250_v49 = vmax.f32 %v2249_v29, %v1702_v48  ;;  %v1647_v53 = vpop.f32.mrf.mxu2 }
 0x3af   :  { %v1648_v51 = vadd.f32 %v1647_v53, %v3758_v47  ;;  %v1471_v8 = vpop.f32.mrf.mxu0  ;;  %v1560_v60 = vpop.f32.mrf.mxu1 }
 0x3b0   :  { %v1472_v29 = vadd.f32 %v1471_v8, %v3747_v34  ;;  %v1561_v41 = vadd.f32 %v1560_v60, %v3750_v36 }
 0x3b1   :  { %v2443_v55 = vmax.f32 %v2442_v45, %v1648_v51 }
 0x3b2   :  { %v2418_v54 = vmax.f32 %v2417_v6, %v1472_v29  ;;  %v4015_v6 = vld [vmem:[%s4288_s10] sm:$0xff]  ;;  %s3297_s10 = smov [#allocation5]  }
 0x3b3   :  { %v1703_v9 = vpop.f32.mrf.mxu3  ;;  %s2769_s30 = sshll.u32 %s3297_s10, 4  ;;  %s2770_s30 = int_to_ptr.vmem [resolvable:$true] %s2769_s30 }
 0x3b4   :  { %v1704_v18 = vadd.f32 %v1703_v9, %v3868_v3 }
 0x3b6   :  { %v2251_v38 = vmax.f32 %v2250_v49, %v1704_v18  ;;  %v1649_v21 = vpop.f32.mrf.mxu2 }
 0x3b7   :  { %v1650_v23 = vadd.f32 %v1649_v21, %v3758_v47  ;;  %v1474_v31 = vpop.f32.mrf.mxu0  ;;  %v1563_v37 = vpop.f32.mrf.mxu1 }
 0x3b8   :  { %v2252_v28 = vrot.slane %v2251_v38, 4  ;;  %2021 = vmatmul.bf16.vlgmr.msra.gmra.mxu3 %v3659_v19  ;;  %v1475_v48 = vadd.f32 %v1474_v31, %v3747_v34  ;;  %v2430_v19 = vmax.f32 %v2429_v39, %v1559_v17  ;;  %v1564_v53 = vadd.f32 %v1563_v37, %v3750_v36 }
 0x3b9   :  { %v2444_v25 = vmax.f32 %v2443_v55, %v1650_v23 }
 0x3ba   :  { %v2253_v45 = vmax.f32 %v2251_v38, %v2252_v28  ;;  %1789 = vmatmul.bf16.gmra.mxu0 %v3727_v7  ;;  %1878 = vmatmul.bf16.gmra.mxu1 %v3727_v7  ;;  %v2431_v51 = vmax.f32 %v2430_v19, %v1561_v41  ;;  %v2419_v55 = vmax.f32 %v2418_v54, %v1475_v48  ;;  %v4018_v48 = vperm.slane %v4015_v6, 4 }
 0x3bb   :  { %1967 = vmatmul.bf16.gmra.mxu2 %v3727_v7  ;;  %v1706_v44 = vpop.f32.mrf.mxu3 }
 0x3bc   :  { %v2254_v49 = vrot.slane %v2253_v45, 2  ;;  %v2432_v9 = vmax.f32 %v2431_v51, %v1564_v53  ;;  %v1707_v38 = vadd.f32 %v1706_v44, %v3868_v3 }
 0x3be   :  { %v2255_v8 = vmax.f32 %v2253_v45, %v2254_v49  ;;  %v1652_v60 = vpop.f32.mrf.mxu2 }
 0x3bf   :  { %v1653_v56 = vadd.f32 %v1652_v60, %v3758_v47  ;;  %v1476_v0 = vpop.f32.mrf.mxu0  ;;  %v1565_v4 = vpop.f32.mrf.mxu1 }
 0x3c0   :  { %v2256_v2 = vrot.slane %v2255_v8, 1  ;;  %v1477_v14 = vadd.f32 %v1476_v0, %v3747_v34  ;;  %v1566_v15 = vadd.f32 %v1565_v4, %v3750_v36 }
 0x3c1   :  { %v3997_v18 = vmax.f32 %v2444_v25, %v1653_v56 }
 0x3c2   :  { %v2257_v11 = vmax.f32 %v2255_v8, %v2256_v2  ;;  %v2420_v57 = vmax.f32 %v2419_v55, %v1477_v14  ;;  %v2433_v63 = vmax.f32 %v2432_v9, %v1566_v15 }
 0x3c3   :  { %v1708_v21 = vpop.f32.mrf.mxu3 }
 0x3c4   :  { %v2559_v22 = vrot.slane %v2257_v11, 4  ;;  %v2421_v32 = vrot.slane %v2420_v57, 4  ;;  %v2434_v16 = vrot.slane %v2433_v63, 4  ;;  %v1709_v23 = vadd.f32 %v1708_v21, %v3868_v3 }
 0x3c6   :  { %v2576_v31 = vsel %vm2570_vm4, %v2244_v59, %v2559_v22  ;;  %v2422_v37 = vmax.f32 %v2420_v57, %v2421_v32  ;;  %v2435_v34 = vmax.f32 %v2433_v63, %v2434_v16  ;;  %v2349_v27 = vmax.f32 %v1707_v38, %v1709_v23  ;;  %v4002_v36 = vpop.f32.mrf.mxu2 }
 0x3c7   :  { %v2602_v17 = vrot.slane %v2576_v31, 7  ;;  %v1755_v28 = vpop.f32.mrf.mxu0  ;;  %v1844_v24 = vpop.f32.mrf.mxu1  ;;  %v4031_v57 = vperm.slane %v4015_v6, 6 }
 0x3c8   :  { %v2423_v29 = vrot.slane %v2422_v37, 2  ;;  %v2436_v25 = vrot.slane %v2435_v34, 2  ;;  %2026 = vmatmul.bf16.gmra.mxu3 %v3669_v33  ;;  %v4021_v33 = vperm.slane %v4015_v6, 5  ;;  %v1756_v8 = vadd.f32 %v1755_v28, %v4018_v48 }
 0x3c9   :  { %v2603_v39 = vsel %vm2588_vm5, %v2602_v17, %v3933_v26 }
 0x3ca   :  { %v4008_v41 = vsel %vm2590_vm6, %v2602_v17, %v2603_v39  ;;  %v2424_v45 = vmax.f32 %v2422_v37, %v2423_v29  ;;  %v2437_v43 = vmax.f32 %v2435_v34, %v2436_v25  ;;  %1794 = vmatmul.bf16.gmra.mxu0 %v3735_v30  ;;  %1883 = vmatmul.bf16.gmra.mxu1 %v3735_v30 }
 0x3cb   :  { %1972 = vmatmul.bf16.gmra.mxu2 %v3735_v30  ;;  %v1711_v26 = vpop.f32.mrf.mxu3  ;;  %v1845_v60 = vadd.f32 %v1844_v24, %v4021_v33 }
 0x3cc   :  { %v2425_v44 = vrot.slane %v2424_v45, 1  ;;  %v2438_v19 = vrot.slane %v2437_v43, 1  ;;  %v1712_v49 = vadd.f32 %v1711_v26, %v3868_v3 }
 0x3ce   :  { %v2439_v53 = vmax.f32 %v2437_v43, %v2438_v19  ;;  %v2350_v54 = vmax.f32 %v2349_v27, %v1712_v49  ;;  %v1933_v51 = vpop.f32.mrf.mxu2  ;;  %v2426_v56 = vmax.f32 %v2424_v45, %v2425_v44 }
 0x3cf   :  { %v1757_v61 = vpop.f32.mrf.mxu0  ;;  %v1846_v55 = vpop.f32.mrf.mxu1  ;;  %v1934_v16 = vadd.f32 %v1933_v51, %v4031_v57 }
 0x3d0   :  { %v2566_v0 = vrot.slane %v2439_v53, 4  ;;  %v1758_v4 = vadd.f32 %v1757_v61, %v4018_v48  ;;  %v1847_v2 = vadd.f32 %v1846_v55, %v4021_v33 }
 0x3d2   :  { %v2583_v9 = vsel %vm2570_vm4, %v2426_v56, %v2566_v0  ;;  %v2154_v14 = vmax.f32 %v1756_v8, %v1758_v4  ;;  %v2167_v15 = vmax.f32 %v1845_v60, %v1847_v2 }
 0x3d3   :  { %v2597_v11 = vrot.slane %v2583_v9, 5  ;;  %v1713_v63 = vpop.f32.mrf.mxu3 }
 0x3d4   :  { %v1714_v59 = vadd.f32 %v1713_v63, %v3868_v3 }
 0x3d5   :  { %v2599_v38 = vsel %vm2598_vm9, %v2597_v11, %v3952_v10 }
 0x3d6   :  { %v2351_v21 = vmax.f32 %v2350_v54, %v1714_v59  ;;  %v1935_v22 = vpop.f32.mrf.mxu2  ;;  %v2601_v32 = vsel %vm2600_vm10, %v2597_v11, %v2599_v38 }
 0x3d7   :  { %v1936_v23 = vadd.f32 %v1935_v22, %v4031_v57  ;;  %v1760_v31 = vpop.f32.mrf.mxu0  ;;  %v1849_v37 = vpop.f32.mrf.mxu1  ;;  %2633 = vst [vmem:[#allocation5] sm:$0xff] %v2601_v32 }
 0x3d8   :  { %v1761_v34 = vadd.f32 %v1760_v31, %v4018_v48  ;;  %v1850_v27 = vadd.f32 %v1849_v37, %v4021_v33  ;;  %2031 = vmatmul.bf16.gmra.mxu3 %v3679_v50 }
 0x3d9   :  { %v2180_v17 = vmax.f32 %v1934_v16, %v1936_v23 }
 0x3da   :  { %v2155_v28 = vmax.f32 %v2154_v14, %v1761_v34  ;;  %v2168_v10 = vmax.f32 %v2167_v15, %v1850_v27  ;;  %1799 = vmatmul.bf16.gmra.mxu0 %v3763_v58  ;;  %1888 = vmatmul.bf16.gmra.mxu1 %v3763_v58 }
 0x3db   :  { %1977 = vmatmul.bf16.gmra.mxu2 %v3763_v58  ;;  %v1716_v24 = vpop.f32.mrf.mxu3 }
 0x3dc   :  { %v1717_v29 = vadd.f32 %v1716_v24, %v3868_v3 }
 0x3de   :  { %v2352_v25 = vmax.f32 %v2351_v21, %v1717_v29  ;;  %v1938_v39 = vpop.f32.mrf.mxu2 }
 0x3df   :  { %v1939_v45 = vadd.f32 %v1938_v39, %v4031_v57  ;;  %v1762_v43 = vpop.f32.mrf.mxu0  ;;  %v1851_v26 = vpop.f32.mrf.mxu1 }
 0x3e0   :  { %v1763_v50 = vadd.f32 %v1762_v43, %v4018_v48  ;;  %v1852_v44 = vadd.f32 %v1851_v26, %v4021_v33 }
 0x3e1   :  { %v2181_v19 = vmax.f32 %v2180_v17, %v1939_v45 }
 0x3e2   :  { %v2156_v49 = vmax.f32 %v2155_v28, %v1763_v50  ;;  %v2169_v53 = vmax.f32 %v2168_v10, %v1852_v44 }
 0x3e3   :  { %v1718_v54 = vpop.f32.mrf.mxu3 }
 0x3e4   :  { %v1719_v51 = vadd.f32 %v1718_v54, %v3868_v3 }
 0x3e6   :  { %v2353_v8 = vmax.f32 %v2352_v25, %v1719_v51  ;;  %v1940_v60 = vpop.f32.mrf.mxu2 }
 0x3e7   :  { %v1941_v61 = vadd.f32 %v1940_v60, %v4031_v57  ;;  %v1765_v55 = vpop.f32.mrf.mxu0  ;;  %v1854_v56 = vpop.f32.mrf.mxu1 }
 0x3e8   :  { %v1766_v0 = vadd.f32 %v1765_v55, %v4018_v48  ;;  %v1855_v4 = vadd.f32 %v1854_v56, %v4021_v33  ;;  %2036 = vmatmul.bf16.gmra.mxu3 %v3689_v1  ;;  %v2343_v1 = vrot.slane %v3941_v42, 4 }
 0x3e9   :  { %v2182_v2 = vmax.f32 %v2181_v19, %v1941_v61 }
 0x3ea   :  { %v2157_v9 = vmax.f32 %v2156_v49, %v1766_v0  ;;  %v2170_v14 = vmax.f32 %v2169_v53, %v1855_v4  ;;  %1804 = vmatmul.bf16.gmra.mxu0 %v3777_v40  ;;  %1893 = vmatmul.bf16.gmra.mxu1 %v3777_v40  ;;  %v2344_v27 = vmax.f32 %v3941_v42, %v2343_v1 }
 0x3eb   :  { %1982 = vmatmul.bf16.gmra.mxu2 %v3777_v40  ;;  %v1721_v15 = vpop.f32.mrf.mxu3 }
 0x3ec   :  { %v1722_v11 = vadd.f32 %v1721_v15, %v3868_v3  ;;  %v2345_v39 = vrot.slane %v2344_v27, 2 }
 0x3ee   :  { %v2354_v63 = vmax.f32 %v2353_v8, %v1722_v11  ;;  %v1943_v59 = vpop.f32.mrf.mxu2  ;;  %v2346_v53 = vmax.f32 %v2344_v27, %v2345_v39 }
 0x3ef   :  { %v1944_v38 = vadd.f32 %v1943_v59, %v4031_v57  ;;  %v1767_v21 = vpop.f32.mrf.mxu0  ;;  %v1856_v22 = vpop.f32.mrf.mxu1 }
 0x3f0   :  { %v1768_v32 = vadd.f32 %v1767_v21, %v4018_v48  ;;  %v1857_v16 = vadd.f32 %v1856_v22, %v4021_v33  ;;  %v2347_v55 = vrot.slane %v2346_v53, 1 }
 0x3f1   :  { %v2183_v23 = vmax.f32 %v2182_v2, %v1944_v38 }
 0x3f2   :  { %v2158_v31 = vmax.f32 %v2157_v9, %v1768_v32  ;;  %v2171_v37 = vmax.f32 %v2170_v14, %v1857_v16 }
 0x3f3   :  { %v1723_v34 = vpop.f32.mrf.mxu3 }
 0x3f4   :  { %v1724_v17 = vadd.f32 %v1723_v34, %v3868_v3 }
 0x3f6   :  { %v2355_v28 = vmax.f32 %v2354_v63, %v1724_v17  ;;  %v1945_v10 = vpop.f32.mrf.mxu2  ;;  %v2348_v63 = vmax.f32 %v2346_v53, %v2347_v55 }
 0x3f7   :  { %v1946_v24 = vadd.f32 %v1945_v10, %v4031_v57  ;;  %v1770_v29 = vpop.f32.mrf.mxu0  ;;  %v1859_v25 = vpop.f32.mrf.mxu1 }
 0x3f8   :  { %v2356_v45 = vrot.slane %v2355_v28, 4  ;;  %v1771_v43 = vadd.f32 %v1770_v29, %v4018_v48  ;;  %v1860_v26 = vadd.f32 %v1859_v25, %v4021_v33  ;;  %2041 = vmatmul.bf16.gmra.mxu3 %v3699_v20 }
 0x3f9   :  { %v2184_v50 = vmax.f32 %v2183_v23, %v1946_v24 }
 0x3fa   :  { %v2357_v44 = vmax.f32 %v2355_v28, %v2356_v45  ;;  %v2159_v19 = vmax.f32 %v2158_v31, %v1771_v43  ;;  %v2172_v42 = vmax.f32 %v2171_v37, %v1860_v26  ;;  %1809 = vmatmul.bf16.gmra.mxu0 %v3791_v12  ;;  %1898 = vmatmul.bf16.gmra.mxu1 %v3791_v12 }
 0x3fb   :  { %1987 = vmatmul.bf16.gmra.mxu2 %v3791_v12  ;;  %v4071_v49 = vpop.f32.mrf.mxu3 }
 0x3fc   :  { %v2358_v54 = vrot.slane %v2357_v44, 2 }
 0x3fe   :  { %v2359_v51 = vmax.f32 %v2357_v44, %v2358_v54  ;;  %v1948_v8 = vpop.f32.mrf.mxu2 }
 0x3ff   :  { %v1949_v60 = vadd.f32 %v1948_v8, %v4031_v57  ;;  %v1772_v61 = vpop.f32.mrf.mxu0  ;;  %v1861_v20 = vpop.f32.mrf.mxu1 }
 0x400   :  { %v2360_v56 = vrot.slane %v2359_v51, 1  ;;  %v1773_v0 = vadd.f32 %v1772_v61, %v4018_v48  ;;  %v1862_v4 = vadd.f32 %v1861_v20, %v4021_v33 }
 0x401   :  { %v2185_v2 = vmax.f32 %v2184_v50, %v1949_v60 }
 0x402   :  { %v2361_v9 = vmax.f32 %v2359_v51, %v2360_v56  ;;  %v2160_v14 = vmax.f32 %v2159_v19, %v1773_v0  ;;  %v2173_v15 = vmax.f32 %v2172_v42, %v1862_v4 }
 0x403   :  { %v4076_v11 = vpop.f32.mrf.mxu3 }
 0x404   :  { %v2563_v59 = vrot.slane %v2361_v9, 4  ;;  %v2161_v38 = vrot.slane %v2160_v14, 4  ;;  %v2174_v21 = vrot.slane %v2173_v15, 4 }
 0x406   :  { %v2580_v22 = vsel %vm2570_vm4, %v2348_v63, %v2563_v59  ;;  %v2162_v1 = vmax.f32 %v2160_v14, %v2161_v38  ;;  %v2175_v32 = vmax.f32 %v2173_v15, %v2174_v21  ;;  %v1950_v16 = vpop.f32.mrf.mxu2 }
 0x407   :  { %v2605_v23 = vrot.slane %v2580_v22, 6  ;;  %v1951_v31 = vadd.f32 %v1950_v16, %v4031_v57  ;;  %v1775_v37 = vpop.f32.mrf.mxu0  ;;  %v1864_v34 = vpop.f32.mrf.mxu1 }
 0x408   :  { %v2163_v27 = vrot.slane %v2162_v1, 2  ;;  %v2176_v17 = vrot.slane %v2175_v32, 2  ;;  %2046 = vmatmul.bf16.gmra.mxu3 %v3709_v35  ;;  %v1776_v50 = vadd.f32 %v1775_v37, %v4018_v48 }
 0x409   :  { %v4081_v28 = vmax.f32 %v2185_v2, %v1951_v31  ;;  %v2606_v10 = vsel %vm2593_vm7, %v2605_v23, %v4008_v41  ;;  %v1865_v41 = vadd.f32 %v1864_v34, %v4021_v33 }
 0x40a   :  { %v2164_v24 = vmax.f32 %v2162_v1, %v2163_v27  ;;  %v2177_v29 = vmax.f32 %v2175_v32, %v2176_v17  ;;  %1814 = vmatmul.bf16.gmra.mxu0 %v3805_v5  ;;  %1903 = vmatmul.bf16.gmra.mxu1 %v3805_v5  ;;  %v4088_v25 = vsel %vm2595_vm8, %v2605_v23, %v2606_v10 }
 0x40b   :  { %1992 = vmatmul.bf16.gmra.mxu2 %v3805_v5  ;;  %v1731_v39 = vpop.f32.mrf.mxu3  ;;  %v1729_v27 = vadd.f32 %v4076_v11, %v3868_v3  ;;  %v1655_v10 = vadd.f32 %v4002_v36, %v3758_v47 }
 0x40c   :  { %v2165_v45 = vrot.slane %v2164_v24, 1  ;;  %v2178_v43 = vrot.slane %v2177_v29, 1 }
 0x40e   :  { %v2179_v35 = vmax.f32 %v2177_v29, %v2178_v43  ;;  %v1953_v26 = vpop.f32.mrf.mxu2  ;;  %v2166_v42 = vmax.f32 %v2164_v24, %v2165_v45  ;;  %v1727_v24 = vadd.f32 %v4071_v49, %v3868_v3  ;;  %v2446_v49 = vmax.f32 %v3997_v18, %v1655_v10 }
 0x40f   :  { %v1777_v44 = vpop.f32.mrf.mxu0  ;;  %v1866_v19 = vpop.f32.mrf.mxu1  ;;  %v1954_v56 = vadd.f32 %v1953_v26, %v4031_v57 }
 0x410   :  { %v2556_v53 = vrot.slane %v2179_v35, 4  ;;  %v1778_v54 = vadd.f32 %v1777_v44, %v4018_v48  ;;  %v1867_v51 = vadd.f32 %v1866_v19, %v4021_v33  ;;  %v1732_v35 = vadd.f32 %v1731_v39, %v3868_v3 }
 0x411   :  { %v2453_v11 = vmax.f32 %v1727_v24, %v1729_v27 }
 0x412   :  { %v4096_v8 = vsel %vm2570_vm4, %v2166_v42, %v2556_v53  ;;  %v2258_v60 = vmax.f32 %v1776_v50, %v1778_v54  ;;  %v2271_v61 = vmax.f32 %v1865_v41, %v1867_v51  ;;  %v2447_v51 = vrot.slane %v2446_v49, 4 }
 0x413   :  { %v1733_v20 = vpop.f32.mrf.mxu3  ;;  %v2454_v19 = vmax.f32 %v2453_v11, %v1732_v35 }
 0x414   :  { %v1734_v44 = vadd.f32 %v1733_v20, %v3868_v3 }
 0x416   :  { %v1955_v55 = vpop.f32.mrf.mxu2  ;;  %v2455_v53 = vmax.f32 %v2454_v19, %v1734_v44 }
 0x417   :  { %v1956_v0 = vadd.f32 %v1955_v55, %v4031_v57  ;;  %v1780_v4 = vpop.f32.mrf.mxu0  ;;  %v1869_v2 = vpop.f32.mrf.mxu1 }
 0x418   :  { %v1781_v9 = vadd.f32 %v1780_v4, %v4018_v48  ;;  %v1870_v14 = vadd.f32 %v1869_v2, %v4021_v33  ;;  %2051 = vmatmul.bf16.gmra.mxu3 %v3719_v62 }
 0x419   :  { %v2284_v15 = vmax.f32 %v1954_v56, %v1956_v0 }
 0x41a   :  { %v2259_v63 = vmax.f32 %v2258_v60, %v1781_v9  ;;  %v2272_v59 = vmax.f32 %v2271_v61, %v1870_v14  ;;  %1819 = vmatmul.bf16.gmra.mxu0 %v3824_v46  ;;  %1908 = vmatmul.bf16.gmra.mxu1 %v3824_v46 }
 0x41b   :  { %1997 = vmatmul.bf16.gmra.mxu2 %v3824_v46  ;;  %v1736_v38 = vpop.f32.mrf.mxu3 }
 0x41c   :  { %v1737_v42 = vadd.f32 %v1736_v38, %v3868_v3 }
 0x41e   :  { %v1958_v21 = vpop.f32.mrf.mxu2  ;;  %v2456_v55 = vmax.f32 %v2455_v53, %v1737_v42 }
 0x41f   :  { %v1959_v22 = vadd.f32 %v1958_v21, %v4031_v57  ;;  %v1782_v1 = vpop.f32.mrf.mxu0  ;;  %v1871_v32 = vpop.f32.mrf.mxu1 }
 0x420   :  { %v1783_v16 = vadd.f32 %v1782_v1, %v4018_v48  ;;  %v1872_v23 = vadd.f32 %v1871_v32, %v4021_v33 }
 0x421   :  { %v2285_v62 = vmax.f32 %v2284_v15, %v1959_v22  ;;  %v2448_v15 = vmax.f32 %v2446_v49, %v2447_v51 }
 0x422   :  { %v2260_v31 = vmax.f32 %v2259_v63, %v1783_v16  ;;  %v2273_v37 = vmax.f32 %v2272_v59, %v1872_v23 }
 0x423   :  { %v1738_v34 = vpop.f32.mrf.mxu3  ;;  %v2449_v1 = vrot.slane %v2448_v15, 2 }
 0x426   :  { %v1960_v17 = vpop.f32.mrf.mxu2 }
 0x427   :  { %v1961_v29 = vadd.f32 %v1960_v17, %v4031_v57  ;;  %v1785_v45 = vpop.f32.mrf.mxu0  ;;  %v1874_v43 = vpop.f32.mrf.mxu1 }
 0x428   :  { %v1786_v26 = vadd.f32 %v1785_v45, %v4018_v48  ;;  %v1875_v50 = vadd.f32 %v1874_v43, %v4021_v33  ;;  %2056 = vmatmul.bf16.gmra.mxu3 %v3727_v7  ;;  %v1739_v7 = vadd.f32 %v1738_v34, %v3868_v3 }
 0x429   :  { %v2286_v41 = vmax.f32 %v2285_v62, %v1961_v29 }
 0x42a   :  { %v2261_v47 = vmax.f32 %v2260_v31, %v1786_v26  ;;  %v2274_v36 = vmax.f32 %v2273_v37, %v1875_v50  ;;  %1824 = vmatmul.bf16.gmra.mxu0 %v3844_v13  ;;  %1913 = vmatmul.bf16.gmra.mxu1 %v3844_v13  ;;  %v2457_v2 = vmax.f32 %v2456_v55, %v1739_v7  ;;  %v4140_v26 = vperm.slane %v4015_v6, 7 }
 0x42b   :  { %2002 = vmatmul.bf16.gmra.mxu2 %v3844_v13  ;;  %v1741_v39 = vpop.f32.mrf.mxu3 }
 0x42c   :  { %v1742_v56 = vadd.f32 %v1741_v39, %v3868_v3 }
 0x42e   :  { %v1963_v54 = vpop.f32.mrf.mxu2  ;;  %v2458_v59 = vmax.f32 %v2457_v2, %v1742_v56 }
 0x42f   :  { %v1964_v60 = vadd.f32 %v1963_v54, %v4031_v57  ;;  %v1787_v61 = vpop.f32.mrf.mxu0  ;;  %v1876_v20 = vpop.f32.mrf.mxu1 }
 0x430   :  { %v1788_v18 = vadd.f32 %v1787_v61, %v4018_v48  ;;  %v1877_v0 = vadd.f32 %v1876_v20, %v4021_v33 }
 0x431   :  { %v2287_v4 = vmax.f32 %v2286_v41, %v1964_v60 }
 0x432   :  { %v2262_v9 = vmax.f32 %v2261_v47, %v1788_v18  ;;  %v2275_v14 = vmax.f32 %v2274_v36, %v1877_v0 }
 0x433   :  { %v1743_v63 = vpop.f32.mrf.mxu3 }
 0x434   :  { %v1744_v38 = vadd.f32 %v1743_v63, %v3868_v3  ;;  %v2450_v3 = vmax.f32 %v2448_v15, %v2449_v1 }
 0x436   :  { %v2459_v21 = vmax.f32 %v2458_v59, %v1744_v38  ;;  %v1965_v22 = vpop.f32.mrf.mxu2  ;;  %v2451_v35 = vrot.slane %v2450_v3, 1 }
 0x437   :  { %v1966_v32 = vadd.f32 %v1965_v22, %v4031_v57  ;;  %v1790_v16 = vpop.f32.mrf.mxu0  ;;  %v1879_v23 = vpop.f32.mrf.mxu1 }
 0x438   :  { %v2460_v62 = vrot.slane %v2459_v21, 4  ;;  %v1791_v31 = vadd.f32 %v1790_v16, %v4018_v48  ;;  %v1880_v37 = vadd.f32 %v1879_v23, %v4021_v33  ;;  %2061 = vmatmul.bf16.gmra.mxu3 %v3735_v30  ;;  %v2452_v42 = vmax.f32 %v2450_v3, %v2451_v35 }
 0x439   :  { %v2288_v34 = vmax.f32 %v2287_v4, %v1966_v32 }
 0x43a   :  { %v2461_v27 = vmax.f32 %v2459_v21, %v2460_v62  ;;  %v2263_v17 = vmax.f32 %v2262_v9, %v1791_v31  ;;  %v2276_v10 = vmax.f32 %v2275_v14, %v1880_v37  ;;  %1829 = vmatmul.bf16.gmra.mxu0 %v3858_v52  ;;  %1918 = vmatmul.bf16.gmra.mxu1 %v3858_v52 }
 0x43b   :  { %2007 = vmatmul.bf16.gmra.mxu2 %v3858_v52  ;;  %v2022_v24 = vpop.f32.mrf.mxu3 }
 0x43c   :  { %v2462_v29 = vrot.slane %v2461_v27, 2  ;;  %v2023_v53 = vadd.f32 %v2022_v24, %v4140_v26 }
 0x43e   :  { %v2463_v45 = vmax.f32 %v2461_v27, %v2462_v29  ;;  %v1968_v43 = vpop.f32.mrf.mxu2 }
 0x43f   :  { %v1969_v30 = vadd.f32 %v1968_v43, %v4031_v57  ;;  %v1792_v50 = vpop.f32.mrf.mxu0  ;;  %v1881_v11 = vpop.f32.mrf.mxu1 }
 0x440   :  { %v2464_v41 = vrot.slane %v2463_v45, 1  ;;  %v1793_v44 = vadd.f32 %v1792_v50, %v4018_v48  ;;  %v1882_v47 = vadd.f32 %v1881_v11, %v4021_v33 }
 0x441   :  { %v2289_v36 = vmax.f32 %v2288_v34, %v1969_v30 }
 0x442   :  { %v2465_v49 = vmax.f32 %v2463_v45, %v2464_v41  ;;  %v2264_v39 = vmax.f32 %v2263_v17, %v1793_v44  ;;  %v2277_v19 = vmax.f32 %v2276_v10, %v1882_v47 }
 0x443   :  { %v2024_v7 = vpop.f32.mrf.mxu3 }
 0x444   :  { %v2567_v54 = vrot.slane %v2465_v49, 4  ;;  %v2265_v6 = vrot.slane %v2264_v39, 4  ;;  %v2278_v51 = vrot.slane %v2277_v19, 4  ;;  %v2025_v60 = vadd.f32 %v2024_v7, %v4140_v26 }
 0x446   :  { %v2584_v61 = vsel %vm2570_vm4, %v2452_v42, %v2567_v54  ;;  %v2266_v20 = vmax.f32 %v2264_v39, %v2265_v6  ;;  %v2279_v55 = vmax.f32 %v2277_v19, %v2278_v51  ;;  %v2193_v56 = vmax.f32 %v2023_v53, %v2025_v60  ;;  %v1970_v18 = vpop.f32.mrf.mxu2 }
 0x447   :  { %v2608_v0 = vrot.slane %v2584_v61, 5  ;;  %v1971_v4 = vadd.f32 %v1970_v18, %v4031_v57  ;;  %v1795_v2 = vpop.f32.mrf.mxu0  ;;  %v1884_v9 = vpop.f32.mrf.mxu1 }
 0x448   :  { %v2267_v14 = vrot.slane %v2266_v20, 2  ;;  %v2280_v15 = vrot.slane %v2279_v55, 2  ;;  %2066 = vmatmul.bf16.gmra.mxu3 %v3763_v58  ;;  %v1796_v58 = vadd.f32 %v1795_v2, %v4018_v48  ;;  %v1885_v34 = vadd.f32 %v1884_v9, %v4021_v33 }
 0x449   :  { %v4150_v63 = vmax.f32 %v2289_v36, %v1971_v4  ;;  %v2609_v59 = vsel %vm2598_vm9, %v2608_v0, %v4088_v25 }
 0x44a   :  { %v2268_v38 = vmax.f32 %v2266_v20, %v2267_v14  ;;  %v2281_v21 = vmax.f32 %v2279_v55, %v2280_v15  ;;  %v2610_v22 = vsel %vm2600_vm10, %v2608_v0, %v2609_v59 }
 0x44b   :  { %v2027_v1 = vpop.f32.mrf.mxu3  ;;  %2634 = vst [vmem:[#allocation5 + $0x8] sm:$0xff] %v2610_v22 }
 0x44c   :  { %v2269_v32 = vrot.slane %v2268_v38, 1  ;;  %v2282_v16 = vrot.slane %v2281_v21, 1  ;;  %v2028_v23 = vadd.f32 %v2027_v1, %v4140_v26 }
 0x44e   :  { %v2283_v62 = vmax.f32 %v2281_v21, %v2282_v16  ;;  %v2194_v31 = vmax.f32 %v2193_v56, %v2028_v23  ;;  %v1973_v37 = vpop.f32.mrf.mxu2  ;;  %v2270_v25 = vmax.f32 %v2268_v38, %v2269_v32 }
 0x44f   :  { %v1797_v27 = vpop.f32.mrf.mxu0  ;;  %v1886_v17 = vpop.f32.mrf.mxu1  ;;  %v1974_v36 = vadd.f32 %v1973_v37, %v4031_v57 }
 0x450   :  { %v2560_v10 = vrot.slane %v2283_v62, 4  ;;  %v1798_v3 = vadd.f32 %v1797_v27, %v4018_v48  ;;  %v1887_v24 = vadd.f32 %v1886_v17, %v4021_v33  ;;  %v2187_v27 = vrot.slane %v4081_v28, 4 }
 0x452   :  { %v2577_v29 = vsel %vm2570_vm4, %v2270_v25, %v2560_v10  ;;  %v2362_v45 = vmax.f32 %v1796_v58, %v1798_v3  ;;  %v2375_v43 = vmax.f32 %v1885_v34, %v1887_v24 }
 0x453   :  { %v2611_v35 = vrot.slane %v2577_v29, 7  ;;  %v2029_v30 = vpop.f32.mrf.mxu3 }
 0x454   :  { %v2030_v50 = vadd.f32 %v2029_v30, %v4140_v26 }
 0x455   :  { %v2612_v11 = vsel %vm2588_vm5, %v2611_v35, %v4096_v8 }
 0x456   :  { %v4165_v41 = vsel %vm2590_vm6, %v2611_v35, %v2612_v11  ;;  %v2195_v44 = vmax.f32 %v2194_v31, %v2030_v50  ;;  %v1975_v47 = vpop.f32.mrf.mxu2 }
 0x457   :  { %v1976_v49 = vadd.f32 %v1975_v47, %v4031_v57  ;;  %v1800_v39 = vpop.f32.mrf.mxu0  ;;  %v1889_v19 = vpop.f32.mrf.mxu1 }
 0x458   :  { %v1801_v42 = vadd.f32 %v1800_v39, %v4018_v48  ;;  %v1890_v53 = vadd.f32 %v1889_v19, %v4021_v33  ;;  %2071 = vmatmul.bf16.gmra.mxu3 %v3777_v40 }
 0x459   :  { %v2388_v7 = vmax.f32 %v1974_v36, %v1976_v49 }
 0x45a   :  { %v2363_v54 = vmax.f32 %v2362_v45, %v1801_v42  ;;  %v2376_v8 = vmax.f32 %v2375_v43, %v1890_v53  ;;  %v2188_v43 = vmax.f32 %v4081_v28, %v2187_v27 }
 0x45b   :  { %v2032_v6 = vpop.f32.mrf.mxu3 }
 0x45c   :  { %v2033_v51 = vadd.f32 %v2032_v6, %v4140_v26 }
 0x45e   :  { %v2196_v60 = vmax.f32 %v2195_v44, %v2033_v51  ;;  %v1978_v61 = vpop.f32.mrf.mxu2  ;;  %v2189_v44 = vrot.slane %v2188_v43, 2 }
 0x45f   :  { %v1979_v20 = vadd.f32 %v1978_v61, %v4031_v57  ;;  %v1802_v55 = vpop.f32.mrf.mxu0  ;;  %v1891_v56 = vpop.f32.mrf.mxu1 }
 0x460   :  { %v1803_v18 = vadd.f32 %v1802_v55, %v4018_v48  ;;  %v1892_v0 = vadd.f32 %v1891_v56, %v4021_v33 }
 0x461   :  { %v2389_v4 = vmax.f32 %v2388_v7, %v1979_v20 }
 0x462   :  { %v2364_v2 = vmax.f32 %v2363_v54, %v1803_v18  ;;  %v2377_v9 = vmax.f32 %v2376_v8, %v1892_v0  ;;  %v2190_v8 = vmax.f32 %v2188_v43, %v2189_v44 }
 0x463   :  { %v2034_v40 = vpop.f32.mrf.mxu3 }
 0x464   :  { %v2035_v14 = vadd.f32 %v2034_v40, %v4140_v26  ;;  %v2191_v20 = vrot.slane %v2190_v8, 1 }
 0x466   :  { %v2197_v15 = vmax.f32 %v2196_v60, %v2035_v14  ;;  %v1980_v59 = vpop.f32.mrf.mxu2 }
 0x467   :  { %v1981_v38 = vadd.f32 %v1980_v59, %v4031_v57  ;;  %v1805_v21 = vpop.f32.mrf.mxu0  ;;  %v1894_v22 = vpop.f32.mrf.mxu1 }
 0x468   :  { %v1806_v1 = vadd.f32 %v1805_v21, %v4018_v48  ;;  %v1895_v32 = vadd.f32 %v1894_v22, %v4021_v33  ;;  %2076 = vmatmul.bf16.gmra.mxu3 %v3791_v12 }
 0x469   :  { %v2390_v16 = vmax.f32 %v2389_v4, %v1981_v38 }
 0x46a   :  { %v2365_v23 = vmax.f32 %v2364_v2, %v1806_v1  ;;  %v2378_v62 = vmax.f32 %v2377_v9, %v1895_v32 }
 0x46b   :  { %v2037_v31 = vpop.f32.mrf.mxu3 }
 0x46c   :  { %v2038_v37 = vadd.f32 %v2037_v31, %v4140_v26 }
 0x46e   :  { %v2198_v58 = vmax.f32 %v2197_v15, %v2038_v37  ;;  %v1983_v34 = vpop.f32.mrf.mxu2  ;;  %v2192_v15 = vmax.f32 %v2190_v8, %v2191_v20 }
 0x46f   :  { %v1984_v17 = vadd.f32 %v1983_v34, %v4031_v57  ;;  %v1807_v25 = vpop.f32.mrf.mxu0  ;;  %v1896_v10 = vpop.f32.mrf.mxu1 }
 0x470   :  { %v1808_v3 = vadd.f32 %v1807_v25, %v4018_v48  ;;  %v1897_v24 = vadd.f32 %v1896_v10, %v4021_v33 }
 0x471   :  { %v2391_v29 = vmax.f32 %v2390_v16, %v1984_v17 }
 0x472   :  { %v2366_v12 = vmax.f32 %v2365_v23, %v1808_v3  ;;  %v2379_v45 = vmax.f32 %v2378_v62, %v1897_v24 }
 0x473   :  { %v2039_v35 = vpop.f32.mrf.mxu3 }
 0x474   :  { %v2040_v30 = vadd.f32 %v2039_v35, %v4140_v26 }
 0x476   :  { %v2199_v50 = vmax.f32 %v2198_v58, %v2040_v30  ;;  %v1985_v11 = vpop.f32.mrf.mxu2 }
 0x477   :  { %v1986_v47 = vadd.f32 %v1985_v11, %v4031_v57  ;;  %v1810_v36 = vpop.f32.mrf.mxu0  ;;  %v1899_v49 = vpop.f32.mrf.mxu1 }
 0x478   :  { %v2200_v39 = vrot.slane %v2199_v50, 4  ;;  %v1811_v19 = vadd.f32 %v1810_v36, %v4018_v48  ;;  %v1900_v42 = vadd.f32 %v1899_v49, %v4021_v33  ;;  %2081 = vmatmul.bf16.gmra.mxu3 %v3805_v5 }
 0x479   :  { %v2392_v53 = vmax.f32 %v2391_v29, %v1986_v47 }
 0x47a   :  { %v2201_v7 = vmax.f32 %v2199_v50, %v2200_v39  ;;  %v2367_v28 = vmax.f32 %v2366_v12, %v1811_v19  ;;  %v2380_v54 = vmax.f32 %v2379_v45, %v1900_v42 }
 0x47b   :  { %v2042_v6 = vpop.f32.mrf.mxu3 }
 0x47c   :  { %v2202_v51 = vrot.slane %v2201_v7, 2  ;;  %v2043_v59 = vadd.f32 %v2042_v6, %v4140_v26 }
 0x47e   :  { %v2203_v60 = vmax.f32 %v2201_v7, %v2202_v51  ;;  %v1988_v61 = vpop.f32.mrf.mxu2 }
 0x47f   :  { %v1989_v55 = vadd.f32 %v1988_v61, %v4031_v57  ;;  %v1812_v56 = vpop.f32.mrf.mxu0  ;;  %v1901_v18 = vpop.f32.mrf.mxu1 }
 0x480   :  { %v2204_v0 = vrot.slane %v2203_v60, 1  ;;  %v1813_v4 = vadd.f32 %v1812_v56, %v4018_v48  ;;  %v1902_v2 = vadd.f32 %v1901_v18, %v4021_v33 }
 0x481   :  { %v4195_v5 = vmax.f32 %v2392_v53, %v1989_v55 }
 0x482   :  { %v2205_v9 = vmax.f32 %v2203_v60, %v2204_v0  ;;  %v2368_v40 = vmax.f32 %v2367_v28, %v1813_v4  ;;  %v2381_v14 = vmax.f32 %v2380_v54, %v1902_v2 }
 0x483   :  { %v2044_v38 = vpop.f32.mrf.mxu3 }
 0x484   :  { %v2557_v21 = vrot.slane %v2205_v9, 4  ;;  %v2369_v22 = vrot.slane %v2368_v40, 4  ;;  %v2382_v1 = vrot.slane %v2381_v14, 4  ;;  %v2045_v32 = vadd.f32 %v2044_v38, %v4140_v26 }
 0x486   :  { %v4200_v16 = vsel %vm2570_vm4, %v2192_v15, %v2557_v21  ;;  %v2370_v23 = vmax.f32 %v2368_v40, %v2369_v22  ;;  %v2383_v62 = vmax.f32 %v2381_v14, %v2382_v1  ;;  %v2297_v31 = vmax.f32 %v2043_v59, %v2045_v32 }
 0x487   :  { %v1815_v37 = vpop.f32.mrf.mxu0  ;;  %v1904_v58 = vpop.f32.mrf.mxu1 }
 0x488   :  { %v2371_v34 = vrot.slane %v2370_v23, 2  ;;  %v2384_v27 = vrot.slane %v2383_v62, 2  ;;  %2086 = vmatmul.bf16.gmra.mxu3 %v3824_v46  ;;  %v1816_v40 = vadd.f32 %v1815_v37, %v4018_v48 }
 0x48a   :  { %v2372_v17 = vmax.f32 %v2370_v23, %v2371_v34  ;;  %v2385_v25 = vmax.f32 %v2383_v62, %v2384_v27 }
 0x48b   :  { %v2047_v10 = vpop.f32.mrf.mxu3 }
 0x48c   :  { %v2373_v3 = vrot.slane %v2372_v17, 1  ;;  %v2386_v24 = vrot.slane %v2385_v25, 1  ;;  %v2048_v29 = vadd.f32 %v2047_v10, %v4140_v26 }
 0x48e   :  { %v2387_v12 = vmax.f32 %v2385_v25, %v2386_v24  ;;  %v2298_v45 = vmax.f32 %v2297_v31, %v2048_v29  ;;  %v2374_v30 = vmax.f32 %v2372_v17, %v2373_v3 }
 0x48f   :  { %v1817_v43 = vpop.f32.mrf.mxu0  ;;  %v1906_v35 = vpop.f32.mrf.mxu1 }
 0x490   :  { %v2564_v50 = vrot.slane %v2387_v12, 4  ;;  %v1818_v4 = vadd.f32 %v1817_v43, %v4018_v48  ;;  %v1907_v2 = vadd.f32 %v1906_v35, %v4021_v33 }
 0x492   :  { %v2581_v11 = vsel %vm2570_vm4, %v2374_v30, %v2564_v50  ;;  %v2466_v21 = vmax.f32 %v1816_v40, %v1818_v4 }
 0x493   :  { %v2614_v44 = vrot.slane %v2581_v11, 6  ;;  %v2049_v47 = vpop.f32.mrf.mxu3 }
 0x494   :  { %v2050_v36 = vadd.f32 %v2049_v47, %v4140_v26 }
 0x495   :  { %v2615_v46 = vsel %vm2593_vm7, %v2614_v44, %v4165_v41 }
 0x496   :  { %v2299_v49 = vmax.f32 %v2298_v45, %v2050_v36  ;;  %v4209_v39 = vsel %vm2595_vm8, %v2614_v44, %v2615_v46 }
 0x497   :  { %v1820_v19 = vpop.f32.mrf.mxu0  ;;  %v1909_v42 = vpop.f32.mrf.mxu1 }
 0x498   :  { %2091 = vmatmul.bf16.gmra.mxu3 %v3844_v13  ;;  %v2291_v13 = vrot.slane %v4150_v63, 4  ;;  %v1821_v14 = vadd.f32 %v1820_v19, %v4018_v48  ;;  %v1910_v59 = vadd.f32 %v1909_v42, %v4021_v33 }
 0x49a   :  { %v2292_v9 = vmax.f32 %v4150_v63, %v2291_v13  ;;  %v2467_v63 = vmax.f32 %v2466_v21, %v1821_v14 }
 0x49b   :  { %v2052_v53 = vpop.f32.mrf.mxu3 }
 0x49c   :  { %v2053_v7 = vadd.f32 %v2052_v53, %v4140_v26  ;;  %v2293_v62 = vrot.slane %v2292_v9, 2 }
 0x49e   :  { %v2300_v28 = vmax.f32 %v2299_v49, %v2053_v7  ;;  %v2294_v12 = vmax.f32 %v2292_v9, %v2293_v62 }
 0x49f   :  { %v1822_v54 = vpop.f32.mrf.mxu0  ;;  %v1911_v8 = vpop.f32.mrf.mxu1 }
 0x4a0   :  { %v1823_v22 = vadd.f32 %v1822_v54, %v4018_v48  ;;  %v1912_v32 = vadd.f32 %v1911_v8, %v4021_v33  ;;  %v2295_v46 = vrot.slane %v2294_v12, 1 }
 0x4a2   :  { %v2468_v25 = vmax.f32 %v2467_v63, %v1823_v22 }
 0x4a3   :  { %v2054_v6 = vpop.f32.mrf.mxu3 }
 0x4a4   :  { %v2055_v51 = vadd.f32 %v2054_v6, %v4140_v26 }
 0x4a6   :  { %v2301_v60 = vmax.f32 %v2300_v28, %v2055_v51 }
 0x4a7   :  { %v1825_v61 = vpop.f32.mrf.mxu0  ;;  %v1914_v41 = vpop.f32.mrf.mxu1 }
 0x4a8   :  { %2096 = vmatmul.bf16.gmra.mxu3 %v3858_v52  ;;  %v1905_v52 = vadd.f32 %v1904_v58, %v4021_v33  ;;  %v1826_v31 = vadd.f32 %v1825_v61, %v4018_v48  ;;  %v1915_v58 = vadd.f32 %v1914_v41, %v4021_v33 }
 0x4aa   :  { %v2479_v1 = vmax.f32 %v1905_v52, %v1907_v2  ;;  %v2469_v45 = vmax.f32 %v2468_v25, %v1826_v31 }
 0x4ab   :  { %v2057_v20 = vpop.f32.mrf.mxu3 }
 0x4ac   :  { %v2058_v55 = vadd.f32 %v2057_v20, %v4140_v26  ;;  %v2480_v27 = vmax.f32 %v2479_v1, %v1910_v59 }
 0x4ae   :  { %v2302_v56 = vmax.f32 %v2301_v60, %v2058_v55  ;;  %v2481_v3 = vmax.f32 %v2480_v27, %v1912_v32  ;;  %v2296_v60 = vmax.f32 %v2294_v12, %v2295_v46 }
 0x4af   :  { %v1827_v18 = vpop.f32.mrf.mxu0  ;;  %v1916_v0 = vpop.f32.mrf.mxu1 }
 0x4b0   :  { %v1828_v10 = vadd.f32 %v1827_v18, %v4018_v48  ;;  %v1917_v24 = vadd.f32 %v1916_v0, %v4021_v33  ;;  %v2482_v30 = vmax.f32 %v2481_v3, %v1915_v58 }
 0x4b2   :  { %v2470_v44 = vmax.f32 %v2469_v45, %v1828_v10  ;;  %v2483_v47 = vmax.f32 %v2482_v30, %v1917_v24 }
 0x4b3   :  { %v2059_v15 = vpop.f32.mrf.mxu3 }
 0x4b4   :  { %v2060_v38 = vadd.f32 %v2059_v15, %v4140_v26 }
 0x4b6   :  { %v2303_v23 = vmax.f32 %v2302_v56, %v2060_v38 }
 0x4b7   :  { %v1830_v37 = vpop.f32.mrf.mxu0  ;;  %v1919_v34 = vpop.f32.mrf.mxu1 }
 0x4b8   :  { %v2304_v17 = vrot.slane %v2303_v23, 4  ;;  %v1831_v43 = vadd.f32 %v1830_v37, %v4018_v48  ;;  %v1920_v11 = vadd.f32 %v1919_v34, %v4021_v33 }
 0x4ba   :  { %v2305_v29 = vmax.f32 %v2303_v23, %v2304_v17  ;;  %v2471_v49 = vmax.f32 %v2470_v44, %v1831_v43  ;;  %v2484_v7 = vmax.f32 %v2483_v47, %v1920_v11 }
 0x4bb   :  { %v2062_v35 = vpop.f32.mrf.mxu3 }
 0x4bc   :  { %v2306_v50 = vrot.slane %v2305_v29, 2  ;;  %v2063_v61 = vadd.f32 %v2062_v35, %v4140_v26 }
 0x4be   :  { %v2307_v36 = vmax.f32 %v2305_v29, %v2306_v50 }
 0x4bf   :  { %v1832_v19 = vpop.f32.mrf.mxu0  ;;  %v1921_v42 = vpop.f32.mrf.mxu1 }
 0x4c0   :  { %v2308_v53 = vrot.slane %v2307_v36, 1  ;;  %v1833_v28 = vadd.f32 %v1832_v19, %v4018_v48  ;;  %v1922_v54 = vadd.f32 %v1921_v42, %v4021_v33 }
 0x4c2   :  { %v2309_v8 = vmax.f32 %v2307_v36, %v2308_v53  ;;  %v2472_v6 = vmax.f32 %v2471_v49, %v1833_v28  ;;  %v2485_v51 = vmax.f32 %v2484_v7, %v1922_v54 }
 0x4c3   :  { %v2064_v41 = vpop.f32.mrf.mxu3 }
 0x4c4   :  { %v2561_v20 = vrot.slane %v2309_v8, 4  ;;  %v2473_v55 = vrot.slane %v2472_v6, 4  ;;  %v2486_v56 = vrot.slane %v2485_v51, 4  ;;  %v2065_v13 = vadd.f32 %v2064_v41, %v4140_v26 }
 0x4c6   :  { %v2578_v18 = vsel %vm2570_vm4, %v2296_v60, %v2561_v20  ;;  %v2474_v0 = vmax.f32 %v2472_v6, %v2473_v55  ;;  %v2487_v4 = vmax.f32 %v2485_v51, %v2486_v56  ;;  %v2401_v2 = vmax.f32 %v2063_v61, %v2065_v13 }
 0x4c7   :  { %v2620_v48 = vrot.slane %v2578_v18, 7 }
 0x4c8   :  { %v2475_v9 = vrot.slane %v2474_v0, 2  ;;  %v2488_v33 = vrot.slane %v2487_v4, 2 }
 0x4c9   :  { %v2621_v40 = vsel %vm2588_vm5, %v2620_v48, %v4200_v16  ;;  %v1990_v16 = vpop.f32.mrf.mxu2 }
 0x4ca   :  { %v2622_v14 = vsel %vm2590_vm6, %v2620_v48, %v2621_v40  ;;  %v2476_v15 = vmax.f32 %v2474_v0, %v2475_v9  ;;  %v2489_v52 = vmax.f32 %v2487_v4, %v2488_v33  ;;  %v1991_v43 = vadd.f32 %v1990_v16, %v4031_v57 }
 0x4cb   :  { %v2067_v59 = vpop.f32.mrf.mxu3 }
 0x4cc   :  { %v2477_v38 = vrot.slane %v2476_v15, 1  ;;  %v2490_v21 = vrot.slane %v2489_v52, 1  ;;  %v2068_v22 = vadd.f32 %v2067_v59, %v4140_v26  ;;  %v2394_v50 = vmax.f32 %v4195_v5, %v1991_v43 }
 0x4ce   :  { %v2491_v1 = vmax.f32 %v2489_v52, %v2490_v21  ;;  %v2402_v32 = vmax.f32 %v2401_v2, %v2068_v22  ;;  %v2478_v23 = vmax.f32 %v2476_v15, %v2477_v38  ;;  %v2395_v44 = vrot.slane %v2394_v50, 4 }
 0x4d0   :  { %v2568_v62 = vrot.slane %v2491_v1, 4  ;;  %v2396_v46 = vmax.f32 %v2394_v50, %v2395_v44 }
 0x4d1   :  { %v1993_v24 = vpop.f32.mrf.mxu2 }
 0x4d2   :  { %v2585_v63 = vsel %vm2570_vm4, %v2478_v23, %v2568_v62  ;;  %v2397_v42 = vrot.slane %v2396_v46, 2  ;;  %v1994_v52 = vadd.f32 %v1993_v24, %v4031_v57 }
 0x4d3   :  { %v2617_v31 = vrot.slane %v2585_v63, 5  ;;  %v2069_v37 = vpop.f32.mrf.mxu3 }
 0x4d4   :  { %v2070_v34 = vadd.f32 %v2069_v37, %v4140_v26  ;;  %v2398_v54 = vmax.f32 %v2396_v46, %v2397_v42 }
 0x4d5   :  { %v2618_v27 = vsel %vm2598_vm9, %v2617_v31, %v4209_v39 }
 0x4d6   :  { %v2403_v58 = vmax.f32 %v2402_v32, %v2070_v34  ;;  %v2619_v17 = vsel %vm2600_vm10, %v2617_v31, %v2618_v27  ;;  %v2399_v60 = vrot.slane %v2398_v54, 1 }
 0x4d7   :  { %2635 = vst [vmem:[#allocation5 + $0x10] sm:$0xff] %v2619_v17 }
 0x4d8   :  { %v2400_v20 = vmax.f32 %v2398_v54, %v2399_v60 }
 0x4d9   :  { %v1995_v35 = vpop.f32.mrf.mxu2 }
 0x4da   :  { %v1996_v15 = vadd.f32 %v1995_v35, %v4031_v57 }
 0x4db   :  { %v2072_v25 = vpop.f32.mrf.mxu3 }
 0x4dc   :  { %v2073_v10 = vadd.f32 %v2072_v25, %v4140_v26  ;;  %v2492_v38 = vmax.f32 %v1994_v52, %v1996_v15 }
 0x4de   :  { %v2404_v3 = vmax.f32 %v2403_v58, %v2073_v10 }
 0x4e1   :  { %v1998_v47 = vpop.f32.mrf.mxu2 }
 0x4e2   :  { %v1999_v59 = vadd.f32 %v1998_v47, %v4031_v57 }
 0x4e3   :  { %v2074_v29 = vpop.f32.mrf.mxu3 }
 0x4e4   :  { %v2075_v12 = vadd.f32 %v2074_v29, %v4140_v26  ;;  %v2493_v22 = vmax.f32 %v2492_v38, %v1999_v59 }
 0x4e6   :  { %v2405_v45 = vmax.f32 %v2404_v3, %v2075_v12 }
 0x4e9   :  { %v2000_v6 = vpop.f32.mrf.mxu2 }
 0x4ea   :  { %v2001_v21 = vadd.f32 %v2000_v6, %v4031_v57 }
 0x4eb   :  { %v2077_v30 = vpop.f32.mrf.mxu3 }
 0x4ec   :  { %v2078_v39 = vadd.f32 %v2077_v30, %v4140_v26  ;;  %v2494_v32 = vmax.f32 %v2493_v22, %v2001_v21 }
 0x4ee   :  { %v2406_v11 = vmax.f32 %v2405_v45, %v2078_v39 }
 0x4f1   :  { %v2003_v13 = vpop.f32.mrf.mxu2 }
 0x4f2   :  { %v2004_v1 = vadd.f32 %v2003_v13, %v4031_v57 }
 0x4f3   :  { %v2079_v36 = vpop.f32.mrf.mxu3 }
 0x4f4   :  { %v2080_v49 = vadd.f32 %v2079_v36, %v4140_v26  ;;  %v2495_v63 = vmax.f32 %v2494_v32, %v2004_v1 }
 0x4f6   :  { %v2407_v19 = vmax.f32 %v2406_v11, %v2080_v49 }
 0x4f8   :  { %v2408_v53 = vrot.slane %v2407_v19, 4 }
 0x4f9   :  { %v2005_v48 = vpop.f32.mrf.mxu2 }
 0x4fa   :  { %v2409_v7 = vmax.f32 %v2407_v19, %v2408_v53  ;;  %v2006_v23 = vadd.f32 %v2005_v48, %v4031_v57 }
 0x4fb   :  { %v2082_v28 = vpop.f32.mrf.mxu3 }
 0x4fc   :  { %v2410_v8 = vrot.slane %v2409_v7, 2  ;;  %v2496_v34 = vmax.f32 %v2495_v63, %v2006_v23  ;;  %v2083_v27 = vadd.f32 %v2082_v28, %v4140_v26 }
 0x4fe   :  { %v2411_v51 = vmax.f32 %v2409_v7, %v2410_v8 }
 0x500   :  { %v2412_v5 = vrot.slane %v2411_v51, 1 }
 0x501   :  { %v2008_v33 = vpop.f32.mrf.mxu2 }
 0x502   :  { %v2413_v61 = vmax.f32 %v2411_v51, %v2412_v5  ;;  %v2009_v31 = vadd.f32 %v2008_v33, %v4031_v57 }
 0x503   :  { %v2084_v41 = vpop.f32.mrf.mxu3 }
 0x504   :  { %v2565_v55 = vrot.slane %v2413_v61, 4  ;;  %v2085_v37 = vadd.f32 %v2084_v41, %v4140_v26  ;;  %v2497_v17 = vmax.f32 %v2496_v34, %v2009_v31 }
 0x506   :  { %v2582_v56 = vsel %vm2570_vm4, %v2400_v20, %v2565_v55  ;;  %v2505_v25 = vmax.f32 %v2083_v27, %v2085_v37 }
 0x507   :  { %v2623_v18 = vrot.slane %v2582_v56, 6 }
 0x509   :  { %v2624_v0 = vsel %vm2593_vm7, %v2623_v18, %v2622_v14  ;;  %v2010_v62 = vpop.f32.mrf.mxu2 }
 0x50a   :  { %v2625_v4 = vsel %vm2595_vm8, %v2623_v18, %v2624_v0  ;;  %v2011_v16 = vadd.f32 %v2010_v62, %v4031_v57 }
 0x50b   :  { %v2087_v2 = vpop.f32.mrf.mxu3 }
 0x50c   :  { %v2088_v58 = vadd.f32 %v2087_v2, %v4140_v26  ;;  %v2498_v24 = vmax.f32 %v2497_v17, %v2011_v16 }
 0x50e   :  { %v2506_v29 = vmax.f32 %v2505_v25, %v2088_v58  ;;  %v2499_v35 = vrot.slane %v2498_v24, 4 }
 0x510   :  { %v2500_v11 = vmax.f32 %v2498_v24, %v2499_v35 }
 0x512   :  { %v2501_v46 = vrot.slane %v2500_v11, 2 }
 0x513   :  { %v2089_v9 = vpop.f32.mrf.mxu3 }
 0x514   :  { %v2090_v10 = vadd.f32 %v2089_v9, %v4140_v26  ;;  %v2502_v42 = vmax.f32 %v2500_v11, %v2501_v46 }
 0x516   :  { %v2507_v45 = vmax.f32 %v2506_v29, %v2090_v10  ;;  %v2503_v28 = vrot.slane %v2502_v42, 1 }
 0x518   :  { %v2504_v6 = vmax.f32 %v2502_v42, %v2503_v28 }
 0x51b   :  { %v2092_v40 = vpop.f32.mrf.mxu3 }
 0x51c   :  { %v2093_v12 = vadd.f32 %v2092_v40, %v4140_v26 }
 0x51e   :  { %v2508_v30 = vmax.f32 %v2507_v45, %v2093_v12 }
 0x523   :  { %v2094_v14 = vpop.f32.mrf.mxu3 }
 0x524   :  { %v2095_v43 = vadd.f32 %v2094_v14, %v4140_v26 }
 0x526   :  { %v2509_v50 = vmax.f32 %v2508_v30, %v2095_v43 }
 0x52b   :  { %v2097_v3 = vpop.f32.mrf.mxu3 }
 0x52c   :  { %v2098_v57 = vadd.f32 %v2097_v3, %v4140_v26 }
 0x52e   :  { %v2510_v44 = vmax.f32 %v2509_v50, %v2098_v57 }
 0x533   :  { %v2099_v39 = vpop.f32.mrf.mxu3 }
 0x534   :  { %v2100_v47 = vadd.f32 %v2099_v39, %v4140_v26 }
 0x536   :  { %v2511_v36 = vmax.f32 %v2510_v44, %v2100_v47 }
 0x538   :  { %v2512_v49 = vrot.slane %v2511_v36, 4 }
 0x53a   :  { %v2513_v19 = vmax.f32 %v2511_v36, %v2512_v49 }
 0x53c   :  { %v2514_v53 = vrot.slane %v2513_v19, 2 }
 0x53e   :  { %v2515_v7 = vmax.f32 %v2513_v19, %v2514_v53 }
 0x540   :  { %v2516_v54 = vrot.slane %v2515_v7, 1 }
 0x542   :  { %v2517_v8 = vmax.f32 %v2515_v7, %v2516_v54 }
 0x544   :  { %v2569_v51 = vrot.slane %v2517_v8, 4 }
 0x546   :  { %v2586_v60 = vsel %vm2570_vm4, %v2504_v6, %v2569_v51 }
 0x547   :  { %v2626_v26 = vrot.slane %v2586_v60, 5 }
 0x549   :  { %v2627_v5 = vsel %vm2598_vm9, %v2626_v26, %v2625_v4 }
 0x54a   :  { %v2628_v61 = vsel %vm2600_vm10, %v2626_v26, %v2627_v5 }
 0x54b   :  { %2636 = vst [vmem:[#allocation5 + $0x18] sm:$0xff] %v2628_v61 }
 0x54c   :  { %2774 = dma.vmem_to_hbm [thread:$0]  %s2770_s30, 512, %s2772_s1, [#allocation4]  }
 0x54d   :  { %3291 = dma.done.wait [#allocation4], 512  }
 0x54e   :  { %3292 = vsyncadd [#allocation4], 4294966784 }
 0x54f   :  { %2779 = vsyncpa [#allocation3], 1 }
 0x550   :  { %2780 = vsyncpa [#allocation4], 1 }

</bundles_post_ra>
